<compile_context>
chip_gen: v6e
topology: v6e:2x2x1
jax: 0.10.0
libtpu: 0.0.40
codegen_flags: <defaults>
</compile_context>

<pallas_src>
import jax
import jax.numpy as jnp
from jax import lax
from jax.experimental import pallas as pl
from jax.experimental.pallas import tpu as pltpu

MM_TM = 256      # matmul M tile (feedback: 256-512)
MM_TK = 512      # matmul K tile (used only when K is a multiple of it)
ELEM_TM = 512    # elementwise row tile
EPS = 1e-5
VMEM_LIMIT = 64 * 1024 * 1024


# --------------------------------------------------------------------------
# Pallas kernels
# --------------------------------------------------------------------------
def _mm_kernel(a_ref, b_ref, o_ref, acc_ref):
    """o = a @ b; bf16 MXU operands, f32 accumulation over the K grid axis."""
    @pl.when(pl.program_id(1) == 0)
    def _():
        acc_ref[...] = jnp.zeros_like(acc_ref)

    acc_ref[...] += jnp.dot(a_ref[...], b_ref[...],
                            preferred_element_type=jnp.float32)

    @pl.when(pl.program_id(1) == pl.num_programs(1) - 1)
    def _():
        o_ref[...] = acc_ref[...].astype(o_ref.dtype)


def _mm_bnrelu_kernel(a_ref, scale_ref, shift_ref, b_ref, o_ref, acc_ref):
    """o = relu(a*scale + shift) @ b — pre-activation BN+ReLU fused as a per-K-column
    prologue (exact for 1x1 convs; exact for im2col'd KxK convs with per-tap-replicated
    scale/shift and BN-neutral pad values). Prologue math in f32 (v5e has no bf16 VALU)."""
    @pl.when(pl.program_id(1) == 0)
    def _():
        acc_ref[...] = jnp.zeros_like(acc_ref)

    a = jnp.maximum(a_ref[...].astype(jnp.float32) * scale_ref[...] + shift_ref[...], 0.0)
    acc_ref[...] += jnp.dot(a.astype(jnp.bfloat16), b_ref[...],
                            preferred_element_type=jnp.float32)

    @pl.when(pl.program_id(1) == pl.num_programs(1) - 1)
    def _():
        o_ref[...] = acc_ref[...].astype(o_ref.dtype)


def _scale_shift_relu_kernel(x_ref, scale_ref, shift_ref, o_ref):
    y = jnp.maximum(x_ref[...].astype(jnp.float32) * scale_ref[...] + shift_ref[...], 0.0)
    o_ref[...] = y.astype(o_ref.dtype)


# --------------------------------------------------------------------------
# Kernel wrappers
# --------------------------------------------------------------------------
def pallas_matmul(a, b, scale=None, shift=None):
    """a: (M, K) activation (cast to bf16), b: (K, N) bf16 weight -> (M, N) bf16.
    If scale/shift (length K, f32) are given, computes relu(a*scale+shift) @ b."""
    M, K = a.shape
    Kb, N = b.shape
    assert K == Kb
    a = a.astype(jnp.bfloat16)
    b = b.astype(jnp.bfloat16)

    Mp = M if M % 8 == 0 else (M + 7) // 8 * 8
    if Mp != M:
        a = jnp.pad(a, ((0, Mp - M), (0, 0)))

    bm = min(MM_TM, Mp)
    # v7x: make sure the "parallel" M axis has >= 2 blocks so both TCs get work.
    if pl.cdiv(Mp, bm) < 2 and Mp % 32 == 0:
        bm = Mp // 2
    bk = MM_TK if (K % MM_TK == 0) else K   # full-K block for ragged K: no pad copies
    grid = (pl.cdiv(Mp, bm), pl.cdiv(K, bk))

    a_spec = pl.BlockSpec((bm, bk), lambda i, kk: (i, kk))
    b_spec = pl.BlockSpec((bk, N), lambda i, kk: (kk, 0))
    o_spec = pl.BlockSpec((bm, N), lambda i, kk: (i, 0))
    scratch = [pltpu.VMEM((bm, N), jnp.float32)]
    cparams = pltpu.CompilerParams(
        dimension_semantics=("parallel", "arbitrary"),
        vmem_limit_bytes=VMEM_LIMIT)

    if scale is None:
        out = pl.pallas_call(
            _mm_kernel,
            out_shape=jax.ShapeDtypeStruct((Mp, N), jnp.bfloat16),
            grid_spec=pltpu.PrefetchScalarGridSpec(
                num_scalar_prefetch=0, grid=grid,
                in_specs=[a_spec, b_spec], out_specs=o_spec,
                scratch_shapes=scratch),
            compiler_params=cparams,
        )(a, b)
    else:
        sc = scale.reshape(1, K).astype(jnp.float32)
        sh = shift.reshape(1, K).astype(jnp.float32)
        s_spec = pl.BlockSpec((1, bk), lambda i, kk: (0, kk))
        out = pl.pallas_call(
            _mm_bnrelu_kernel,
            out_shape=jax.ShapeDtypeStruct((Mp, N), jnp.bfloat16),
            grid_spec=pltpu.PrefetchScalarGridSpec(
                num_scalar_prefetch=0, grid=grid,
                in_specs=[a_spec, s_spec, s_spec, b_spec], out_specs=o_spec,
                scratch_shapes=scratch),
            compiler_params=cparams,
        )(a, sc, sh, b)
    return out if Mp == M else out[:M]


def pallas_scale_shift_relu(x2d, scale, shift):
    """relu(x * scale + shift) with per-channel scale/shift. x2d: (M, C) -> bf16."""
    M, C = x2d.shape
    bm = min(ELEM_TM, M)
    return pl.pallas_call(
        _scale_shift_relu_kernel,
        out_shape=jax.ShapeDtypeStruct((M, C), jnp.bfloat16),
        grid_spec=pltpu.PrefetchScalarGridSpec(
            num_scalar_prefetch=0, grid=(pl.cdiv(M, bm),),
            in_specs=[pl.BlockSpec((bm, C), lambda i: (i, 0)),
                      pl.BlockSpec((1, C), lambda i: (0, 0)),
                      pl.BlockSpec((1, C), lambda i: (0, 0))],
            out_specs=pl.BlockSpec((bm, C), lambda i: (i, 0))),
        compiler_params=pltpu.CompilerParams(
            dimension_semantics=("parallel",), vmem_limit_bytes=VMEM_LIMIT),
    )(x2d.astype(jnp.bfloat16),
      scale.reshape(1, C).astype(jnp.float32),
      shift.reshape(1, C).astype(jnp.float32))


# --------------------------------------------------------------------------
# Layer helpers (glue in plain JAX, hot path in Pallas)
# --------------------------------------------------------------------------
def slab_stats(t):
    """Training-mode BN batch stats (biased var) of an NHWC slab -> (mean, rsqrt(var+eps))."""
    tf = t.astype(jnp.float32)
    mean = jnp.mean(tf, axis=(0, 1, 2))
    var = jnp.var(tf, axis=(0, 1, 2))
    return mean, lax.rsqrt(var + EPS)


def conv_im2col(x, w2d, kh, kw, stride=1, padding=0, bn_scale=None, bn_shift=None):
    """x: NHWC bf16; w2d: (kh*kw*Ci, Co) bf16, tap-major / channel-minor ordering.
    If bn_scale/bn_shift (per input channel) are given, the pre-activation BN+ReLU is
    fused into the matmul prologue and the pad ring uses a per-channel value whose
    fused activation is exactly 0 (pad-after-ReLU semantics)."""
    # TODO(synk): gather the kh*kw shifted windows inside the kernel (halo / Element
    # BlockSpec) to avoid materializing the kh*kw-expanded im2col activation in HBM.
    N, H, W, C = x.shape
    Ho = (H + 2 * padding - kh) // stride + 1
    Wo = (W + 2 * padding - kw) // stride + 1
    if padding:
        if bn_scale is None:
            x = jnp.pad(x, ((0, 0), (padding, padding), (padding, padding), (0, 0)))
        else:
            # relu(v*scale + shift) == 0 with margin -(|shift|+1) (robust to bf16 rounding).
            safe = jnp.where(bn_scale == 0, 1.0, bn_scale)
            pad_val = jnp.where(bn_scale == 0, 0.0,
                                (-(jnp.abs(bn_shift) + 1.0) - bn_shift) / safe)
            xp = jnp.broadcast_to(pad_val.astype(x.dtype),
                                  (N, H + 2 * padding, W + 2 * padding, C))
            x = lax.dynamic_update_slice(xp, x, (0, padding, padding, 0))
    patches = [x[:, dy:dy + stride * Ho:stride, dx:dx + stride * Wo:stride, :]
               for dy in range(kh) for dx in range(kw)]
    a = jnp.stack(patches, axis=3).reshape(N * Ho * Wo, kh * kw * C)
    col_scale = None if bn_scale is None else jnp.tile(bn_scale, kh * kw)
    col_shift = None if bn_shift is None else jnp.tile(bn_shift, kh * kw)
    out = pallas_matmul(a, w2d, col_scale, col_shift)
    return out.reshape(N, Ho, Wo, w2d.shape[1])


def maxpool_3x3_s2_p1(x):
    # TODO(synk): pooling stays in plain JAX (reduce_window); not the FLOP hot path.
    return lax.reduce_window(
        x, jnp.array(-jnp.inf, x.dtype), lax.max,
        window_dimensions=(1, 3, 3, 1), window_strides=(1, 2, 2, 1),
        padding=((0, 0), (1, 1), (1, 1), (0, 0)))


def avgpool_2x2(x):
    N, H, W, C = x.shape
    xf = x.astype(jnp.float32).reshape(N, H // 2, 2, W // 2, 2, C)
    return xf.mean(axis=(2, 4)).astype(jnp.bfloat16)


# --------------------------------------------------------------------------
# Parameter init (deterministic, mirrors the torch module's shapes)
# --------------------------------------------------------------------------
def init_densenet_params(key, num_block_list, k, reduction, num_class):
    keys = iter(jax.random.split(key, 1024))

    def conv_w(co, ci, kh, kw, pad_ci_to=None):
        fan_in = ci * kh * kw
        w = jax.random.normal(next(keys), (co, ci, kh, kw), jnp.float32)
        w = w * (2.0 / fan_in) ** 0.5
        # (Co,Ci,kh,kw) -> (kh,kw,Ci,Co) -> (kh*kw*Ci, Co): tap-major, channel-minor
        # — matches the im2col column ordering.
        w2 = jnp.transpose(w, (2, 3, 1, 0)).reshape(kh * kw * ci, co)
        if pad_ci_to is not None and pad_ci_to > ci:     # 1x1 conv K padding
            w2 = jnp.pad(w2, ((0, pad_ci_to - ci), (0, 0)))
        return w2.astype(jnp.bfloat16)

    def bn_p(c):
        return (jnp.ones((c,), jnp.float32), jnp.zeros((c,), jnp.float32))

    params = {}
    inner = 2 * k
    params["stem_w"] = conv_w(inner, 3, 7, 7)
    params["stem_bn"] = bn_p(inner)

    stages = []
    for si, nb in enumerate(num_block_list):
        c0 = inner
        cf = c0 + nb * k
        layers = []
        cur = c0
        for _ in range(nb):
            layers.append({
                "bn1": bn_p(cur),
                "w1": conv_w(4 * k, cur, 1, 1, pad_ci_to=cf),  # K padded to buffer width
                "bn2": bn_p(4 * k),
                "w2": conv_w(k, 4 * k, 3, 3),
            })
            cur += k
        inner = cf
        stage = {"dense": layers}
        if si != len(num_block_list) - 1:
            out_ch = int(reduction * inner)
            stage["trans"] = {"bn": bn_p(inner), "w": conv_w(out_ch, inner, 1, 1)}
            inner = out_ch
        stages.append(stage)
    params["stages"] = stages
    params["final_bn"] = bn_p(inner)

    bound = 1.0 / (inner ** 0.5)
    params["linear_w"] = jax.random.uniform(
        next(keys), (num_class, inner), jnp.float32, -bound, bound).T
    params["linear_b"] = jax.random.uniform(
        next(keys), (num_class,), jnp.float32, -bound, bound)
    return params


# --------------------------------------------------------------------------
# Forward pass (matches the PyTorch DenseNet.forward, train-mode BN)
# --------------------------------------------------------------------------
def dense_stage(x, layers):
    """Bottleneck layers; channel concat done in-place into one preallocated buffer.
    Per-channel BN stats are cached per slab (written channels never change), so no
    full-buffer stats pass is needed for bn1 / transition BN / final BN."""
    N, H, W, C0 = x.shape
    k = layers[0]["w2"].shape[1]
    Cf = C0 + len(layers) * k
    buf = jnp.zeros((N, H, W, Cf), jnp.bfloat16)
    # TODO(synk): per-layer dynamic_update_slice may copy the buffer; aliasing conv2's
    # output into buf needs a k-wide lane-offset store BlockSpec (k << 128), left to XLA.
    buf = lax.dynamic_update_slice(buf, x.astype(jnp.bfloat16), (0, 0, 0, 0))
    mean_c = jnp.zeros((Cf,), jnp.float32)
    inv_c = jnp.zeros((Cf,), jnp.float32)
    m0, i0 = slab_stats(x)
    mean_c = mean_c.at[:C0].set(m0)
    inv_c = inv_c.at[:C0].set(i0)

    cur = C0
    for layer in layers:
        g1, b1 = layer["bn1"]
        s1 = g1 * inv_c[:cur]
        scale = jnp.zeros((Cf,), jnp.float32).at[:cur].set(s1)
        shift = jnp.zeros((Cf,), jnp.float32).at[:cur].set(b1 - mean_c[:cur] * s1)
        # BN1 + ReLU + 1x1 conv fused in one Pallas call; scale/shift are zero beyond
        # `cur` and w1 rows beyond `cur` are zero, so the unwritten tail is inert.
        y = pallas_matmul(buf.reshape(-1, Cf), layer["w1"], scale, shift)
        y = y.reshape(N, H, W, layer["w1"].shape[1])

        # BN2 + ReLU fused into the 3x3 conv (per-tap-replicated scale/shift).
        g2, b2 = layer["bn2"]
        m2, i2 = slab_stats(y)
        s2 = g2 * i2
        sh2 = b2 - m2 * s2
        r = conv_im2col(y, layer["w2"], 3, 3, stride=1, padding=1,
                        bn_scale=s2, bn_shift=sh2)

        buf = lax.dynamic_update_slice(buf, r, (0, 0, 0, cur))
        mr, ir = slab_stats(r)
        mean_c = mean_c.at[cur:cur + k].set(mr)
        inv_c = inv_c.at[cur:cur + k].set(ir)
        cur += k
    return buf, mean_c, inv_c


@jax.jit
def densenet_forward(params, x_nchw):
    x = jnp.transpose(x_nchw, (0, 2, 3, 1)).astype(jnp.bfloat16)  # NCHW -> NHWC, bf16

    # conv1: Conv7x7/s2/p3 -> BN -> ReLU -> MaxPool3x3/s2/p1
    x = conv_im2col(x, params["stem_w"], 7, 7, stride=2, padding=3)
    gs, bs = params["stem_bn"]
    ms, is_ = slab_stats(x)
    s = gs * is_
    N, H, W, C = x.shape
    x = pallas_scale_shift_relu(x.reshape(-1, C), s, bs - ms * s).reshape(N, H, W, C)
    x = maxpool_3x3_s2_p1(x)

    # features: dense blocks + transitions (BN stats reused from the slab cache)
    mean_c = inv_c = None
    for stage in params["stages"]:
        x, mean_c, inv_c = dense_stage(x, stage["dense"])
        if "trans" in stage:
            gt, bt = stage["trans"]["bn"]
            st = gt * inv_c
            N, H, W, C = x.shape
            x = pallas_matmul(x.reshape(-1, C), stage["trans"]["w"],
                              st, bt - mean_c * st).reshape(N, H, W, -1)  # BN+ReLU+1x1 fused
            x = avgpool_2x2(x)

    gf, bfb = params["final_bn"]
    sf = gf * inv_c
    N, H, W, C = x.shape
    x = pallas_scale_shift_relu(x.reshape(-1, C), sf, bfb - mean_c * sf).reshape(N, H, W, C)

    feats = jnp.mean(x.astype(jnp.float32), axis=(1, 2))   # AdaptiveAvgPool2d + flatten
    # TODO(synk): tiny (batch x classes) head left to XLA per perf feedback (launch
    # overhead would exceed compute for a Pallas call here).
    return feats @ params["linear_w"] + params["linear_b"]


if __name__ == "__main__":
    # Small config consistent with the module: DenseNet([2,2,2], growth_rate=4,
    # reduction=0.5, num_class=10) on a 2x3x32x32 input.
    key = jax.random.PRNGKey(0)
    kp, kx = jax.random.split(key)
    num_block_list, k, reduction, num_class = [2, 2, 2], 4, 0.5, 10
    params = init_densenet_params(kp, num_block_list, k, reduction, num_class)

    x = jax.random.normal(kx, (2, 3, 32, 32), jnp.float32)
    out = jax.block_until_ready(densenet_forward(params, x))
    assert out.shape == (2, num_class), out.shape
    assert jnp.all(jnp.isfinite(out))
    print("KERNEL_OK")
</pallas_src>

<mosaic_0001>
module attributes {stable_mosaic.version = 11 : i64} {
  func.func @_mm_kernel(%arg0: i32, %arg1: i32, %arg2: memref<256x147xbf16, #tpu.memory_space<vmem>>, %arg3: memref<147x8xbf16, #tpu.memory_space<vmem>>, %arg4: memref<256x8xbf16, #tpu.memory_space<vmem>>, %arg5: memref<256x8xf32, #tpu.memory_space<vmem>>) attributes {dimension_semantics = [#tpu.dimension_semantics<parallel>, #tpu.dimension_semantics<arbitrary>], iteration_bounds = array<i64: 2, 1>, scalar_prefetch = 0 : i64, scratch_operands = 1 : i64, tpu.core_type = #tpu.core_type<tc>, window_params = [{transform_indices = @transform_0, window_bounds = array<i64: 256, 147>}, {transform_indices = @transform_1, window_bounds = array<i64: 147, 8>}, {transform_indices = @transform_2, window_bounds = array<i64: 256, 8>}]} {
    %c0_i32 = arith.constant 0 : i32
    %0 = arith.cmpi eq, %arg1, %c0_i32 : i32
    %1 = arith.extui %0 : i1 to i32
    %c0_i32_0 = arith.constant 0 : i32
    %2 = arith.cmpi ne, %1, %c0_i32_0 : i32
    scf.if %2 {
      %cst_10 = arith.constant 0.000000e+00 : f32
      %12 = vector.broadcast %cst_10 : f32 to vector<256x8xf32>
      %c0_11 = arith.constant 0 : index
      %c0_12 = arith.constant 0 : index
      %13 = vector.load %arg5[%c0_11, %c0_12] : memref<256x8xf32, #tpu.memory_space<vmem>>, vector<256x8xf32>
      tpu.vector_store %arg5[%c0_11, %c0_12], %12 {strides = array<i32>} : memref<256x8xf32, #tpu.memory_space<vmem>>, vector<256x8xf32>,
    } else {
    }
    %c0 = arith.constant 0 : index
    %c0_1 = arith.constant 0 : index
    %3 = vector.load %arg5[%c0, %c0_1] : memref<256x8xf32, #tpu.memory_space<vmem>>, vector<256x8xf32>
    %c0_2 = arith.constant 0 : index
    %c0_3 = arith.constant 0 : index
    %4 = vector.load %arg2[%c0_2, %c0_3] : memref<256x147xbf16, #tpu.memory_space<vmem>>, vector<256x147xbf16>
    %c0_4 = arith.constant 0 : index
    %c0_5 = arith.constant 0 : index
    %5 = vector.load %arg3[%c0_4, %c0_5] : memref<147x8xbf16, #tpu.memory_space<vmem>>, vector<147x8xbf16>
    %cst = arith.constant dense<0.000000e+00> : vector<256x8xf32>
    %6 = tpu.matmul %4, %5, %cst {dimension_numbers = #tpu.dot_dimension_numbers<[1], [0], [0], [1], [0, 0, 1, 1], [], []>} : vector<256x147xbf16>, vector<147x8xbf16>, vector<256x8xf32> -> vector<256x8xf32>
    %7 = arith.addf %3, %6 : vector<256x8xf32>
    %c0_6 = arith.constant 0 : index
    %c0_7 = arith.constant 0 : index
    %8 = vector.load %arg5[%c0_6, %c0_7] : memref<256x8xf32, #tpu.memory_space<vmem>>, vector<256x8xf32>
    tpu.vector_store %arg5[%c0_6, %c0_7], %7 {strides = array<i32>} : memref<256x8xf32, #tpu.memory_space<vmem>>, vector<256x8xf32>,
    %c0_i32_8 = arith.constant 0 : i32
    %9 = arith.cmpi eq, %arg1, %c0_i32_8 : i32
    %10 = arith.extui %9 : i1 to i32
    %c0_i32_9 = arith.constant 0 : i32
    %11 = arith.cmpi ne, %10, %c0_i32_9 : i32
    scf.if %11 {
      %c0_10 = arith.constant 0 : index
      %c0_11 = arith.constant 0 : index
      %12 = vector.load %arg5[%c0_10, %c0_11] : memref<256x8xf32, #tpu.memory_space<vmem>>, vector<256x8xf32>
      %13 = arith.truncf %12 : vector<256x8xf32> to vector<256x8xbf16>
      %c0_12 = arith.constant 0 : index
      %c0_13 = arith.constant 0 : index
      %14 = vector.load %arg4[%c0_12, %c0_13] : memref<256x8xbf16, #tpu.memory_space<vmem>>, vector<256x8xbf16>
      tpu.vector_store %arg4[%c0_12, %c0_13], %13 {strides = array<i32>} : memref<256x8xbf16, #tpu.memory_space<vmem>>, vector<256x8xbf16>,
    } else {
    }
    return
  }
  func.func @transform_0(%arg0: i32, %arg1: i32) -> (i32, i32) {
    %c0_i32 = arith.constant 0 : i32
    return %arg0, %arg1 : i32, i32
  }
  func.func @transform_1(%arg0: i32, %arg1: i32) -> (i32, i32) {
    %c0_i32 = arith.constant 0 : i32
    %c0_i32_0 = arith.constant 0 : i32
    return %arg1, %c0_i32 : i32, i32
  }
  func.func @transform_2(%arg0: i32, %arg1: i32) -> (i32, i32) {
    %c0_i32 = arith.constant 0 : i32
    %c0_i32_0 = arith.constant 0 : i32
    return %arg0, %c0_i32 : i32, i32
  }
}

module attributes {stable_mosaic.version = 11 : i64} {
  func.func @_scale_shift_relu_kernel(%arg0: i32, %arg1: memref<512x8xbf16, #tpu.memory_space<vmem>>, %arg2: memref<1x8xf32, #tpu.memory_space<vmem>>, %arg3: memref<1x8xf32, #tpu.memory_space<vmem>>, %arg4: memref<512x8xbf16, #tpu.memory_space<vmem>>) attributes {dimension_semantics = [#tpu.dimension_semantics<parallel>], iteration_bounds = array<i64: 1>, scalar_prefetch = 0 : i64, scratch_operands = 0 : i64, tpu.core_type = #tpu.core_type<tc>, window_params = [{transform_indices = @transform_0, window_bounds = array<i64: 512, 8>}, {pipeline_mode = #tpu.pipeline_mode<synchronous>, transform_indices = @transform_1, window_bounds = array<i64: 1, 8>}, {pipeline_mode = #tpu.pipeline_mode<synchronous>, transform_indices = @transform_2, window_bounds = array<i64: 1, 8>}, {transform_indices = @transform_3, window_bounds = array<i64: 512, 8>}]} {
    %c0 = arith.constant 0 : index
    %c0_0 = arith.constant 0 : index
    %0 = vector.load %arg1[%c0, %c0_0] : memref<512x8xbf16, #tpu.memory_space<vmem>>, vector<512x8xbf16>
    %1 = arith.extf %0 : vector<512x8xbf16> to vector<512x8xf32>
    %c0_1 = arith.constant 0 : index
    %c0_2 = arith.constant 0 : index
    %2 = vector.load %arg2[%c0_1, %c0_2] : memref<1x8xf32, #tpu.memory_space<vmem>>, vector<1x8xf32>
    %3 = vector.broadcast %2 : vector<1x8xf32> to vector<512x8xf32>
    %4 = arith.mulf %1, %3 : vector<512x8xf32>
    %c0_3 = arith.constant 0 : index
    %c0_4 = arith.constant 0 : index
    %5 = vector.load %arg3[%c0_3, %c0_4] : memref<1x8xf32, #tpu.memory_space<vmem>>, vector<1x8xf32>
    %6 = vector.broadcast %5 : vector<1x8xf32> to vector<512x8xf32>
    %7 = arith.addf %4, %6 : vector<512x8xf32>
    %cst = arith.constant 0.000000e+00 : f32
    %8 = vector.broadcast %cst : f32 to vector<512x8xf32>
    %9 = arith.maximumf %7, %8 : vector<512x8xf32>
    %10 = arith.truncf %9 : vector<512x8xf32> to vector<512x8xbf16>
    %c0_5 = arith.constant 0 : index
    %c0_6 = arith.constant 0 : index
    %11 = vector.load %arg4[%c0_5, %c0_6] : memref<512x8xbf16, #tpu.memory_space<vmem>>, vector<512x8xbf16>
    tpu.vector_store %arg4[%c0_5, %c0_6], %10 {strides = array<i32>} : memref<512x8xbf16, #tpu.memory_space<vmem>>, vector<512x8xbf16>,
    return
  }
  func.func @transform_0(%arg0: i32) -> (i32, i32) {
    %c0_i32 = arith.constant 0 : i32
    %c0_i32_0 = arith.constant 0 : i32
    return %arg0, %c0_i32 : i32, i32
  }
  func.func @transform_1(%arg0: i32) -> (i32, i32) {
    %c0_i32 = arith.constant 0 : i32
    %c0_i32_0 = arith.constant 0 : i32
    %c0_i32_1 = arith.constant 0 : i32
    return %c0_i32, %c0_i32_0 : i32, i32
  }
  func.func @transform_2(%arg0: i32) -> (i32, i32) {
    %c0_i32 = arith.constant 0 : i32
    %c0_i32_0 = arith.constant 0 : i32
    %c0_i32_1 = arith.constant 0 : i32
    return %c0_i32, %c0_i32_0 : i32, i32
  }
  func.func @transform_3(%arg0: i32) -> (i32, i32) {
    %c0_i32 = arith.constant 0 : i32
    %c0_i32_0 = arith.constant 0 : i32
    return %arg0, %c0_i32 : i32, i32
  }
}

module attributes {stable_mosaic.version = 11 : i64} {
  func.func @_mm_bnrelu_kernel(%arg0: i32, %arg1: i32, %arg2: memref<64x16xbf16, #tpu.memory_space<vmem>>, %arg3: memref<1x16xf32, #tpu.memory_space<vmem>>, %arg4: memref<1x16xf32, #tpu.memory_space<vmem>>, %arg5: memref<16x16xbf16, #tpu.memory_space<vmem>>, %arg6: memref<64x16xbf16, #tpu.memory_space<vmem>>, %arg7: memref<64x16xf32, #tpu.memory_space<vmem>>) attributes {dimension_semantics = [#tpu.dimension_semantics<parallel>, #tpu.dimension_semantics<arbitrary>], iteration_bounds = array<i64: 2, 1>, scalar_prefetch = 0 : i64, scratch_operands = 1 : i64, tpu.core_type = #tpu.core_type<tc>, window_params = [{transform_indices = @transform_0, window_bounds = array<i64: 64, 16>}, {transform_indices = @transform_1, window_bounds = array<i64: 1, 16>}, {transform_indices = @transform_2, window_bounds = array<i64: 1, 16>}, {transform_indices = @transform_3, window_bounds = array<i64: 16, 16>}, {transform_indices = @transform_4, window_bounds = array<i64: 64, 16>}]} {
    %c0_i32 = arith.constant 0 : i32
    %0 = arith.cmpi eq, %arg1, %c0_i32 : i32
    %1 = arith.extui %0 : i1 to i32
    %c0_i32_0 = arith.constant 0 : i32
    %2 = arith.cmpi ne, %1, %c0_i32_0 : i32
    scf.if %2 {
      %cst_15 = arith.constant 0.000000e+00 : f32
      %22 = vector.broadcast %cst_15 : f32 to vector<64x16xf32>
      %c0_16 = arith.constant 0 : index
      %c0_17 = arith.constant 0 : index
      %23 = vector.load %arg7[%c0_16, %c0_17] : memref<64x16xf32, #tpu.memory_space<vmem>>, vector<64x16xf32>
      tpu.vector_store %arg7[%c0_16, %c0_17], %22 {strides = array<i32>} : memref<64x16xf32, #tpu.memory_space<vmem>>, vector<64x16xf32>,
    } else {
    }
    %c0 = arith.constant 0 : index
    %c0_1 = arith.constant 0 : index
    %3 = vector.load %arg2[%c0, %c0_1] : memref<64x16xbf16, #tpu.memory_space<vmem>>, vector<64x16xbf16>
    %4 = arith.extf %3 : vector<64x16xbf16> to vector<64x16xf32>
    %c0_2 = arith.constant 0 : index
    %c0_3 = arith.constant 0 : index
    %5 = vector.load %arg3[%c0_2, %c0_3] : memref<1x16xf32, #tpu.memory_space<vmem>>, vector<1x16xf32>
    %6 = vector.broadcast %5 : vector<1x16xf32> to vector<64x16xf32>
    %7 = arith.mulf %4, %6 : vector<64x16xf32>
    %c0_4 = arith.constant 0 : index
    %c0_5 = arith.constant 0 : index
    %8 = vector.load %arg4[%c0_4, %c0_5] : memref<1x16xf32, #tpu.memory_space<vmem>>, vector<1x16xf32>
    %9 = vector.broadcast %8 : vector<1x16xf32> to vector<64x16xf32>
    %10 = arith.addf %7, %9 : vector<64x16xf32>
    %cst = arith.constant 0.000000e+00 : f32
    %11 = vector.broadcast %cst : f32 to vector<64x16xf32>
    %12 = arith.maximumf %10, %11 : vector<64x16xf32>
    %c0_6 = arith.constant 0 : index
    %c0_7 = arith.constant 0 : index
    %13 = vector.load %arg7[%c0_6, %c0_7] : memref<64x16xf32, #tpu.memory_space<vmem>>, vector<64x16xf32>
    %14 = arith.truncf %12 : vector<64x16xf32> to vector<64x16xbf16>
    %c0_8 = arith.constant 0 : index
    %c0_9 = arith.constant 0 : index
    %15 = vector.load %arg5[%c0_8, %c0_9] : memref<16x16xbf16, #tpu.memory_space<vmem>>, vector<16x16xbf16>
    %cst_10 = arith.constant dense<0.000000e+00> : vector<64x16xf32>
    %16 = tpu.matmul %14, %15, %cst_10 {dimension_numbers = #tpu.dot_dimension_numbers<[1], [0], [0], [1], [0, 0, 1, 1], [], []>} : vector<64x16xbf16>, vector<16x16xbf16>, vector<64x16xf32> -> vector<64x16xf32>
    %17 = arith.addf %13, %16 : vector<64x16xf32>
    %c0_11 = arith.constant 0 : index
    %c0_12 = arith.constant 0 : index
    %18 = vector.load %arg7[%c0_11, %c0_12] : memref<64x16xf32, #tpu.memory_space<vmem>>, vector<64x16xf32>
    tpu.vector_store %arg7[%c0_11, %c0_12], %17 {strides = array<i32>} : memref<64x16xf32, #tpu.memory_space<vmem>>, vector<64x16xf32>,
    %c0_i32_13 = arith.constant 0 : i32
    %19 = arith.cmpi eq, %arg1, %c0_i32_13 : i32
    %20 = arith.extui %19 : i1 to i32
    %c0_i32_14 = arith.constant 0 : i32
    %21 = arith.cmpi ne, %20, %c0_i32_14 : i32
    scf.if %21 {
      %c0_15 = arith.constant 0 : index
      %c0_16 = arith.constant 0 : index
      %22 = vector.load %arg7[%c0_15, %c0_16] : memref<64x16xf32, #tpu.memory_space<vmem>>, vector<64x16xf32>
      %23 = arith.truncf %22 : vector<64x16xf32> to vector<64x16xbf16>
      %c0_17 = arith.constant 0 : index
      %c0_18 = arith.constant 0 : index
      %24 = vector.load %arg6[%c0_17, %c0_18] : memref<64x16xbf16, #tpu.memory_space<vmem>>, vector<64x16xbf16>
      tpu.vector_store %arg6[%c0_17, %c0_18], %23 {strides = array<i32>} : memref<64x16xbf16, #tpu.memory_space<vmem>>, vector<64x16xbf16>,
    } else {
    }
    return
  }
  func.func @transform_0(%arg0: i32, %arg1: i32) -> (i32, i32) {
    %c0_i32 = arith.constant 0 : i32
    return %arg0, %arg1 : i32, i32
  }
  func.func @transform_1(%arg0: i32, %arg1: i32) -> (i32, i32) {
    %c0_i32 = arith.constant 0 : i32
    %c0_i32_0 = arith.constant 0 : i32
    return %c0_i32, %arg1 : i32, i32
  }
  func.func @transform_2(%arg0: i32, %arg1: i32) -> (i32, i32) {
    %c0_i32 = arith.constant 0 : i32
    %c0_i32_0 = arith.constant 0 : i32
    return %c0_i32, %arg1 : i32, i32
  }
  func.func @transform_3(%arg0: i32, %arg1: i32) -> (i32, i32) {
    %c0_i32 = arith.constant 0 : i32
    %c0_i32_0 = arith.constant 0 : i32
    return %arg1, %c0_i32 : i32, i32
  }
  func.func @transform_4(%arg0: i32, %arg1: i32) -> (i32, i32) {
    %c0_i32 = arith.constant 0 : i32
    %c0_i32_0 = arith.constant 0 : i32
    return %arg0, %c0_i32 : i32, i32
  }
}

module attributes {stable_mosaic.version = 11 : i64} {
  func.func @_mm_bnrelu_kernel(%arg0: i32, %arg1: i32, %arg2: memref<64x144xbf16, #tpu.memory_space<vmem>>, %arg3: memref<1x144xf32, #tpu.memory_space<vmem>>, %arg4: memref<1x144xf32, #tpu.memory_space<vmem>>, %arg5: memref<144x4xbf16, #tpu.memory_space<vmem>>, %arg6: memref<64x4xbf16, #tpu.memory_space<vmem>>, %arg7: memref<64x4xf32, #tpu.memory_space<vmem>>) attributes {dimension_semantics = [#tpu.dimension_semantics<parallel>, #tpu.dimension_semantics<arbitrary>], iteration_bounds = array<i64: 2, 1>, scalar_prefetch = 0 : i64, scratch_operands = 1 : i64, tpu.core_type = #tpu.core_type<tc>, window_params = [{transform_indices = @transform_0, window_bounds = array<i64: 64, 144>}, {transform_indices = @transform_1, window_bounds = array<i64: 1, 144>}, {transform_indices = @transform_2, window_bounds = array<i64: 1, 144>}, {transform_indices = @transform_3, window_bounds = array<i64: 144, 4>}, {transform_indices = @transform_4, window_bounds = array<i64: 64, 4>}]} {
    %c0_i32 = arith.constant 0 : i32
    %0 = arith.cmpi eq, %arg1, %c0_i32 : i32
    %1 = arith.extui %0 : i1 to i32
    %c0_i32_0 = arith.constant 0 : i32
    %2 = arith.cmpi ne, %1, %c0_i32_0 : i32
    scf.if %2 {
      %cst_15 = arith.constant 0.000000e+00 : f32
      %22 = vector.broadcast %cst_15 : f32 to vector<64x4xf32>
      %c0_16 = arith.constant 0 : index
      %c0_17 = arith.constant 0 : index
      %23 = vector.load %arg7[%c0_16, %c0_17] : memref<64x4xf32, #tpu.memory_space<vmem>>, vector<64x4xf32>
      tpu.vector_store %arg7[%c0_16, %c0_17], %22 {strides = array<i32>} : memref<64x4xf32, #tpu.memory_space<vmem>>, vector<64x4xf32>,
    } else {
    }
    %c0 = arith.constant 0 : index
    %c0_1 = arith.constant 0 : index
    %3 = vector.load %arg2[%c0, %c0_1] : memref<64x144xbf16, #tpu.memory_space<vmem>>, vector<64x144xbf16>
    %4 = arith.extf %3 : vector<64x144xbf16> to vector<64x144xf32>
    %c0_2 = arith.constant 0 : index
    %c0_3 = arith.constant 0 : index
    %5 = vector.load %arg3[%c0_2, %c0_3] : memref<1x144xf32, #tpu.memory_space<vmem>>, vector<1x144xf32>
    %6 = vector.broadcast %5 : vector<1x144xf32> to vector<64x144xf32>
    %7 = arith.mulf %4, %6 : vector<64x144xf32>
    %c0_4 = arith.constant 0 : index
    %c0_5 = arith.constant 0 : index
    %8 = vector.load %arg4[%c0_4, %c0_5] : memref<1x144xf32, #tpu.memory_space<vmem>>, vector<1x144xf32>
    %9 = vector.broadcast %8 : vector<1x144xf32> to vector<64x144xf32>
    %10 = arith.addf %7, %9 : vector<64x144xf32>
    %cst = arith.constant 0.000000e+00 : f32
    %11 = vector.broadcast %cst : f32 to vector<64x144xf32>
    %12 = arith.maximumf %10, %11 : vector<64x144xf32>
    %c0_6 = arith.constant 0 : index
    %c0_7 = arith.constant 0 : index
    %13 = vector.load %arg7[%c0_6, %c0_7] : memref<64x4xf32, #tpu.memory_space<vmem>>, vector<64x4xf32>
    %14 = arith.truncf %12 : vector<64x144xf32> to vector<64x144xbf16>
    %c0_8 = arith.constant 0 : index
    %c0_9 = arith.constant 0 : index
    %15 = vector.load %arg5[%c0_8, %c0_9] : memref<144x4xbf16, #tpu.memory_space<vmem>>, vector<144x4xbf16>
    %cst_10 = arith.constant dense<0.000000e+00> : vector<64x4xf32>
    %16 = tpu.matmul %14, %15, %cst_10 {dimension_numbers = #tpu.dot_dimension_numbers<[1], [0], [0], [1], [0, 0, 1, 1], [], []>} : vector<64x144xbf16>, vector<144x4xbf16>, vector<64x4xf32> -> vector<64x4xf32>
    %17 = arith.addf %13, %16 : vector<64x4xf32>
    %c0_11 = arith.constant 0 : index
    %c0_12 = arith.constant 0 : index
    %18 = vector.load %arg7[%c0_11, %c0_12] : memref<64x4xf32, #tpu.memory_space<vmem>>, vector<64x4xf32>
    tpu.vector_store %arg7[%c0_11, %c0_12], %17 {strides = array<i32>} : memref<64x4xf32, #tpu.memory_space<vmem>>, vector<64x4xf32>,
    %c0_i32_13 = arith.constant 0 : i32
    %19 = arith.cmpi eq, %arg1, %c0_i32_13 : i32
    %20 = arith.extui %19 : i1 to i32
    %c0_i32_14 = arith.constant 0 : i32
    %21 = arith.cmpi ne, %20, %c0_i32_14 : i32
    scf.if %21 {
      %c0_15 = arith.constant 0 : index
      %c0_16 = arith.constant 0 : index
      %22 = vector.load %arg7[%c0_15, %c0_16] : memref<64x4xf32, #tpu.memory_space<vmem>>, vector<64x4xf32>
      %23 = arith.truncf %22 : vector<64x4xf32> to vector<64x4xbf16>
      %c0_17 = arith.constant 0 : index
      %c0_18 = arith.constant 0 : index
      %24 = vector.load %arg6[%c0_17, %c0_18] : memref<64x4xbf16, #tpu.memory_space<vmem>>, vector<64x4xbf16>
      tpu.vector_store %arg6[%c0_17, %c0_18], %23 {strides = array<i32>} : memref<64x4xbf16, #tpu.memory_space<vmem>>, vector<64x4xbf16>,
    } else {
    }
    return
  }
  func.func @transform_0(%arg0: i32, %arg1: i32) -> (i32, i32) {
    %c0_i32 = arith.constant 0 : i32
    return %arg0, %arg1 : i32, i32
  }
  func.func @transform_1(%arg0: i32, %arg1: i32) -> (i32, i32) {
    %c0_i32 = arith.constant 0 : i32
    %c0_i32_0 = arith.constant 0 : i32
    return %c0_i32, %arg1 : i32, i32
  }
  func.func @transform_2(%arg0: i32, %arg1: i32) -> (i32, i32) {
    %c0_i32 = arith.constant 0 : i32
    %c0_i32_0 = arith.constant 0 : i32
    return %c0_i32, %arg1 : i32, i32
  }
  func.func @transform_3(%arg0: i32, %arg1: i32) -> (i32, i32) {
    %c0_i32 = arith.constant 0 : i32
    %c0_i32_0 = arith.constant 0 : i32
    return %arg1, %c0_i32 : i32, i32
  }
  func.func @transform_4(%arg0: i32, %arg1: i32) -> (i32, i32) {
    %c0_i32 = arith.constant 0 : i32
    %c0_i32_0 = arith.constant 0 : i32
    return %arg0, %c0_i32 : i32, i32
  }
}

module attributes {stable_mosaic.version = 11 : i64} {
  func.func @_mm_bnrelu_kernel(%arg0: i32, %arg1: i32, %arg2: memref<64x16xbf16, #tpu.memory_space<vmem>>, %arg3: memref<1x16xf32, #tpu.memory_space<vmem>>, %arg4: memref<1x16xf32, #tpu.memory_space<vmem>>, %arg5: memref<16x8xbf16, #tpu.memory_space<vmem>>, %arg6: memref<64x8xbf16, #tpu.memory_space<vmem>>, %arg7: memref<64x8xf32, #tpu.memory_space<vmem>>) attributes {dimension_semantics = [#tpu.dimension_semantics<parallel>, #tpu.dimension_semantics<arbitrary>], iteration_bounds = array<i64: 2, 1>, scalar_prefetch = 0 : i64, scratch_operands = 1 : i64, tpu.core_type = #tpu.core_type<tc>, window_params = [{transform_indices = @transform_0, window_bounds = array<i64: 64, 16>}, {transform_indices = @transform_1, window_bounds = array<i64: 1, 16>}, {transform_indices = @transform_2, window_bounds = array<i64: 1, 16>}, {transform_indices = @transform_3, window_bounds = array<i64: 16, 8>}, {transform_indices = @transform_4, window_bounds = array<i64: 64, 8>}]} {
    %c0_i32 = arith.constant 0 : i32
    %0 = arith.cmpi eq, %arg1, %c0_i32 : i32
    %1 = arith.extui %0 : i1 to i32
    %c0_i32_0 = arith.constant 0 : i32
    %2 = arith.cmpi ne, %1, %c0_i32_0 : i32
    scf.if %2 {
      %cst_15 = arith.constant 0.000000e+00 : f32
      %22 = vector.broadcast %cst_15 : f32 to vector<64x8xf32>
      %c0_16 = arith.constant 0 : index
      %c0_17 = arith.constant 0 : index
      %23 = vector.load %arg7[%c0_16, %c0_17] : memref<64x8xf32, #tpu.memory_space<vmem>>, vector<64x8xf32>
      tpu.vector_store %arg7[%c0_16, %c0_17], %22 {strides = array<i32>} : memref<64x8xf32, #tpu.memory_space<vmem>>, vector<64x8xf32>,
    } else {
    }
    %c0 = arith.constant 0 : index
    %c0_1 = arith.constant 0 : index
    %3 = vector.load %arg2[%c0, %c0_1] : memref<64x16xbf16, #tpu.memory_space<vmem>>, vector<64x16xbf16>
    %4 = arith.extf %3 : vector<64x16xbf16> to vector<64x16xf32>
    %c0_2 = arith.constant 0 : index
    %c0_3 = arith.constant 0 : index
    %5 = vector.load %arg3[%c0_2, %c0_3] : memref<1x16xf32, #tpu.memory_space<vmem>>, vector<1x16xf32>
    %6 = vector.broadcast %5 : vector<1x16xf32> to vector<64x16xf32>
    %7 = arith.mulf %4, %6 : vector<64x16xf32>
    %c0_4 = arith.constant 0 : index
    %c0_5 = arith.constant 0 : index
    %8 = vector.load %arg4[%c0_4, %c0_5] : memref<1x16xf32, #tpu.memory_space<vmem>>, vector<1x16xf32>
    %9 = vector.broadcast %8 : vector<1x16xf32> to vector<64x16xf32>
    %10 = arith.addf %7, %9 : vector<64x16xf32>
    %cst = arith.constant 0.000000e+00 : f32
    %11 = vector.broadcast %cst : f32 to vector<64x16xf32>
    %12 = arith.maximumf %10, %11 : vector<64x16xf32>
    %c0_6 = arith.constant 0 : index
    %c0_7 = arith.constant 0 : index
    %13 = vector.load %arg7[%c0_6, %c0_7] : memref<64x8xf32, #tpu.memory_space<vmem>>, vector<64x8xf32>
    %14 = arith.truncf %12 : vector<64x16xf32> to vector<64x16xbf16>
    %c0_8 = arith.constant 0 : index
    %c0_9 = arith.constant 0 : index
    %15 = vector.load %arg5[%c0_8, %c0_9] : memref<16x8xbf16, #tpu.memory_space<vmem>>, vector<16x8xbf16>
    %cst_10 = arith.constant dense<0.000000e+00> : vector<64x8xf32>
    %16 = tpu.matmul %14, %15, %cst_10 {dimension_numbers = #tpu.dot_dimension_numbers<[1], [0], [0], [1], [0, 0, 1, 1], [], []>} : vector<64x16xbf16>, vector<16x8xbf16>, vector<64x8xf32> -> vector<64x8xf32>
    %17 = arith.addf %13, %16 : vector<64x8xf32>
    %c0_11 = arith.constant 0 : index
    %c0_12 = arith.constant 0 : index
    %18 = vector.load %arg7[%c0_11, %c0_12] : memref<64x8xf32, #tpu.memory_space<vmem>>, vector<64x8xf32>
    tpu.vector_store %arg7[%c0_11, %c0_12], %17 {strides = array<i32>} : memref<64x8xf32, #tpu.memory_space<vmem>>, vector<64x8xf32>,
    %c0_i32_13 = arith.constant 0 : i32
    %19 = arith.cmpi eq, %arg1, %c0_i32_13 : i32
    %20 = arith.extui %19 : i1 to i32
    %c0_i32_14 = arith.constant 0 : i32
    %21 = arith.cmpi ne, %20, %c0_i32_14 : i32
    scf.if %21 {
      %c0_15 = arith.constant 0 : index
      %c0_16 = arith.constant 0 : index
      %22 = vector.load %arg7[%c0_15, %c0_16] : memref<64x8xf32, #tpu.memory_space<vmem>>, vector<64x8xf32>
      %23 = arith.truncf %22 : vector<64x8xf32> to vector<64x8xbf16>
      %c0_17 = arith.constant 0 : index
      %c0_18 = arith.constant 0 : index
      %24 = vector.load %arg6[%c0_17, %c0_18] : memref<64x8xbf16, #tpu.memory_space<vmem>>, vector<64x8xbf16>
      tpu.vector_store %arg6[%c0_17, %c0_18], %23 {strides = array<i32>} : memref<64x8xbf16, #tpu.memory_space<vmem>>, vector<64x8xbf16>,
    } else {
    }
    return
  }
  func.func @transform_0(%arg0: i32, %arg1: i32) -> (i32, i32) {
    %c0_i32 = arith.constant 0 : i32
    return %arg0, %arg1 : i32, i32
  }
  func.func @transform_1(%arg0: i32, %arg1: i32) -> (i32, i32) {
    %c0_i32 = arith.constant 0 : i32
    %c0_i32_0 = arith.constant 0 : i32
    return %c0_i32, %arg1 : i32, i32
  }
  func.func @transform_2(%arg0: i32, %arg1: i32) -> (i32, i32) {
    %c0_i32 = arith.constant 0 : i32
    %c0_i32_0 = arith.constant 0 : i32
    return %c0_i32, %arg1 : i32, i32
  }
  func.func @transform_3(%arg0: i32, %arg1: i32) -> (i32, i32) {
    %c0_i32 = arith.constant 0 : i32
    %c0_i32_0 = arith.constant 0 : i32
    return %arg1, %c0_i32 : i32, i32
  }
  func.func @transform_4(%arg0: i32, %arg1: i32) -> (i32, i32) {
    %c0_i32 = arith.constant 0 : i32
    %c0_i32_0 = arith.constant 0 : i32
    return %arg0, %c0_i32 : i32, i32
  }
}

module attributes {stable_mosaic.version = 11 : i64} {
  func.func @_mm_bnrelu_kernel(%arg0: i32, %arg1: i32, %arg2: memref<16x16xbf16, #tpu.memory_space<vmem>>, %arg3: memref<1x16xf32, #tpu.memory_space<vmem>>, %arg4: memref<1x16xf32, #tpu.memory_space<vmem>>, %arg5: memref<16x16xbf16, #tpu.memory_space<vmem>>, %arg6: memref<16x16xbf16, #tpu.memory_space<vmem>>, %arg7: memref<16x16xf32, #tpu.memory_space<vmem>>) attributes {dimension_semantics = [#tpu.dimension_semantics<parallel>, #tpu.dimension_semantics<arbitrary>], iteration_bounds = array<i64: 2, 1>, scalar_prefetch = 0 : i64, scratch_operands = 1 : i64, tpu.core_type = #tpu.core_type<tc>, window_params = [{transform_indices = @transform_0, window_bounds = array<i64: 16, 16>}, {transform_indices = @transform_1, window_bounds = array<i64: 1, 16>}, {transform_indices = @transform_2, window_bounds = array<i64: 1, 16>}, {transform_indices = @transform_3, window_bounds = array<i64: 16, 16>}, {transform_indices = @transform_4, window_bounds = array<i64: 16, 16>}]} {
    %c0_i32 = arith.constant 0 : i32
    %0 = arith.cmpi eq, %arg1, %c0_i32 : i32
    %1 = arith.extui %0 : i1 to i32
    %c0_i32_0 = arith.constant 0 : i32
    %2 = arith.cmpi ne, %1, %c0_i32_0 : i32
    scf.if %2 {
      %cst_15 = arith.constant 0.000000e+00 : f32
      %22 = vector.broadcast %cst_15 : f32 to vector<16x16xf32>
      %c0_16 = arith.constant 0 : index
      %c0_17 = arith.constant 0 : index
      %23 = vector.load %arg7[%c0_16, %c0_17] : memref<16x16xf32, #tpu.memory_space<vmem>>, vector<16x16xf32>
      tpu.vector_store %arg7[%c0_16, %c0_17], %22 {strides = array<i32>} : memref<16x16xf32, #tpu.memory_space<vmem>>, vector<16x16xf32>,
    } else {
    }
    %c0 = arith.constant 0 : index
    %c0_1 = arith.constant 0 : index
    %3 = vector.load %arg2[%c0, %c0_1] : memref<16x16xbf16, #tpu.memory_space<vmem>>, vector<16x16xbf16>
    %4 = arith.extf %3 : vector<16x16xbf16> to vector<16x16xf32>
    %c0_2 = arith.constant 0 : index
    %c0_3 = arith.constant 0 : index
    %5 = vector.load %arg3[%c0_2, %c0_3] : memref<1x16xf32, #tpu.memory_space<vmem>>, vector<1x16xf32>
    %6 = vector.broadcast %5 : vector<1x16xf32> to vector<16x16xf32>
    %7 = arith.mulf %4, %6 : vector<16x16xf32>
    %c0_4 = arith.constant 0 : index
    %c0_5 = arith.constant 0 : index
    %8 = vector.load %arg4[%c0_4, %c0_5] : memref<1x16xf32, #tpu.memory_space<vmem>>, vector<1x16xf32>
    %9 = vector.broadcast %8 : vector<1x16xf32> to vector<16x16xf32>
    %10 = arith.addf %7, %9 : vector<16x16xf32>
    %cst = arith.constant 0.000000e+00 : f32
    %11 = vector.broadcast %cst : f32 to vector<16x16xf32>
    %12 = arith.maximumf %10, %11 : vector<16x16xf32>
    %c0_6 = arith.constant 0 : index
    %c0_7 = arith.constant 0 : index
    %13 = vector.load %arg7[%c0_6, %c0_7] : memref<16x16xf32, #tpu.memory_space<vmem>>, vector<16x16xf32>
    %14 = arith.truncf %12 : vector<16x16xf32> to vector<16x16xbf16>
    %c0_8 = arith.constant 0 : index
    %c0_9 = arith.constant 0 : index
    %15 = vector.load %arg5[%c0_8, %c0_9] : memref<16x16xbf16, #tpu.memory_space<vmem>>, vector<16x16xbf16>
    %cst_10 = arith.constant dense<0.000000e+00> : vector<16x16xf32>
    %16 = tpu.matmul %14, %15, %cst_10 {dimension_numbers = #tpu.dot_dimension_numbers<[1], [0], [0], [1], [0, 0, 1, 1], [], []>} : vector<16x16xbf16>, vector<16x16xbf16>, vector<16x16xf32> -> vector<16x16xf32>
    %17 = arith.addf %13, %16 : vector<16x16xf32>
    %c0_11 = arith.constant 0 : index
    %c0_12 = arith.constant 0 : index
    %18 = vector.load %arg7[%c0_11, %c0_12] : memref<16x16xf32, #tpu.memory_space<vmem>>, vector<16x16xf32>
    tpu.vector_store %arg7[%c0_11, %c0_12], %17 {strides = array<i32>} : memref<16x16xf32, #tpu.memory_space<vmem>>, vector<16x16xf32>,
    %c0_i32_13 = arith.constant 0 : i32
    %19 = arith.cmpi eq, %arg1, %c0_i32_13 : i32
    %20 = arith.extui %19 : i1 to i32
    %c0_i32_14 = arith.constant 0 : i32
    %21 = arith.cmpi ne, %20, %c0_i32_14 : i32
    scf.if %21 {
      %c0_15 = arith.constant 0 : index
      %c0_16 = arith.constant 0 : index
      %22 = vector.load %arg7[%c0_15, %c0_16] : memref<16x16xf32, #tpu.memory_space<vmem>>, vector<16x16xf32>
      %23 = arith.truncf %22 : vector<16x16xf32> to vector<16x16xbf16>
      %c0_17 = arith.constant 0 : index
      %c0_18 = arith.constant 0 : index
      %24 = vector.load %arg6[%c0_17, %c0_18] : memref<16x16xbf16, #tpu.memory_space<vmem>>, vector<16x16xbf16>
      tpu.vector_store %arg6[%c0_17, %c0_18], %23 {strides = array<i32>} : memref<16x16xbf16, #tpu.memory_space<vmem>>, vector<16x16xbf16>,
    } else {
    }
    return
  }
  func.func @transform_0(%arg0: i32, %arg1: i32) -> (i32, i32) {
    %c0_i32 = arith.constant 0 : i32
    return %arg0, %arg1 : i32, i32
  }
  func.func @transform_1(%arg0: i32, %arg1: i32) -> (i32, i32) {
    %c0_i32 = arith.constant 0 : i32
    %c0_i32_0 = arith.constant 0 : i32
    return %c0_i32, %arg1 : i32, i32
  }
  func.func @transform_2(%arg0: i32, %arg1: i32) -> (i32, i32) {
    %c0_i32 = arith.constant 0 : i32
    %c0_i32_0 = arith.constant 0 : i32
    return %c0_i32, %arg1 : i32, i32
  }
  func.func @transform_3(%arg0: i32, %arg1: i32) -> (i32, i32) {
    %c0_i32 = arith.constant 0 : i32
    %c0_i32_0 = arith.constant 0 : i32
    return %arg1, %c0_i32 : i32, i32
  }
  func.func @transform_4(%arg0: i32, %arg1: i32) -> (i32, i32) {
    %c0_i32 = arith.constant 0 : i32
    %c0_i32_0 = arith.constant 0 : i32
    return %arg0, %c0_i32 : i32, i32
  }
}

module attributes {stable_mosaic.version = 11 : i64} {
  func.func @_mm_bnrelu_kernel(%arg0: i32, %arg1: i32, %arg2: memref<16x144xbf16, #tpu.memory_space<vmem>>, %arg3: memref<1x144xf32, #tpu.memory_space<vmem>>, %arg4: memref<1x144xf32, #tpu.memory_space<vmem>>, %arg5: memref<144x4xbf16, #tpu.memory_space<vmem>>, %arg6: memref<16x4xbf16, #tpu.memory_space<vmem>>, %arg7: memref<16x4xf32, #tpu.memory_space<vmem>>) attributes {dimension_semantics = [#tpu.dimension_semantics<parallel>, #tpu.dimension_semantics<arbitrary>], iteration_bounds = array<i64: 2, 1>, scalar_prefetch = 0 : i64, scratch_operands = 1 : i64, tpu.core_type = #tpu.core_type<tc>, window_params = [{transform_indices = @transform_0, window_bounds = array<i64: 16, 144>}, {transform_indices = @transform_1, window_bounds = array<i64: 1, 144>}, {transform_indices = @transform_2, window_bounds = array<i64: 1, 144>}, {transform_indices = @transform_3, window_bounds = array<i64: 144, 4>}, {transform_indices = @transform_4, window_bounds = array<i64: 16, 4>}]} {
    %c0_i32 = arith.constant 0 : i32
    %0 = arith.cmpi eq, %arg1, %c0_i32 : i32
    %1 = arith.extui %0 : i1 to i32
    %c0_i32_0 = arith.constant 0 : i32
    %2 = arith.cmpi ne, %1, %c0_i32_0 : i32
    scf.if %2 {
      %cst_15 = arith.constant 0.000000e+00 : f32
      %22 = vector.broadcast %cst_15 : f32 to vector<16x4xf32>
      %c0_16 = arith.constant 0 : index
      %c0_17 = arith.constant 0 : index
      %23 = vector.load %arg7[%c0_16, %c0_17] : memref<16x4xf32, #tpu.memory_space<vmem>>, vector<16x4xf32>
      tpu.vector_store %arg7[%c0_16, %c0_17], %22 {strides = array<i32>} : memref<16x4xf32, #tpu.memory_space<vmem>>, vector<16x4xf32>,
    } else {
    }
    %c0 = arith.constant 0 : index
    %c0_1 = arith.constant 0 : index
    %3 = vector.load %arg2[%c0, %c0_1] : memref<16x144xbf16, #tpu.memory_space<vmem>>, vector<16x144xbf16>
    %4 = arith.extf %3 : vector<16x144xbf16> to vector<16x144xf32>
    %c0_2 = arith.constant 0 : index
    %c0_3 = arith.constant 0 : index
    %5 = vector.load %arg3[%c0_2, %c0_3] : memref<1x144xf32, #tpu.memory_space<vmem>>, vector<1x144xf32>
    %6 = vector.broadcast %5 : vector<1x144xf32> to vector<16x144xf32>
    %7 = arith.mulf %4, %6 : vector<16x144xf32>
    %c0_4 = arith.constant 0 : index
    %c0_5 = arith.constant 0 : index
    %8 = vector.load %arg4[%c0_4, %c0_5] : memref<1x144xf32, #tpu.memory_space<vmem>>, vector<1x144xf32>
    %9 = vector.broadcast %8 : vector<1x144xf32> to vector<16x144xf32>
    %10 = arith.addf %7, %9 : vector<16x144xf32>
    %cst = arith.constant 0.000000e+00 : f32
    %11 = vector.broadcast %cst : f32 to vector<16x144xf32>
    %12 = arith.maximumf %10, %11 : vector<16x144xf32>
    %c0_6 = arith.constant 0 : index
    %c0_7 = arith.constant 0 : index
    %13 = vector.load %arg7[%c0_6, %c0_7] : memref<16x4xf32, #tpu.memory_space<vmem>>, vector<16x4xf32>
    %14 = arith.truncf %12 : vector<16x144xf32> to vector<16x144xbf16>
    %c0_8 = arith.constant 0 : index
    %c0_9 = arith.constant 0 : index
    %15 = vector.load %arg5[%c0_8, %c0_9] : memref<144x4xbf16, #tpu.memory_space<vmem>>, vector<144x4xbf16>
    %cst_10 = arith.constant dense<0.000000e+00> : vector<16x4xf32>
    %16 = tpu.matmul %14, %15, %cst_10 {dimension_numbers = #tpu.dot_dimension_numbers<[1], [0], [0], [1], [0, 0, 1, 1], [], []>} : vector<16x144xbf16>, vector<144x4xbf16>, vector<16x4xf32> -> vector<16x4xf32>
    %17 = arith.addf %13, %16 : vector<16x4xf32>
    %c0_11 = arith.constant 0 : index
    %c0_12 = arith.constant 0 : index
    %18 = vector.load %arg7[%c0_11, %c0_12] : memref<16x4xf32, #tpu.memory_space<vmem>>, vector<16x4xf32>
    tpu.vector_store %arg7[%c0_11, %c0_12], %17 {strides = array<i32>} : memref<16x4xf32, #tpu.memory_space<vmem>>, vector<16x4xf32>,
    %c0_i32_13 = arith.constant 0 : i32
    %19 = arith.cmpi eq, %arg1, %c0_i32_13 : i32
    %20 = arith.extui %19 : i1 to i32
    %c0_i32_14 = arith.constant 0 : i32
    %21 = arith.cmpi ne, %20, %c0_i32_14 : i32
    scf.if %21 {
      %c0_15 = arith.constant 0 : index
      %c0_16 = arith.constant 0 : index
      %22 = vector.load %arg7[%c0_15, %c0_16] : memref<16x4xf32, #tpu.memory_space<vmem>>, vector<16x4xf32>
      %23 = arith.truncf %22 : vector<16x4xf32> to vector<16x4xbf16>
      %c0_17 = arith.constant 0 : index
      %c0_18 = arith.constant 0 : index
      %24 = vector.load %arg6[%c0_17, %c0_18] : memref<16x4xbf16, #tpu.memory_space<vmem>>, vector<16x4xbf16>
      tpu.vector_store %arg6[%c0_17, %c0_18], %23 {strides = array<i32>} : memref<16x4xbf16, #tpu.memory_space<vmem>>, vector<16x4xbf16>,
    } else {
    }
    return
  }
  func.func @transform_0(%arg0: i32, %arg1: i32) -> (i32, i32) {
    %c0_i32 = arith.constant 0 : i32
    return %arg0, %arg1 : i32, i32
  }
  func.func @transform_1(%arg0: i32, %arg1: i32) -> (i32, i32) {
    %c0_i32 = arith.constant 0 : i32
    %c0_i32_0 = arith.constant 0 : i32
    return %c0_i32, %arg1 : i32, i32
  }
  func.func @transform_2(%arg0: i32, %arg1: i32) -> (i32, i32) {
    %c0_i32 = arith.constant 0 : i32
    %c0_i32_0 = arith.constant 0 : i32
    return %c0_i32, %arg1 : i32, i32
  }
  func.func @transform_3(%arg0: i32, %arg1: i32) -> (i32, i32) {
    %c0_i32 = arith.constant 0 : i32
    %c0_i32_0 = arith.constant 0 : i32
    return %arg1, %c0_i32 : i32, i32
  }
  func.func @transform_4(%arg0: i32, %arg1: i32) -> (i32, i32) {
    %c0_i32 = arith.constant 0 : i32
    %c0_i32_0 = arith.constant 0 : i32
    return %arg0, %c0_i32 : i32, i32
  }
}

module attributes {stable_mosaic.version = 11 : i64} {
  func.func @_mm_bnrelu_kernel(%arg0: i32, %arg1: i32, %arg2: memref<16x16xbf16, #tpu.memory_space<vmem>>, %arg3: memref<1x16xf32, #tpu.memory_space<vmem>>, %arg4: memref<1x16xf32, #tpu.memory_space<vmem>>, %arg5: memref<16x8xbf16, #tpu.memory_space<vmem>>, %arg6: memref<16x8xbf16, #tpu.memory_space<vmem>>, %arg7: memref<16x8xf32, #tpu.memory_space<vmem>>) attributes {dimension_semantics = [#tpu.dimension_semantics<parallel>, #tpu.dimension_semantics<arbitrary>], iteration_bounds = array<i64: 2, 1>, scalar_prefetch = 0 : i64, scratch_operands = 1 : i64, tpu.core_type = #tpu.core_type<tc>, window_params = [{transform_indices = @transform_0, window_bounds = array<i64: 16, 16>}, {transform_indices = @transform_1, window_bounds = array<i64: 1, 16>}, {transform_indices = @transform_2, window_bounds = array<i64: 1, 16>}, {transform_indices = @transform_3, window_bounds = array<i64: 16, 8>}, {transform_indices = @transform_4, window_bounds = array<i64: 16, 8>}]} {
    %c0_i32 = arith.constant 0 : i32
    %0 = arith.cmpi eq, %arg1, %c0_i32 : i32
    %1 = arith.extui %0 : i1 to i32
    %c0_i32_0 = arith.constant 0 : i32
    %2 = arith.cmpi ne, %1, %c0_i32_0 : i32
    scf.if %2 {
      %cst_15 = arith.constant 0.000000e+00 : f32
      %22 = vector.broadcast %cst_15 : f32 to vector<16x8xf32>
      %c0_16 = arith.constant 0 : index
      %c0_17 = arith.constant 0 : index
      %23 = vector.load %arg7[%c0_16, %c0_17] : memref<16x8xf32, #tpu.memory_space<vmem>>, vector<16x8xf32>
      tpu.vector_store %arg7[%c0_16, %c0_17], %22 {strides = array<i32>} : memref<16x8xf32, #tpu.memory_space<vmem>>, vector<16x8xf32>,
    } else {
    }
    %c0 = arith.constant 0 : index
    %c0_1 = arith.constant 0 : index
    %3 = vector.load %arg2[%c0, %c0_1] : memref<16x16xbf16, #tpu.memory_space<vmem>>, vector<16x16xbf16>
    %4 = arith.extf %3 : vector<16x16xbf16> to vector<16x16xf32>
    %c0_2 = arith.constant 0 : index
    %c0_3 = arith.constant 0 : index
    %5 = vector.load %arg3[%c0_2, %c0_3] : memref<1x16xf32, #tpu.memory_space<vmem>>, vector<1x16xf32>
    %6 = vector.broadcast %5 : vector<1x16xf32> to vector<16x16xf32>
    %7 = arith.mulf %4, %6 : vector<16x16xf32>
    %c0_4 = arith.constant 0 : index
    %c0_5 = arith.constant 0 : index
    %8 = vector.load %arg4[%c0_4, %c0_5] : memref<1x16xf32, #tpu.memory_space<vmem>>, vector<1x16xf32>
    %9 = vector.broadcast %8 : vector<1x16xf32> to vector<16x16xf32>
    %10 = arith.addf %7, %9 : vector<16x16xf32>
    %cst = arith.constant 0.000000e+00 : f32
    %11 = vector.broadcast %cst : f32 to vector<16x16xf32>
    %12 = arith.maximumf %10, %11 : vector<16x16xf32>
    %c0_6 = arith.constant 0 : index
    %c0_7 = arith.constant 0 : index
    %13 = vector.load %arg7[%c0_6, %c0_7] : memref<16x8xf32, #tpu.memory_space<vmem>>, vector<16x8xf32>
    %14 = arith.truncf %12 : vector<16x16xf32> to vector<16x16xbf16>
    %c0_8 = arith.constant 0 : index
    %c0_9 = arith.constant 0 : index
    %15 = vector.load %arg5[%c0_8, %c0_9] : memref<16x8xbf16, #tpu.memory_space<vmem>>, vector<16x8xbf16>
    %cst_10 = arith.constant dense<0.000000e+00> : vector<16x8xf32>
    %16 = tpu.matmul %14, %15, %cst_10 {dimension_numbers = #tpu.dot_dimension_numbers<[1], [0], [0], [1], [0, 0, 1, 1], [], []>} : vector<16x16xbf16>, vector<16x8xbf16>, vector<16x8xf32> -> vector<16x8xf32>
    %17 = arith.addf %13, %16 : vector<16x8xf32>
    %c0_11 = arith.constant 0 : index
    %c0_12 = arith.constant 0 : index
    %18 = vector.load %arg7[%c0_11, %c0_12] : memref<16x8xf32, #tpu.memory_space<vmem>>, vector<16x8xf32>
    tpu.vector_store %arg7[%c0_11, %c0_12], %17 {strides = array<i32>} : memref<16x8xf32, #tpu.memory_space<vmem>>, vector<16x8xf32>,
    %c0_i32_13 = arith.constant 0 : i32
    %19 = arith.cmpi eq, %arg1, %c0_i32_13 : i32
    %20 = arith.extui %19 : i1 to i32
    %c0_i32_14 = arith.constant 0 : i32
    %21 = arith.cmpi ne, %20, %c0_i32_14 : i32
    scf.if %21 {
      %c0_15 = arith.constant 0 : index
      %c0_16 = arith.constant 0 : index
      %22 = vector.load %arg7[%c0_15, %c0_16] : memref<16x8xf32, #tpu.memory_space<vmem>>, vector<16x8xf32>
      %23 = arith.truncf %22 : vector<16x8xf32> to vector<16x8xbf16>
      %c0_17 = arith.constant 0 : index
      %c0_18 = arith.constant 0 : index
      %24 = vector.load %arg6[%c0_17, %c0_18] : memref<16x8xbf16, #tpu.memory_space<vmem>>, vector<16x8xbf16>
      tpu.vector_store %arg6[%c0_17, %c0_18], %23 {strides = array<i32>} : memref<16x8xbf16, #tpu.memory_space<vmem>>, vector<16x8xbf16>,
    } else {
    }
    return
  }
  func.func @transform_0(%arg0: i32, %arg1: i32) -> (i32, i32) {
    %c0_i32 = arith.constant 0 : i32
    return %arg0, %arg1 : i32, i32
  }
  func.func @transform_1(%arg0: i32, %arg1: i32) -> (i32, i32) {
    %c0_i32 = arith.constant 0 : i32
    %c0_i32_0 = arith.constant 0 : i32
    return %c0_i32, %arg1 : i32, i32
  }
  func.func @transform_2(%arg0: i32, %arg1: i32) -> (i32, i32) {
    %c0_i32 = arith.constant 0 : i32
    %c0_i32_0 = arith.constant 0 : i32
    return %c0_i32, %arg1 : i32, i32
  }
  func.func @transform_3(%arg0: i32, %arg1: i32) -> (i32, i32) {
    %c0_i32 = arith.constant 0 : i32
    %c0_i32_0 = arith.constant 0 : i32
    return %arg1, %c0_i32 : i32, i32
  }
  func.func @transform_4(%arg0: i32, %arg1: i32) -> (i32, i32) {
    %c0_i32 = arith.constant 0 : i32
    %c0_i32_0 = arith.constant 0 : i32
    return %arg0, %c0_i32 : i32, i32
  }
}

module attributes {stable_mosaic.version = 11 : i64} {
  func.func @_mm_bnrelu_kernel(%arg0: i32, %arg1: i32, %arg2: memref<8x16xbf16, #tpu.memory_space<vmem>>, %arg3: memref<1x16xf32, #tpu.memory_space<vmem>>, %arg4: memref<1x16xf32, #tpu.memory_space<vmem>>, %arg5: memref<16x16xbf16, #tpu.memory_space<vmem>>, %arg6: memref<8x16xbf16, #tpu.memory_space<vmem>>, %arg7: memref<8x16xf32, #tpu.memory_space<vmem>>) attributes {dimension_semantics = [#tpu.dimension_semantics<parallel>, #tpu.dimension_semantics<arbitrary>], iteration_bounds = array<i64: 1, 1>, scalar_prefetch = 0 : i64, scratch_operands = 1 : i64, tpu.core_type = #tpu.core_type<tc>, window_params = [{transform_indices = @transform_0, window_bounds = array<i64: 8, 16>}, {transform_indices = @transform_1, window_bounds = array<i64: 1, 16>}, {transform_indices = @transform_2, window_bounds = array<i64: 1, 16>}, {transform_indices = @transform_3, window_bounds = array<i64: 16, 16>}, {transform_indices = @transform_4, window_bounds = array<i64: 8, 16>}]} {
    %c0_i32 = arith.constant 0 : i32
    %0 = arith.cmpi eq, %arg1, %c0_i32 : i32
    %1 = arith.extui %0 : i1 to i32
    %c0_i32_0 = arith.constant 0 : i32
    %2 = arith.cmpi ne, %1, %c0_i32_0 : i32
    scf.if %2 {
      %cst_15 = arith.constant 0.000000e+00 : f32
      %22 = vector.broadcast %cst_15 : f32 to vector<8x16xf32>
      %c0_16 = arith.constant 0 : index
      %c0_17 = arith.constant 0 : index
      %23 = vector.load %arg7[%c0_16, %c0_17] : memref<8x16xf32, #tpu.memory_space<vmem>>, vector<8x16xf32>
      tpu.vector_store %arg7[%c0_16, %c0_17], %22 {strides = array<i32>} : memref<8x16xf32, #tpu.memory_space<vmem>>, vector<8x16xf32>,
    } else {
    }
    %c0 = arith.constant 0 : index
    %c0_1 = arith.constant 0 : index
    %3 = vector.load %arg2[%c0, %c0_1] : memref<8x16xbf16, #tpu.memory_space<vmem>>, vector<8x16xbf16>
    %4 = arith.extf %3 : vector<8x16xbf16> to vector<8x16xf32>
    %c0_2 = arith.constant 0 : index
    %c0_3 = arith.constant 0 : index
    %5 = vector.load %arg3[%c0_2, %c0_3] : memref<1x16xf32, #tpu.memory_space<vmem>>, vector<1x16xf32>
    %6 = vector.broadcast %5 : vector<1x16xf32> to vector<8x16xf32>
    %7 = arith.mulf %4, %6 : vector<8x16xf32>
    %c0_4 = arith.constant 0 : index
    %c0_5 = arith.constant 0 : index
    %8 = vector.load %arg4[%c0_4, %c0_5] : memref<1x16xf32, #tpu.memory_space<vmem>>, vector<1x16xf32>
    %9 = vector.broadcast %8 : vector<1x16xf32> to vector<8x16xf32>
    %10 = arith.addf %7, %9 : vector<8x16xf32>
    %cst = arith.constant 0.000000e+00 : f32
    %11 = vector.broadcast %cst : f32 to vector<8x16xf32>
    %12 = arith.maximumf %10, %11 : vector<8x16xf32>
    %c0_6 = arith.constant 0 : index
    %c0_7 = arith.constant 0 : index
    %13 = vector.load %arg7[%c0_6, %c0_7] : memref<8x16xf32, #tpu.memory_space<vmem>>, vector<8x16xf32>
    %14 = arith.truncf %12 : vector<8x16xf32> to vector<8x16xbf16>
    %c0_8 = arith.constant 0 : index
    %c0_9 = arith.constant 0 : index
    %15 = vector.load %arg5[%c0_8, %c0_9] : memref<16x16xbf16, #tpu.memory_space<vmem>>, vector<16x16xbf16>
    %cst_10 = arith.constant dense<0.000000e+00> : vector<8x16xf32>
    %16 = tpu.matmul %14, %15, %cst_10 {dimension_numbers = #tpu.dot_dimension_numbers<[1], [0], [0], [1], [0, 0, 1, 1], [], []>} : vector<8x16xbf16>, vector<16x16xbf16>, vector<8x16xf32> -> vector<8x16xf32>
    %17 = arith.addf %13, %16 : vector<8x16xf32>
    %c0_11 = arith.constant 0 : index
    %c0_12 = arith.constant 0 : index
    %18 = vector.load %arg7[%c0_11, %c0_12] : memref<8x16xf32, #tpu.memory_space<vmem>>, vector<8x16xf32>
    tpu.vector_store %arg7[%c0_11, %c0_12], %17 {strides = array<i32>} : memref<8x16xf32, #tpu.memory_space<vmem>>, vector<8x16xf32>,
    %c0_i32_13 = arith.constant 0 : i32
    %19 = arith.cmpi eq, %arg1, %c0_i32_13 : i32
    %20 = arith.extui %19 : i1 to i32
    %c0_i32_14 = arith.constant 0 : i32
    %21 = arith.cmpi ne, %20, %c0_i32_14 : i32
    scf.if %21 {
      %c0_15 = arith.constant 0 : index
      %c0_16 = arith.constant 0 : index
      %22 = vector.load %arg7[%c0_15, %c0_16] : memref<8x16xf32, #tpu.memory_space<vmem>>, vector<8x16xf32>
      %23 = arith.truncf %22 : vector<8x16xf32> to vector<8x16xbf16>
      %c0_17 = arith.constant 0 : index
      %c0_18 = arith.constant 0 : index
      %24 = vector.load %arg6[%c0_17, %c0_18] : memref<8x16xbf16, #tpu.memory_space<vmem>>, vector<8x16xbf16>
      tpu.vector_store %arg6[%c0_17, %c0_18], %23 {strides = array<i32>} : memref<8x16xbf16, #tpu.memory_space<vmem>>, vector<8x16xbf16>,
    } else {
    }
    return
  }
  func.func @transform_0(%arg0: i32, %arg1: i32) -> (i32, i32) {
    %c0_i32 = arith.constant 0 : i32
    return %arg0, %arg1 : i32, i32
  }
  func.func @transform_1(%arg0: i32, %arg1: i32) -> (i32, i32) {
    %c0_i32 = arith.constant 0 : i32
    %c0_i32_0 = arith.constant 0 : i32
    return %c0_i32, %arg1 : i32, i32
  }
  func.func @transform_2(%arg0: i32, %arg1: i32) -> (i32, i32) {
    %c0_i32 = arith.constant 0 : i32
    %c0_i32_0 = arith.constant 0 : i32
    return %c0_i32, %arg1 : i32, i32
  }
  func.func @transform_3(%arg0: i32, %arg1: i32) -> (i32, i32) {
    %c0_i32 = arith.constant 0 : i32
    %c0_i32_0 = arith.constant 0 : i32
    return %arg1, %c0_i32 : i32, i32
  }
  func.func @transform_4(%arg0: i32, %arg1: i32) -> (i32, i32) {
    %c0_i32 = arith.constant 0 : i32
    %c0_i32_0 = arith.constant 0 : i32
    return %arg0, %c0_i32 : i32, i32
  }
}

module attributes {stable_mosaic.version = 11 : i64} {
  func.func @_mm_bnrelu_kernel(%arg0: i32, %arg1: i32, %arg2: memref<8x144xbf16, #tpu.memory_space<vmem>>, %arg3: memref<1x144xf32, #tpu.memory_space<vmem>>, %arg4: memref<1x144xf32, #tpu.memory_space<vmem>>, %arg5: memref<144x4xbf16, #tpu.memory_space<vmem>>, %arg6: memref<8x4xbf16, #tpu.memory_space<vmem>>, %arg7: memref<8x4xf32, #tpu.memory_space<vmem>>) attributes {dimension_semantics = [#tpu.dimension_semantics<parallel>, #tpu.dimension_semantics<arbitrary>], iteration_bounds = array<i64: 1, 1>, scalar_prefetch = 0 : i64, scratch_operands = 1 : i64, tpu.core_type = #tpu.core_type<tc>, window_params = [{transform_indices = @transform_0, window_bounds = array<i64: 8, 144>}, {transform_indices = @transform_1, window_bounds = array<i64: 1, 144>}, {transform_indices = @transform_2, window_bounds = array<i64: 1, 144>}, {transform_indices = @transform_3, window_bounds = array<i64: 144, 4>}, {transform_indices = @transform_4, window_bounds = array<i64: 8, 4>}]} {
    %c0_i32 = arith.constant 0 : i32
    %0 = arith.cmpi eq, %arg1, %c0_i32 : i32
    %1 = arith.extui %0 : i1 to i32
    %c0_i32_0 = arith.constant 0 : i32
    %2 = arith.cmpi ne, %1, %c0_i32_0 : i32
    scf.if %2 {
      %cst_15 = arith.constant 0.000000e+00 : f32
      %22 = vector.broadcast %cst_15 : f32 to vector<8x4xf32>
      %c0_16 = arith.constant 0 : index
      %c0_17 = arith.constant 0 : index
      %23 = vector.load %arg7[%c0_16, %c0_17] : memref<8x4xf32, #tpu.memory_space<vmem>>, vector<8x4xf32>
      tpu.vector_store %arg7[%c0_16, %c0_17], %22 {strides = array<i32>} : memref<8x4xf32, #tpu.memory_space<vmem>>, vector<8x4xf32>,
    } else {
    }
    %c0 = arith.constant 0 : index
    %c0_1 = arith.constant 0 : index
    %3 = vector.load %arg2[%c0, %c0_1] : memref<8x144xbf16, #tpu.memory_space<vmem>>, vector<8x144xbf16>
    %4 = arith.extf %3 : vector<8x144xbf16> to vector<8x144xf32>
    %c0_2 = arith.constant 0 : index
    %c0_3 = arith.constant 0 : index
    %5 = vector.load %arg3[%c0_2, %c0_3] : memref<1x144xf32, #tpu.memory_space<vmem>>, vector<1x144xf32>
    %6 = vector.broadcast %5 : vector<1x144xf32> to vector<8x144xf32>
    %7 = arith.mulf %4, %6 : vector<8x144xf32>
    %c0_4 = arith.constant 0 : index
    %c0_5 = arith.constant 0 : index
    %8 = vector.load %arg4[%c0_4, %c0_5] : memref<1x144xf32, #tpu.memory_space<vmem>>, vector<1x144xf32>
    %9 = vector.broadcast %8 : vector<1x144xf32> to vector<8x144xf32>
    %10 = arith.addf %7, %9 : vector<8x144xf32>
    %cst = arith.constant 0.000000e+00 : f32
    %11 = vector.broadcast %cst : f32 to vector<8x144xf32>
    %12 = arith.maximumf %10, %11 : vector<8x144xf32>
    %c0_6 = arith.constant 0 : index
    %c0_7 = arith.constant 0 : index
    %13 = vector.load %arg7[%c0_6, %c0_7] : memref<8x4xf32, #tpu.memory_space<vmem>>, vector<8x4xf32>
    %14 = arith.truncf %12 : vector<8x144xf32> to vector<8x144xbf16>
    %c0_8 = arith.constant 0 : index
    %c0_9 = arith.constant 0 : index
    %15 = vector.load %arg5[%c0_8, %c0_9] : memref<144x4xbf16, #tpu.memory_space<vmem>>, vector<144x4xbf16>
    %cst_10 = arith.constant dense<0.000000e+00> : vector<8x4xf32>
    %16 = tpu.matmul %14, %15, %cst_10 {dimension_numbers = #tpu.dot_dimension_numbers<[1], [0], [0], [1], [0, 0, 1, 1], [], []>} : vector<8x144xbf16>, vector<144x4xbf16>, vector<8x4xf32> -> vector<8x4xf32>
    %17 = arith.addf %13, %16 : vector<8x4xf32>
    %c0_11 = arith.constant 0 : index
    %c0_12 = arith.constant 0 : index
    %18 = vector.load %arg7[%c0_11, %c0_12] : memref<8x4xf32, #tpu.memory_space<vmem>>, vector<8x4xf32>
    tpu.vector_store %arg7[%c0_11, %c0_12], %17 {strides = array<i32>} : memref<8x4xf32, #tpu.memory_space<vmem>>, vector<8x4xf32>,
    %c0_i32_13 = arith.constant 0 : i32
    %19 = arith.cmpi eq, %arg1, %c0_i32_13 : i32
    %20 = arith.extui %19 : i1 to i32
    %c0_i32_14 = arith.constant 0 : i32
    %21 = arith.cmpi ne, %20, %c0_i32_14 : i32
    scf.if %21 {
      %c0_15 = arith.constant 0 : index
      %c0_16 = arith.constant 0 : index
      %22 = vector.load %arg7[%c0_15, %c0_16] : memref<8x4xf32, #tpu.memory_space<vmem>>, vector<8x4xf32>
      %23 = arith.truncf %22 : vector<8x4xf32> to vector<8x4xbf16>
      %c0_17 = arith.constant 0 : index
      %c0_18 = arith.constant 0 : index
      %24 = vector.load %arg6[%c0_17, %c0_18] : memref<8x4xbf16, #tpu.memory_space<vmem>>, vector<8x4xbf16>
      tpu.vector_store %arg6[%c0_17, %c0_18], %23 {strides = array<i32>} : memref<8x4xbf16, #tpu.memory_space<vmem>>, vector<8x4xbf16>,
    } else {
    }
    return
  }
  func.func @transform_0(%arg0: i32, %arg1: i32) -> (i32, i32) {
    %c0_i32 = arith.constant 0 : i32
    return %arg0, %arg1 : i32, i32
  }
  func.func @transform_1(%arg0: i32, %arg1: i32) -> (i32, i32) {
    %c0_i32 = arith.constant 0 : i32
    %c0_i32_0 = arith.constant 0 : i32
    return %c0_i32, %arg1 : i32, i32
  }
  func.func @transform_2(%arg0: i32, %arg1: i32) -> (i32, i32) {
    %c0_i32 = arith.constant 0 : i32
    %c0_i32_0 = arith.constant 0 : i32
    return %c0_i32, %arg1 : i32, i32
  }
  func.func @transform_3(%arg0: i32, %arg1: i32) -> (i32, i32) {
    %c0_i32 = arith.constant 0 : i32
    %c0_i32_0 = arith.constant 0 : i32
    return %arg1, %c0_i32 : i32, i32
  }
  func.func @transform_4(%arg0: i32, %arg1: i32) -> (i32, i32) {
    %c0_i32 = arith.constant 0 : i32
    %c0_i32_0 = arith.constant 0 : i32
    return %arg0, %c0_i32 : i32, i32
  }
}

module attributes {stable_mosaic.version = 11 : i64} {
  func.func @_scale_shift_relu_kernel(%arg0: i32, %arg1: memref<8x16xbf16, #tpu.memory_space<vmem>>, %arg2: memref<1x16xf32, #tpu.memory_space<vmem>>, %arg3: memref<1x16xf32, #tpu.memory_space<vmem>>, %arg4: memref<8x16xbf16, #tpu.memory_space<vmem>>) attributes {dimension_semantics = [#tpu.dimension_semantics<parallel>], iteration_bounds = array<i64: 1>, scalar_prefetch = 0 : i64, scratch_operands = 0 : i64, tpu.core_type = #tpu.core_type<tc>, window_params = [{transform_indices = @transform_0, window_bounds = array<i64: 8, 16>}, {pipeline_mode = #tpu.pipeline_mode<synchronous>, transform_indices = @transform_1, window_bounds = array<i64: 1, 16>}, {pipeline_mode = #tpu.pipeline_mode<synchronous>, transform_indices = @transform_2, window_bounds = array<i64: 1, 16>}, {transform_indices = @transform_3, window_bounds = array<i64: 8, 16>}]} {
    %c0 = arith.constant 0 : index
    %c0_0 = arith.constant 0 : index
    %0 = vector.load %arg1[%c0, %c0_0] : memref<8x16xbf16, #tpu.memory_space<vmem>>, vector<8x16xbf16>
    %1 = arith.extf %0 : vector<8x16xbf16> to vector<8x16xf32>
    %c0_1 = arith.constant 0 : index
    %c0_2 = arith.constant 0 : index
    %2 = vector.load %arg2[%c0_1, %c0_2] : memref<1x16xf32, #tpu.memory_space<vmem>>, vector<1x16xf32>
    %3 = vector.broadcast %2 : vector<1x16xf32> to vector<8x16xf32>
    %4 = arith.mulf %1, %3 : vector<8x16xf32>
    %c0_3 = arith.constant 0 : index
    %c0_4 = arith.constant 0 : index
    %5 = vector.load %arg3[%c0_3, %c0_4] : memref<1x16xf32, #tpu.memory_space<vmem>>, vector<1x16xf32>
    %6 = vector.broadcast %5 : vector<1x16xf32> to vector<8x16xf32>
    %7 = arith.addf %4, %6 : vector<8x16xf32>
    %cst = arith.constant 0.000000e+00 : f32
    %8 = vector.broadcast %cst : f32 to vector<8x16xf32>
    %9 = arith.maximumf %7, %8 : vector<8x16xf32>
    %10 = arith.truncf %9 : vector<8x16xf32> to vector<8x16xbf16>
    %c0_5 = arith.constant 0 : index
    %c0_6 = arith.constant 0 : index
    %11 = vector.load %arg4[%c0_5, %c0_6] : memref<8x16xbf16, #tpu.memory_space<vmem>>, vector<8x16xbf16>
    tpu.vector_store %arg4[%c0_5, %c0_6], %10 {strides = array<i32>} : memref<8x16xbf16, #tpu.memory_space<vmem>>, vector<8x16xbf16>,
    return
  }
  func.func @transform_0(%arg0: i32) -> (i32, i32) {
    %c0_i32 = arith.constant 0 : i32
    %c0_i32_0 = arith.constant 0 : i32
    return %arg0, %c0_i32 : i32, i32
  }
  func.func @transform_1(%arg0: i32) -> (i32, i32) {
    %c0_i32 = arith.constant 0 : i32
    %c0_i32_0 = arith.constant 0 : i32
    %c0_i32_1 = arith.constant 0 : i32
    return %c0_i32, %c0_i32_0 : i32, i32
  }
  func.func @transform_2(%arg0: i32) -> (i32, i32) {
    %c0_i32 = arith.constant 0 : i32
    %c0_i32_0 = arith.constant 0 : i32
    %c0_i32_1 = arith.constant 0 : i32
    return %c0_i32, %c0_i32_0 : i32, i32
  }
  func.func @transform_3(%arg0: i32) -> (i32, i32) {
    %c0_i32 = arith.constant 0 : i32
    %c0_i32_0 = arith.constant 0 : i32
    return %arg0, %c0_i32 : i32, i32
  }
}

</mosaic_0001>

<bundles_post_ra>
// kernel: densenet_forward.17
= control target key start
LH: loop header
LB: loop body
LE: loop exit
PB: predicated region body
PF: predicated region fallthrough
CT: control target
= control target key end

     0   :  { %s1369_s9 = smov 0   ;;  %s1371_s10 = smov 0   ;;  %s1638_s0 = inlined_call_operand.vmem [shape: bf16[512,147], index: 0, kind: input, shape index: {}]   ;;  %s1639_s1 = inlined_call_operand.vmem [shape: bf16[147,8], index: 1, kind: input, shape index: {}]   ;;  %s1640_s2 = inlined_call_operand.vmem [shape: bf16[512,8], index: 2, kind: output, shape index: {}]  }
   0x1   :  { %s1373_s11 = smov 0  }
   0x2 LB: > { %s24_s12 = sadd.s32 1, %s1345_s10  ;;  %p1091_p0 = scmp.ge.s32.totalorder %s1349_s11, 1  ;;  %s1349_s11 = sphi %s1373_s11, %s12_s11   ;;  %s1345_s10 = sphi %s1371_s10, %s1642_s10   ;;  %s1341_s9 = sphi %s1369_s9, %s1641_s9  }
   0x3   : > { %p26_p1 = scmp.ge.s32.totalorder %s24_s12, 2  ;;  %p144_p2 = scmp.lt.s32.totalorder %s1349_s11, 3 }
   0x5   : > { %s1644_s12 = smov (%p26_p1, %s24_s12), 0  ;;  %p145_p3 = pnand %p1091_p0, %p144_p2 }
   0x6   : > { %s1092_s19 = sshll.u32 (!%p145_p3), %s1341_s9, 5 }
   0x7   : > { %148 = sbr.rel (%p145_p3) target bundleno = 320 (0x140), region = 28  ;;  %p178_p4 = scmp.lt.s32.totalorder (!%p145_p3), %s1092_s19, 63 }
   0xc   : > { %v1269_v0 = vld [vmem:[%s1639_s1 + $0x38] sm:$0xff]   ;;  %v1351_v1 = vmov 0   ;;  %v1270_v2 = vld [vmem:[%s1639_s1 + $0x30] sm:$0xff]   ;;  %v1271_v3 = vld [vmem:[%s1639_s1 + $0x28] sm:$0xff]   ;;  %s1646_s19 = smov (!%p178_p4, %s1092_s19), 63  ;;  %vm205_vm0 = vcmask 64512  }
   0xd   : > { %578 = vmatprep.subr.bf16.mxu0 %v1351_v1  ;;  %1222 = vmatprep.subr.bf16.mxu1 %v1351_v1  ;;  %v1272_v4 = vld [vmem:[%s1639_s1 + $0x20] sm:$0xff]   ;;  %s1189_s22 = sshll.u32 %s1646_s19, 3  ;;  %v1352_v5 = vmov 0.0   ;;  %v1273_v6 = vld [vmem:[%s1639_s1 + $0x18] sm:$0xff]   ;;  %vm522_vm1 = vcmask 154624   ;;  %v1274_v9 = vld [vmem:[%s1639_s1 + $0x10] sm:$0xff]  }
   0xe   : > { %579 = vmatpush1.bf16.msra.mxu0 %v1269_v0  ;;  %1232 = vmatpush1.bf16.msra.mxu1 %v1269_v0  ;;  %206 = vst.msk [vmem:[#allocation2] sm:$0xff] %vm205_vm0, %v1352_v5  ;;  %207 = vst.msk [vmem:[#allocation2 + $0x8] sm:$0xff] %vm205_vm0, %v1352_v5  ;;  %s1447_s25 = scalar_lea.vmem %s1638_s0, %s1189_s22  ;;  %vm571_vm2 = vcmask 1040384   ;;  %v1275_v10 = vld [vmem:[%s1639_s1 + $0x8] sm:$0xff]   ;;  %vm572_vm3 = vcmask 1041408   ;;  %v1353_v11 = vmov 65535  }
   0xf   : > { %580 = vmatprep.subr.bf16.mxu0 %v1351_v1  ;;  %1223 = vmatprep.subr.bf16.mxu1 %v1351_v1  ;;  %208 = vst.msk [vmem:[#allocation2 + $0x10] sm:$0xff] %vm205_vm0, %v1352_v5  ;;  %209 = vst.msk [vmem:[#allocation2 + $0x18] sm:$0xff] %vm205_vm0, %v1352_v5  ;;  %v1281_v7 = vld [vmem:[%s1447_s25 + $0x4] ss:$8 sps:$4 sm:$0xff]   ;;  %v573_v12 = vsel %vm571_vm2, 4294967295, %v1353_v11  ;;  %s1096_s13 = sshll.u32 %s1646_s19, 2 }
  0x10   : > { %210 = vst.msk [vmem:[#allocation2 + $0x20] sm:$0xff] %vm205_vm0, %v1352_v5  ;;  %211 = vst.msk [vmem:[#allocation2 + $0x28] sm:$0xff] %vm205_vm0, %v1352_v5  ;;  %v1284_v8 = vld [vmem:[%s1447_s25 + $0x84] ss:$8 sps:$4 sm:$0xff]   ;;  %1139 = vmatprep.mubr.msk.bf16.mxu0 %vm522_vm1, %v1281_v7  ;;  %v574_v15 = vsel %vm572_vm3, %v573_v12, 0  ;;  %s1535_s16 = scalar_lea.vmem %s1640_s2, %s1096_s13  ;;  %vm967_vm4 = vcmask 60416  }
  0x11   : > { %212 = vst.msk [vmem:[#allocation2 + $0x30] sm:$0xff] %vm205_vm0, %v1352_v5  ;;  %213 = vst.msk [vmem:[#allocation2 + $0x38] sm:$0xff] %vm205_vm0, %v1352_v5  ;;  %1147 = vmatprep.mubr.msk.bf16.mxu1 %vm522_vm1, %v1284_v8  ;;  %v1276_v13 = vld [vmem:[%s1639_s1] sm:$0xff]   ;;  %v1277_v14 = vld [vmem:[%s1639_s1 + $0x48] ss:$0 sps:$4 sm:$0x33]  }
  0x12   : > { %581 = vmatpush1.bf16.msra.mxu0 %v1270_v2  ;;  %1233 = vmatpush1.bf16.msra.mxu1 %v1270_v2  ;;  %214 = vst.msk [vmem:[#allocation2 + $0x40] sm:$0xff] %vm205_vm0, %v1352_v5  ;;  %215 = vst.msk [vmem:[#allocation2 + $0x48] sm:$0xff] %vm205_vm0, %v1352_v5  ;;  %v576_v16 = vand.u32 %v1277_v14, %v574_v15  ;;  %v1278_v17 = vld [vmem:[%s1639_s1 + $0x40] sm:$0xff]   ;;  %v1285_v20 = vld [vmem:[%s1447_s25 + $0x14] ss:$8 sps:$4 sm:$0xff]  }
  0x13   : > { %582 = vmatprep.subr.bf16.mxu0 %v1351_v1  ;;  %1224 = vmatprep.subr.bf16.mxu1 %v1351_v1  ;;  %216 = vst.msk [vmem:[#allocation2 + $0x50] sm:$0xff] %vm205_vm0, %v1352_v5  ;;  %217 = vst.msk [vmem:[#allocation2 + $0x58] sm:$0xff] %vm205_vm0, %v1352_v5  ;;  %v1279_v18 = vld [vmem:[%s1447_s25] ss:$8 sps:$4 sm:$0xff]   ;;  %v1287_v21 = vld [vmem:[%s1447_s25 + $0x94] ss:$8 sps:$4 sm:$0xff]  }
  0x14   : > { %218 = vst.msk [vmem:[#allocation2 + $0x60] sm:$0xff] %vm205_vm0, %v1352_v5  ;;  %219 = vst.msk [vmem:[#allocation2 + $0x68] sm:$0xff] %vm205_vm0, %v1352_v5  ;;  %v1282_v19 = vld [vmem:[%s1447_s25 + $0x80] ss:$8 sps:$4 sm:$0xff]   ;;  %v1289_v22 = vld [vmem:[%s1447_s25 + $0x10] ss:$8 sps:$4 sm:$0xff]  }
  0x15   : > { %220 = vst.msk [vmem:[#allocation2 + $0x70] sm:$0xff] %vm205_vm0, %v1352_v5  ;;  %221 = vst.msk [vmem:[#allocation2 + $0x78] sm:$0xff] %vm205_vm0, %v1352_v5  ;;  %v1290_v23 = vld [vmem:[%s1447_s25 + $0x90] ss:$8 sps:$4 sm:$0xff]   ;;  %v1291_v24 = vld [vmem:[%s1447_s25 + $0x24] ss:$8 sps:$4 sm:$0xff]  }
  0x16   : > { %583 = vmatpush1.bf16.msra.mxu0 %v1271_v3  ;;  %1234 = vmatpush1.bf16.msra.mxu1 %v1271_v3  ;;  %222 = vst.msk [vmem:[#allocation2 + $0x80] sm:$0xff] %vm205_vm0, %v1352_v5  ;;  %223 = vst.msk [vmem:[#allocation2 + $0x88] sm:$0xff] %vm205_vm0, %v1352_v5  ;;  %v1293_v25 = vld [vmem:[%s1447_s25 + $0xa4] ss:$8 sps:$4 sm:$0xff]   ;;  %v1295_v26 = vld [vmem:[%s1447_s25 + $0x20] ss:$8 sps:$4 sm:$0xff]  }
  0x17   : > { %584 = vmatprep.subr.bf16.mxu0 %v1351_v1  ;;  %1225 = vmatprep.subr.bf16.mxu1 %v1351_v1  ;;  %224 = vst.msk [vmem:[#allocation2 + $0x90] sm:$0xff] %vm205_vm0, %v1352_v5  ;;  %225 = vst.msk [vmem:[#allocation2 + $0x98] sm:$0xff] %vm205_vm0, %v1352_v5  ;;  %v1296_v27 = vld [vmem:[%s1447_s25 + $0xa0] ss:$8 sps:$4 sm:$0xff]   ;;  %v1297_v28 = vld [vmem:[%s1447_s25 + $0x34] ss:$8 sps:$4 sm:$0xff]  }
  0x18   : > { %226 = vst.msk [vmem:[#allocation2 + $0xa0] sm:$0xff] %vm205_vm0, %v1352_v5  ;;  %227 = vst.msk [vmem:[#allocation2 + $0xa8] sm:$0xff] %vm205_vm0, %v1352_v5  ;;  %v1299_v29 = vld [vmem:[%s1447_s25 + $0xb4] ss:$8 sps:$4 sm:$0xff]   ;;  %v1301_v30 = vld [vmem:[%s1447_s25 + $0x30] ss:$8 sps:$4 sm:$0xff]  }
  0x19   : > { %228 = vst.msk [vmem:[#allocation2 + $0xb0] sm:$0xff] %vm205_vm0, %v1352_v5  ;;  %229 = vst.msk [vmem:[#allocation2 + $0xb8] sm:$0xff] %vm205_vm0, %v1352_v5  ;;  %v1302_v31 = vld [vmem:[%s1447_s25 + $0xb0] ss:$8 sps:$4 sm:$0xff]   ;;  %v1303_v32 = vld [vmem:[%s1447_s25 + $0x44] ss:$8 sps:$4 sm:$0xff]  }
  0x1a   : > { %230 = vst.msk [vmem:[#allocation2 + $0xc0] sm:$0xff] %vm205_vm0, %v1352_v5  ;;  %231 = vst.msk [vmem:[#allocation2 + $0xc8] sm:$0xff] %vm205_vm0, %v1352_v5  ;;  %585 = vmatpush1.bf16.msra.mxu0 %v1272_v4  ;;  %1235 = vmatpush1.bf16.msra.mxu1 %v1272_v4  ;;  %v1305_v33 = vld [vmem:[%s1447_s25 + $0xc4] ss:$8 sps:$4 sm:$0xff]   ;;  %v1307_v34 = vld [vmem:[%s1447_s25 + $0x40] ss:$8 sps:$4 sm:$0xff]  }
  0x1b   : > { %232 = vst.msk [vmem:[#allocation2 + $0xd0] sm:$0xff] %vm205_vm0, %v1352_v5  ;;  %233 = vst.msk [vmem:[#allocation2 + $0xd8] sm:$0xff] %vm205_vm0, %v1352_v5  ;;  %586 = vmatprep.subr.bf16.mxu0 %v1351_v1  ;;  %1226 = vmatprep.subr.bf16.mxu1 %v1351_v1  ;;  %v1308_v35 = vld [vmem:[%s1447_s25 + $0xc0] ss:$8 sps:$4 sm:$0xff]   ;;  %v1309_v36 = vld [vmem:[%s1447_s25 + $0x54] ss:$8 sps:$4 sm:$0xff]  }
  0x1c   : > { %234 = vst.msk [vmem:[#allocation2 + $0xe0] sm:$0xff] %vm205_vm0, %v1352_v5  ;;  %235 = vst.msk [vmem:[#allocation2 + $0xe8] sm:$0xff] %vm205_vm0, %v1352_v5  ;;  %v1311_v37 = vld [vmem:[%s1447_s25 + $0xd4] ss:$8 sps:$4 sm:$0xff]   ;;  %v1313_v38 = vld [vmem:[%s1447_s25 + $0x50] ss:$8 sps:$4 sm:$0xff]  }
  0x1d   : > { %236 = vst.msk [vmem:[#allocation2 + $0xf0] sm:$0xff] %vm205_vm0, %v1352_v5  ;;  %237 = vst.msk [vmem:[#allocation2 + $0xf8] sm:$0xff] %vm205_vm0, %v1352_v5  ;;  %v1314_v39 = vld [vmem:[%s1447_s25 + $0xd0] ss:$8 sps:$4 sm:$0xff]   ;;  %v1315_v40 = vld [vmem:[%s1447_s25 + $0x64] ss:$8 sps:$4 sm:$0xff]  }
  0x1e   : > { %587 = vmatpush1.bf16.msra.mxu0 %v1273_v6  ;;  %1236 = vmatpush1.bf16.msra.mxu1 %v1273_v6  ;;  %v1317_v41 = vld [vmem:[%s1447_s25 + $0xe4] ss:$8 sps:$4 sm:$0xff]   ;;  %v1319_v42 = vld [vmem:[%s1447_s25 + $0x60] ss:$8 sps:$4 sm:$0xff]   ;;  %v1321_v44 = vld [vmem:[%s1447_s25 + $0x74] ss:$8 sps:$4 sm:$0xff]  }
  0x1f   : > { %588 = vmatprep.subr.bf16.mxu0 %v1351_v1  ;;  %1227 = vmatprep.subr.bf16.mxu1 %v1351_v1  ;;  %v1320_v43 = vld [vmem:[%s1447_s25 + $0xe0] ss:$8 sps:$4 sm:$0xff]   ;;  %v1323_v45 = vld [vmem:[%s1447_s25 + $0xf4] ss:$8 sps:$4 sm:$0xff]   ;;  %v1325_v46 = vld [vmem:[%s1447_s25 + $0x70] ss:$8 sps:$4 sm:$0xff]  }
  0x20   : > { %v1326_v47 = vld [vmem:[%s1447_s25 + $0xf0] ss:$8 sps:$4 sm:$0xff]   ;;  %v238_v48 = vld [vmem:[#allocation2] sm:$0xff]  ;;  %v239_v56 = vld [vmem:[#allocation2 + $0x8] sm:$0xff] }
  0x21   : > { %v254_v49 = vld [vmem:[#allocation2 + $0x80] sm:$0xff]  ;;  %v255_v57 = vld [vmem:[#allocation2 + $0x88] sm:$0xff]  ;;  %v240_v0 = vld [vmem:[#allocation2 + $0x10] sm:$0xff] }
  0x22   : > { %589 = vmatpush1.bf16.msra.mxu0 %v1274_v9  ;;  %1237 = vmatpush1.bf16.msra.mxu1 %v1274_v9  ;;  %v241_v6 = vld [vmem:[#allocation2 + $0x18] sm:$0xff] }
  0x23   : > { %590 = vmatprep.subr.bf16.mxu0 %v1351_v1  ;;  %1228 = vmatprep.subr.bf16.mxu1 %v1351_v1  ;;  %v257_v11 = vld [vmem:[#allocation2 + $0x98] sm:$0xff] }
  0x26   : > { %591 = vmatpush1.bf16.msra.mxu0 %v1275_v10  ;;  %1238 = vmatpush1.bf16.msra.mxu1 %v1275_v10 }
  0x27   : > { %592 = vmatprep.subr.bf16.mxu0 %v1351_v1  ;;  %1229 = vmatprep.subr.bf16.mxu1 %v1351_v1 }
  0x2a   : > { %593 = vmatpush1.bf16.msra.mxu0 %v1276_v13  ;;  %1239 = vmatpush1.bf16.msra.mxu1 %v1276_v13 }
  0x2b   : > { %606 = vmatprep.subr.bf16.mxu0 %v1351_v1  ;;  %1230 = vmatprep.subr.bf16.mxu1 %v1351_v1 }
  0x2e   : > { %607 = vmatpush2.bf16.msra.mxu0 %v576_v16  ;;  %1240 = vmatpush2.bf16.msra.mxu1 %v576_v16 }
  0x2f   : > { %608 = vmatprep.subr.bf16.mxu0 %v1351_v1  ;;  %1231 = vmatprep.subr.bf16.mxu1 %v1351_v1  ;;  %v256_v1 = vld [vmem:[#allocation2 + $0x90] sm:$0xff] }
  0x32   : > { %609 = vmatpush2.bf16.msra.mxu0 %v1278_v17  ;;  %1241 = vmatpush2.bf16.msra.mxu1 %v1278_v17 }
  0x35   : > { %611 = vmatmul.mubr.bf16.vlgmr.msra.gmra.mxu0 %v1279_v18  ;;  %675 = vmatmul.mubr.bf16.vlgmr.msra.gmra.mxu1 %v1282_v19  ;;  %v242_v18 = vld [vmem:[#allocation2 + $0x20] sm:$0xff] }
  0x36   : > { %1140 = vmatprep.mubr.msk.bf16.mxu0 %vm522_vm1, %v1285_v20  ;;  %1148 = vmatprep.mubr.msk.bf16.mxu1 %vm522_vm1, %v1287_v21 }
  0x3d   : > { %619 = vmatmul.mubr.bf16.gmra.mxu0 %v1289_v22  ;;  %683 = vmatmul.mubr.bf16.gmra.mxu1 %v1290_v23  ;;  %v258_v23 = vld [vmem:[#allocation2 + $0xa0] sm:$0xff] }
  0x3e   : > { %1141 = vmatprep.mubr.msk.bf16.mxu0 %vm522_vm1, %v1291_v24  ;;  %1149 = vmatprep.mubr.msk.bf16.mxu1 %vm522_vm1, %v1293_v25 }
  0x45   : > { %627 = vmatmul.mubr.bf16.gmra.mxu0 %v1295_v26  ;;  %691 = vmatmul.mubr.bf16.gmra.mxu1 %v1296_v27 }
  0x46   : > { %1142 = vmatprep.mubr.msk.bf16.mxu0 %vm522_vm1, %v1297_v28  ;;  %1150 = vmatprep.mubr.msk.bf16.mxu1 %vm522_vm1, %v1299_v29 }
  0x4d   : > { %635 = vmatmul.mubr.bf16.gmra.mxu0 %v1301_v30  ;;  %699 = vmatmul.mubr.bf16.gmra.mxu1 %v1302_v31  ;;  %v243_v30 = vld [vmem:[#allocation2 + $0x28] sm:$0xff] }
  0x4e   : > { %1143 = vmatprep.mubr.msk.bf16.mxu0 %vm522_vm1, %v1303_v32  ;;  %1151 = vmatprep.mubr.msk.bf16.mxu1 %vm522_vm1, %v1305_v33 }
  0x55   : > { %643 = vmatmul.mubr.bf16.gmra.mxu0 %v1307_v34  ;;  %707 = vmatmul.mubr.bf16.gmra.mxu1 %v1308_v35  ;;  %v259_v35 = vld [vmem:[#allocation2 + $0xa8] sm:$0xff] }
  0x56   : > { %1144 = vmatprep.mubr.msk.bf16.mxu0 %vm522_vm1, %v1309_v36  ;;  %1152 = vmatprep.mubr.msk.bf16.mxu1 %vm522_vm1, %v1311_v37 }
  0x5d   : > { %651 = vmatmul.mubr.bf16.gmra.mxu0 %v1313_v38  ;;  %715 = vmatmul.mubr.bf16.gmra.mxu1 %v1314_v39 }
  0x5e   : > { %1145 = vmatprep.mubr.msk.bf16.mxu0 %vm522_vm1, %v1315_v40  ;;  %1153 = vmatprep.mubr.msk.bf16.mxu1 %vm522_vm1, %v1317_v41 }
  0x65   : > { %659 = vmatmul.mubr.bf16.gmra.mxu0 %v1319_v42  ;;  %723 = vmatmul.mubr.bf16.gmra.mxu1 %v1320_v43  ;;  %v244_v42 = vld [vmem:[#allocation2 + $0x30] sm:$0xff] }
  0x66   : > { %1146 = vmatprep.mubr.msk.bf16.mxu0 %vm522_vm1, %v1321_v44  ;;  %1154 = vmatprep.mubr.msk.bf16.mxu1 %vm522_vm1, %v1323_v45 }
  0x6d   : > { %667 = vmatmul.mubr.bf16.gmra.mxu0 %v1325_v46  ;;  %731 = vmatmul.mubr.bf16.gmra.mxu1 %v1326_v47  ;;  %v260_v47 = vld [vmem:[#allocation2 + $0xb0] sm:$0xff] }
  0xf5   : > { %v612_v50 = vpop.f32.mrf.mxu0  ;;  %v676_v51 = vpop.f32.mrf.mxu1 }
  0xf6   : > { %v739_v52 = vadd.f32 %v612_v50, %v238_v48  ;;  %v755_v53 = vadd.f32 %v676_v51, %v254_v49 }
  0xf7   : > { %v614_v54 = vpop.f32.mrf.mxu0  ;;  %v678_v55 = vpop.f32.mrf.mxu1 }
  0xf8   : > { %772 = vst.msk [vmem:[#allocation2] sm:$0xff] %vm205_vm0, %v739_v52  ;;  %788 = vst.msk [vmem:[#allocation2 + $0x80] sm:$0xff] %vm205_vm0, %v755_v53  ;;  %v245_v54 = vld [vmem:[#allocation2 + $0x38] sm:$0xff] }
  0xf9   : > { %v615_v58 = vpop.f32.mrf.mxu0  ;;  %v679_v59 = vpop.f32.mrf.mxu1 }
  0xfa   : > { %v740_v60 = vadd.f32 %v615_v58, %v239_v56  ;;  %v756_v61 = vadd.f32 %v679_v59, %v255_v57  ;;  %v261_v59 = vld [vmem:[#allocation2 + $0xb8] sm:$0xff] }
  0xfb   : > { %v617_v62 = vpop.f32.mrf.mxu0  ;;  %v681_v63 = vpop.f32.mrf.mxu1 }
  0xfc   : > { %773 = vst.msk [vmem:[#allocation2 + $0x8] sm:$0xff] %vm205_vm0, %v740_v60  ;;  %789 = vst.msk [vmem:[#allocation2 + $0x88] sm:$0xff] %vm205_vm0, %v756_v61 }
  0xfd   : > { %v620_v2 = vpop.f32.mrf.mxu0  ;;  %v684_v3 = vpop.f32.mrf.mxu1 }
  0xfe   : > { %v741_v4 = vadd.f32 %v620_v2, %v240_v0  ;;  %v757_v5 = vadd.f32 %v684_v3, %v256_v1  ;;  %v246_v2 = vld [vmem:[#allocation2 + $0x40] sm:$0xff] }
  0xff   : > { %v807_v7 = vld [vmem:[#allocation2] sm:$0xff]  ;;  %v622_v9 = vpop.f32.mrf.mxu0  ;;  %v686_v10 = vpop.f32.mrf.mxu1 }
 0x100   : > { %v823_v8 = vld [vmem:[#allocation2 + $0x80] sm:$0xff]  ;;  %v1190_v12 = vpack.c.bf16 %v807_v7, %v807_v7  ;;  %774 = vst.msk [vmem:[#allocation2 + $0x10] sm:$0xff] %vm205_vm0, %v741_v4  ;;  %790 = vst.msk [vmem:[#allocation2 + $0x90] sm:$0xff] %vm205_vm0, %v757_v5 }
 0x101   : > { %v1206_v13 = vpack.c.bf16 %v823_v8, %v823_v8  ;;  %v623_v14 = vpop.f32.mrf.mxu0  ;;  %v687_v15 = vpop.f32.mrf.mxu1  ;;  %v262_v7 = vld [vmem:[#allocation2 + $0xc0] sm:$0xff] }
 0x102   : > { %968 = vst.msk [vmem:[%s1535_s16] sm:$0xf] %vm967_vm4, %v1190_v12  ;;  %v742_v16 = vadd.f32 %v623_v14, %v241_v6  ;;  %v758_v17 = vadd.f32 %v687_v15, %v257_v11  ;;  %v247_v14 = vld [vmem:[#allocation2 + $0x48] sm:$0xff] }
 0x103   : > { %984 = vst.msk [vmem:[%s1535_s16 + $0x40] sm:$0xf] %vm967_vm4, %v1206_v13  ;;  %v808_v19 = vld [vmem:[#allocation2 + $0x8] sm:$0xff]  ;;  %v625_v21 = vpop.f32.mrf.mxu0  ;;  %v689_v22 = vpop.f32.mrf.mxu1 }
 0x104   : > { %v824_v20 = vld [vmem:[#allocation2 + $0x88] sm:$0xff]  ;;  %v1191_v24 = vpack.c.bf16 %v808_v19, %v808_v19  ;;  %775 = vst.msk [vmem:[#allocation2 + $0x18] sm:$0xff] %vm205_vm0, %v742_v16  ;;  %791 = vst.msk [vmem:[#allocation2 + $0x98] sm:$0xff] %vm205_vm0, %v758_v17 }
 0x105   : > { %v1207_v25 = vpack.c.bf16 %v824_v20, %v824_v20  ;;  %v628_v26 = vpop.f32.mrf.mxu0  ;;  %v692_v27 = vpop.f32.mrf.mxu1  ;;  %v263_v19 = vld [vmem:[#allocation2 + $0xc8] sm:$0xff] }
 0x106   : > { %969 = vst.msk [vmem:[%s1535_s16 + $0x4] sm:$0xf] %vm967_vm4, %v1191_v24  ;;  %v743_v28 = vadd.f32 %v628_v26, %v242_v18  ;;  %v759_v29 = vadd.f32 %v692_v27, %v258_v23  ;;  %v248_v26 = vld [vmem:[#allocation2 + $0x50] sm:$0xff] }
 0x107   : > { %985 = vst.msk [vmem:[%s1535_s16 + $0x44] sm:$0xf] %vm967_vm4, %v1207_v25  ;;  %v809_v31 = vld [vmem:[#allocation2 + $0x10] sm:$0xff]  ;;  %v630_v33 = vpop.f32.mrf.mxu0  ;;  %v694_v34 = vpop.f32.mrf.mxu1 }
 0x108   : > { %v825_v32 = vld [vmem:[#allocation2 + $0x90] sm:$0xff]  ;;  %v1192_v36 = vpack.c.bf16 %v809_v31, %v809_v31  ;;  %776 = vst.msk [vmem:[#allocation2 + $0x20] sm:$0xff] %vm205_vm0, %v743_v28  ;;  %792 = vst.msk [vmem:[#allocation2 + $0xa0] sm:$0xff] %vm205_vm0, %v759_v29 }
 0x109   : > { %v1208_v37 = vpack.c.bf16 %v825_v32, %v825_v32  ;;  %v631_v38 = vpop.f32.mrf.mxu0  ;;  %v695_v39 = vpop.f32.mrf.mxu1  ;;  %v264_v31 = vld [vmem:[#allocation2 + $0xd0] sm:$0xff] }
 0x10a   : > { %970 = vst.msk [vmem:[%s1535_s16 + $0x8] sm:$0xf] %vm967_vm4, %v1192_v36  ;;  %v744_v40 = vadd.f32 %v631_v38, %v243_v30  ;;  %v760_v41 = vadd.f32 %v695_v39, %v259_v35  ;;  %v249_v38 = vld [vmem:[#allocation2 + $0x58] sm:$0xff] }
 0x10b   : > { %986 = vst.msk [vmem:[%s1535_s16 + $0x48] sm:$0xf] %vm967_vm4, %v1208_v37  ;;  %v810_v43 = vld [vmem:[#allocation2 + $0x18] sm:$0xff]  ;;  %v633_v45 = vpop.f32.mrf.mxu0  ;;  %v697_v46 = vpop.f32.mrf.mxu1 }
 0x10c   : > { %v826_v44 = vld [vmem:[#allocation2 + $0x98] sm:$0xff]  ;;  %v1193_v48 = vpack.c.bf16 %v810_v43, %v810_v43  ;;  %777 = vst.msk [vmem:[#allocation2 + $0x28] sm:$0xff] %vm205_vm0, %v744_v40  ;;  %793 = vst.msk [vmem:[#allocation2 + $0xa8] sm:$0xff] %vm205_vm0, %v760_v41 }
 0x10d   : > { %v1209_v49 = vpack.c.bf16 %v826_v44, %v826_v44  ;;  %v636_v50 = vpop.f32.mrf.mxu0  ;;  %v700_v51 = vpop.f32.mrf.mxu1  ;;  %v265_v43 = vld [vmem:[#allocation2 + $0xd8] sm:$0xff] }
 0x10e   : > { %971 = vst.msk [vmem:[%s1535_s16 + $0xc] sm:$0xf] %vm967_vm4, %v1193_v48  ;;  %v745_v52 = vadd.f32 %v636_v50, %v244_v42  ;;  %v761_v53 = vadd.f32 %v700_v51, %v260_v47  ;;  %v250_v50 = vld [vmem:[#allocation2 + $0x60] sm:$0xff] }
 0x10f   : > { %987 = vst.msk [vmem:[%s1535_s16 + $0x4c] sm:$0xf] %vm967_vm4, %v1209_v49  ;;  %v811_v55 = vld [vmem:[#allocation2 + $0x20] sm:$0xff]  ;;  %v638_v57 = vpop.f32.mrf.mxu0  ;;  %v702_v58 = vpop.f32.mrf.mxu1 }
 0x110   : > { %v827_v56 = vld [vmem:[#allocation2 + $0xa0] sm:$0xff]  ;;  %v1194_v60 = vpack.c.bf16 %v811_v55, %v811_v55  ;;  %778 = vst.msk [vmem:[#allocation2 + $0x30] sm:$0xff] %vm205_vm0, %v745_v52  ;;  %794 = vst.msk [vmem:[#allocation2 + $0xb0] sm:$0xff] %vm205_vm0, %v761_v53 }
 0x111   : > { %v1210_v61 = vpack.c.bf16 %v827_v56, %v827_v56  ;;  %v639_v62 = vpop.f32.mrf.mxu0  ;;  %v703_v63 = vpop.f32.mrf.mxu1  ;;  %v266_v55 = vld [vmem:[#allocation2 + $0xe0] sm:$0xff] }
 0x112   : > { %972 = vst.msk [vmem:[%s1535_s16 + $0x10] sm:$0xf] %vm967_vm4, %v1194_v60  ;;  %v746_v0 = vadd.f32 %v639_v62, %v245_v54  ;;  %v762_v1 = vadd.f32 %v703_v63, %v261_v59  ;;  %v251_v62 = vld [vmem:[#allocation2 + $0x68] sm:$0xff] }
 0x113   : > { %988 = vst.msk [vmem:[%s1535_s16 + $0x50] sm:$0xf] %vm967_vm4, %v1210_v61  ;;  %v812_v3 = vld [vmem:[#allocation2 + $0x28] sm:$0xff]  ;;  %v641_v5 = vpop.f32.mrf.mxu0  ;;  %v705_v6 = vpop.f32.mrf.mxu1 }
 0x114   : > { %v828_v4 = vld [vmem:[#allocation2 + $0xa8] sm:$0xff]  ;;  %v1195_v8 = vpack.c.bf16 %v812_v3, %v812_v3  ;;  %779 = vst.msk [vmem:[#allocation2 + $0x38] sm:$0xff] %vm205_vm0, %v746_v0  ;;  %795 = vst.msk [vmem:[#allocation2 + $0xb8] sm:$0xff] %vm205_vm0, %v762_v1 }
 0x115   : > { %v1211_v9 = vpack.c.bf16 %v828_v4, %v828_v4  ;;  %v644_v10 = vpop.f32.mrf.mxu0  ;;  %v708_v11 = vpop.f32.mrf.mxu1  ;;  %v267_v3 = vld [vmem:[#allocation2 + $0xe8] sm:$0xff] }
 0x116   : > { %973 = vst.msk [vmem:[%s1535_s16 + $0x14] sm:$0xf] %vm967_vm4, %v1195_v8  ;;  %v747_v12 = vadd.f32 %v644_v10, %v246_v2  ;;  %v763_v13 = vadd.f32 %v708_v11, %v262_v7  ;;  %v252_v10 = vld [vmem:[#allocation2 + $0x70] sm:$0xff] }
 0x117   : > { %989 = vst.msk [vmem:[%s1535_s16 + $0x54] sm:$0xf] %vm967_vm4, %v1211_v9  ;;  %v813_v15 = vld [vmem:[#allocation2 + $0x30] sm:$0xff]  ;;  %v646_v17 = vpop.f32.mrf.mxu0  ;;  %v710_v18 = vpop.f32.mrf.mxu1 }
 0x118   : > { %v829_v16 = vld [vmem:[#allocation2 + $0xb0] sm:$0xff]  ;;  %v1196_v20 = vpack.c.bf16 %v813_v15, %v813_v15  ;;  %780 = vst.msk [vmem:[#allocation2 + $0x40] sm:$0xff] %vm205_vm0, %v747_v12  ;;  %796 = vst.msk [vmem:[#allocation2 + $0xc0] sm:$0xff] %vm205_vm0, %v763_v13 }
 0x119   : > { %v1212_v21 = vpack.c.bf16 %v829_v16, %v829_v16  ;;  %v647_v22 = vpop.f32.mrf.mxu0  ;;  %v711_v23 = vpop.f32.mrf.mxu1  ;;  %v268_v15 = vld [vmem:[#allocation2 + $0xf0] sm:$0xff] }
 0x11a   : > { %974 = vst.msk [vmem:[%s1535_s16 + $0x18] sm:$0xf] %vm967_vm4, %v1196_v20  ;;  %v748_v24 = vadd.f32 %v647_v22, %v247_v14  ;;  %v764_v25 = vadd.f32 %v711_v23, %v263_v19  ;;  %v253_v22 = vld [vmem:[#allocation2 + $0x78] sm:$0xff] }
 0x11b   : > { %990 = vst.msk [vmem:[%s1535_s16 + $0x58] sm:$0xf] %vm967_vm4, %v1212_v21  ;;  %v814_v27 = vld [vmem:[#allocation2 + $0x38] sm:$0xff]  ;;  %v649_v29 = vpop.f32.mrf.mxu0  ;;  %v713_v30 = vpop.f32.mrf.mxu1 }
 0x11c   : > { %v830_v28 = vld [vmem:[#allocation2 + $0xb8] sm:$0xff]  ;;  %v1197_v32 = vpack.c.bf16 %v814_v27, %v814_v27  ;;  %781 = vst.msk [vmem:[#allocation2 + $0x48] sm:$0xff] %vm205_vm0, %v748_v24  ;;  %797 = vst.msk [vmem:[#allocation2 + $0xc8] sm:$0xff] %vm205_vm0, %v764_v25 }
 0x11d   : > { %v1213_v33 = vpack.c.bf16 %v830_v28, %v830_v28  ;;  %v652_v34 = vpop.f32.mrf.mxu0  ;;  %v716_v35 = vpop.f32.mrf.mxu1  ;;  %v269_v27 = vld [vmem:[#allocation2 + $0xf8] sm:$0xff] }
 0x11e   : > { %975 = vst.msk [vmem:[%s1535_s16 + $0x1c] sm:$0xf] %vm967_vm4, %v1197_v32  ;;  %v749_v36 = vadd.f32 %v652_v34, %v248_v26  ;;  %v765_v37 = vadd.f32 %v716_v35, %v264_v31 }
 0x11f   : > { %991 = vst.msk [vmem:[%s1535_s16 + $0x5c] sm:$0xf] %vm967_vm4, %v1213_v33  ;;  %v815_v39 = vld [vmem:[#allocation2 + $0x40] sm:$0xff]  ;;  %v654_v41 = vpop.f32.mrf.mxu0  ;;  %v718_v42 = vpop.f32.mrf.mxu1 }
 0x120   : > { %v831_v40 = vld [vmem:[#allocation2 + $0xc0] sm:$0xff]  ;;  %v1198_v44 = vpack.c.bf16 %v815_v39, %v815_v39  ;;  %782 = vst.msk [vmem:[#allocation2 + $0x50] sm:$0xff] %vm205_vm0, %v749_v36  ;;  %798 = vst.msk [vmem:[#allocation2 + $0xd0] sm:$0xff] %vm205_vm0, %v765_v37 }
 0x121   : > { %v1214_v45 = vpack.c.bf16 %v831_v40, %v831_v40  ;;  %v655_v46 = vpop.f32.mrf.mxu0  ;;  %v719_v47 = vpop.f32.mrf.mxu1 }
 0x122   : > { %976 = vst.msk [vmem:[%s1535_s16 + $0x20] sm:$0xf] %vm967_vm4, %v1198_v44  ;;  %v750_v48 = vadd.f32 %v655_v46, %v249_v38  ;;  %v766_v49 = vadd.f32 %v719_v47, %v265_v43 }
 0x123   : > { %992 = vst.msk [vmem:[%s1535_s16 + $0x60] sm:$0xf] %vm967_vm4, %v1214_v45  ;;  %v816_v51 = vld [vmem:[#allocation2 + $0x48] sm:$0xff]  ;;  %v657_v53 = vpop.f32.mrf.mxu0  ;;  %v721_v54 = vpop.f32.mrf.mxu1 }
 0x124   : > { %v832_v52 = vld [vmem:[#allocation2 + $0xc8] sm:$0xff]  ;;  %v1199_v56 = vpack.c.bf16 %v816_v51, %v816_v51  ;;  %783 = vst.msk [vmem:[#allocation2 + $0x58] sm:$0xff] %vm205_vm0, %v750_v48  ;;  %799 = vst.msk [vmem:[#allocation2 + $0xd8] sm:$0xff] %vm205_vm0, %v766_v49 }
 0x125   : > { %v1215_v57 = vpack.c.bf16 %v832_v52, %v832_v52  ;;  %v660_v58 = vpop.f32.mrf.mxu0  ;;  %v724_v59 = vpop.f32.mrf.mxu1 }
 0x126   : > { %977 = vst.msk [vmem:[%s1535_s16 + $0x24] sm:$0xf] %vm967_vm4, %v1199_v56  ;;  %v751_v60 = vadd.f32 %v660_v58, %v250_v50  ;;  %v767_v61 = vadd.f32 %v724_v59, %v266_v55 }
 0x127   : > { %993 = vst.msk [vmem:[%s1535_s16 + $0x64] sm:$0xf] %vm967_vm4, %v1215_v57  ;;  %v817_v63 = vld [vmem:[#allocation2 + $0x50] sm:$0xff]  ;;  %v662_v1 = vpop.f32.mrf.mxu0  ;;  %v726_v2 = vpop.f32.mrf.mxu1 }
 0x128   : > { %v833_v0 = vld [vmem:[#allocation2 + $0xd0] sm:$0xff]  ;;  %v1200_v4 = vpack.c.bf16 %v817_v63, %v817_v63  ;;  %784 = vst.msk [vmem:[#allocation2 + $0x60] sm:$0xff] %vm205_vm0, %v751_v60  ;;  %800 = vst.msk [vmem:[#allocation2 + $0xe0] sm:$0xff] %vm205_vm0, %v767_v61 }
 0x129   : > { %v1216_v5 = vpack.c.bf16 %v833_v0, %v833_v0  ;;  %v663_v6 = vpop.f32.mrf.mxu0  ;;  %v727_v7 = vpop.f32.mrf.mxu1 }
 0x12a   : > { %978 = vst.msk [vmem:[%s1535_s16 + $0x28] sm:$0xf] %vm967_vm4, %v1200_v4  ;;  %v752_v8 = vadd.f32 %v663_v6, %v251_v62  ;;  %v768_v9 = vadd.f32 %v727_v7, %v267_v3 }
 0x12b   : > { %994 = vst.msk [vmem:[%s1535_s16 + $0x68] sm:$0xf] %vm967_vm4, %v1216_v5  ;;  %v818_v11 = vld [vmem:[#allocation2 + $0x58] sm:$0xff]  ;;  %v665_v13 = vpop.f32.mrf.mxu0  ;;  %v729_v14 = vpop.f32.mrf.mxu1 }
 0x12c   : > { %v834_v12 = vld [vmem:[#allocation2 + $0xd8] sm:$0xff]  ;;  %v1201_v16 = vpack.c.bf16 %v818_v11, %v818_v11  ;;  %785 = vst.msk [vmem:[#allocation2 + $0x68] sm:$0xff] %vm205_vm0, %v752_v8  ;;  %801 = vst.msk [vmem:[#allocation2 + $0xe8] sm:$0xff] %vm205_vm0, %v768_v9 }
 0x12d   : > { %v1217_v17 = vpack.c.bf16 %v834_v12, %v834_v12  ;;  %v668_v18 = vpop.f32.mrf.mxu0  ;;  %v732_v19 = vpop.f32.mrf.mxu1 }
 0x12e   : > { %979 = vst.msk [vmem:[%s1535_s16 + $0x2c] sm:$0xf] %vm967_vm4, %v1201_v16  ;;  %v753_v20 = vadd.f32 %v668_v18, %v252_v10  ;;  %v769_v21 = vadd.f32 %v732_v19, %v268_v15 }
 0x12f   : > { %995 = vst.msk [vmem:[%s1535_s16 + $0x6c] sm:$0xf] %vm967_vm4, %v1217_v17  ;;  %v819_v23 = vld [vmem:[#allocation2 + $0x60] sm:$0xff]  ;;  %v670_v25 = vpop.f32.mrf.mxu0  ;;  %v734_v26 = vpop.f32.mrf.mxu1 }
 0x130   : > { %v835_v24 = vld [vmem:[#allocation2 + $0xe0] sm:$0xff]  ;;  %v1202_v28 = vpack.c.bf16 %v819_v23, %v819_v23  ;;  %786 = vst.msk [vmem:[#allocation2 + $0x70] sm:$0xff] %vm205_vm0, %v753_v20  ;;  %802 = vst.msk [vmem:[#allocation2 + $0xf0] sm:$0xff] %vm205_vm0, %v769_v21 }
 0x131   : > { %v1218_v29 = vpack.c.bf16 %v835_v24, %v835_v24  ;;  %v671_v30 = vpop.f32.mrf.mxu0  ;;  %v735_v31 = vpop.f32.mrf.mxu1 }
 0x132   : > { %980 = vst.msk [vmem:[%s1535_s16 + $0x30] sm:$0xf] %vm967_vm4, %v1202_v28  ;;  %v754_v32 = vadd.f32 %v671_v30, %v253_v22  ;;  %v770_v33 = vadd.f32 %v735_v31, %v269_v27 }
 0x133   : > { %996 = vst.msk [vmem:[%s1535_s16 + $0x70] sm:$0xf] %vm967_vm4, %v1218_v29  ;;  %v820_v34 = vld [vmem:[#allocation2 + $0x68] sm:$0xff]  ;;  %v673_v36 = vpop.f32.mrf.mxu0  ;;  %v737_v37 = vpop.f32.mrf.mxu1 }
 0x134   : > { %v836_v35 = vld [vmem:[#allocation2 + $0xe8] sm:$0xff]  ;;  %v1203_v38 = vpack.c.bf16 %v820_v34, %v820_v34  ;;  %787 = vst.msk [vmem:[#allocation2 + $0x78] sm:$0xff] %vm205_vm0, %v754_v32  ;;  %803 = vst.msk [vmem:[#allocation2 + $0xf8] sm:$0xff] %vm205_vm0, %v770_v33 }
 0x135   : > { %v1219_v39 = vpack.c.bf16 %v836_v35, %v836_v35 }
 0x136   : > { %981 = vst.msk [vmem:[%s1535_s16 + $0x34] sm:$0xf] %vm967_vm4, %v1203_v38 }
 0x137   : > { %997 = vst.msk [vmem:[%s1535_s16 + $0x74] sm:$0xf] %vm967_vm4, %v1219_v39  ;;  %v821_v40 = vld [vmem:[#allocation2 + $0x70] sm:$0xff] }
 0x138   : > { %v837_v41 = vld [vmem:[#allocation2 + $0xf0] sm:$0xff]  ;;  %v1204_v42 = vpack.c.bf16 %v821_v40, %v821_v40 }
 0x139   : > { %v1220_v43 = vpack.c.bf16 %v837_v41, %v837_v41 }
 0x13a   : > { %982 = vst.msk [vmem:[%s1535_s16 + $0x38] sm:$0xf] %vm967_vm4, %v1204_v42 }
 0x13b   : > { %998 = vst.msk [vmem:[%s1535_s16 + $0x78] sm:$0xf] %vm967_vm4, %v1220_v43  ;;  %v822_v44 = vld [vmem:[#allocation2 + $0x78] sm:$0xff] }
 0x13c   : > { %v838_v45 = vld [vmem:[#allocation2 + $0xf8] sm:$0xff]  ;;  %v1205_v46 = vpack.c.bf16 %v822_v44, %v822_v44 }
 0x13d   : > { %v1221_v47 = vpack.c.bf16 %v838_v45, %v838_v45 }
 0x13e   : > { %983 = vst.msk [vmem:[%s1535_s16 + $0x3c] sm:$0xf] %vm967_vm4, %v1205_v46 }
 0x13f   : > { %999 = vst.msk [vmem:[%s1535_s16 + $0x7c] sm:$0xf] %vm967_vm4, %v1221_v47 }
 0x140 PF: > { %s12_s11 = sadd.s32 1, %s1349_s11   ;;  %s1641_s9 = smov %s1345_s10 }
 0x141   : > { %p9_p5 = scmp.ge.s32.totalorder %s12_s11, 4   ;;  %s1642_s10 = smov %s1644_s12 }
 0x143   :  { %11 = sbr.rel (!%p9_p5) target bundleno = 2 (0x2), region = 69 }

// kernel: densenet_forward.18
= control target key start
LH: loop header
LB: loop body
LE: loop exit
PB: predicated region body
PF: predicated region fallthrough
CT: control target
= control target key end

     0   :  { %vm604_vm0 = vcmask 60416   ;;  %s1472_s0 = inlined_call_operand.vmem [shape: bf16[512,8], index: 0, kind: input, shape index: {}]   ;;  %s1473_s1 = inlined_call_operand.vmem [shape: f32[1,8], index: 1, kind: input, shape index: {}]   ;;  %s1474_s2 = inlined_call_operand.vmem [shape: f32[1,8], index: 2, kind: input, shape index: {}]   ;;  %s1475_s3 = inlined_call_operand.vmem [shape: bf16[512,8], index: 3, kind: output, shape index: {}]  }
   0x1   :  { %v804_v0 = vld [vmem:[%s1472_s0] sm:$0xff]   ;;  %v931_v4 = vld [vmem:[%s1472_s0 + $0x8] sm:$0xff]   ;;  %v932_v5 = vld [vmem:[%s1472_s0 + $0x10] sm:$0xff]  }
   0x2   :  { %v988_v1 = vld [vmem:[%s1473_s1] ss:$0 sm:$0xff]  ;;  %v805_v2 = vunpack.c.l.bf16 %v804_v0  ;;  %v806_v3 = vunpack.c.h.bf16 %v804_v0  ;;  %v933_v6 = vld [vmem:[%s1472_s0 + $0x18] sm:$0xff]   ;;  %v809_v8 = vunpack.c.l.bf16 %v931_v4  ;;  %v810_v9 = vunpack.c.h.bf16 %v931_v4  ;;  %v935_v41 = vld [vmem:[%s1472_s0 + $0x28] sm:$0xff]  }
   0x3   :  { %v1002_v7 = vld [vmem:[%s1474_s2] ss:$0 sm:$0xff]  ;;  %v813_v10 = vunpack.c.l.bf16 %v932_v5  ;;  %v814_v11 = vunpack.c.h.bf16 %v932_v5  ;;  %v817_v14 = vunpack.c.l.bf16 %v933_v6  ;;  %v818_v15 = vunpack.c.h.bf16 %v933_v6  ;;  %v936_v42 = vld [vmem:[%s1472_s0 + $0x30] sm:$0xff]   ;;  %v937_v47 = vld [vmem:[%s1472_s0 + $0x38] sm:$0xff]  }
   0x4   :  { %v149_v12 = vmul.f32 %v805_v2, %v988_v1  ;;  %v150_v13 = vmul.f32 %v806_v3, %v988_v1  ;;  %v151_v16 = vmul.f32 %v809_v8, %v988_v1  ;;  %v152_v17 = vmul.f32 %v810_v9, %v988_v1  ;;  %v934_v36 = vld [vmem:[%s1472_s0 + $0x20] sm:$0xff]  }
   0x5   :  { %v153_v18 = vmul.f32 %v813_v10, %v988_v1  ;;  %v154_v19 = vmul.f32 %v814_v11, %v988_v1  ;;  %v155_v22 = vmul.f32 %v817_v14, %v988_v1  ;;  %v156_v23 = vmul.f32 %v818_v15, %v988_v1 }
   0x6   :  { %v220_v20 = vadd.f32 %v1002_v7, %v149_v12  ;;  %v221_v21 = vadd.f32 %v1002_v7, %v150_v13  ;;  %v222_v24 = vadd.f32 %v1002_v7, %v151_v16  ;;  %v223_v25 = vadd.f32 %v1002_v7, %v152_v17 }
   0x7   :  { %v224_v26 = vadd.f32 %v1002_v7, %v153_v18  ;;  %v225_v27 = vadd.f32 %v1002_v7, %v154_v19  ;;  %v226_v30 = vadd.f32 %v1002_v7, %v155_v22  ;;  %v227_v31 = vadd.f32 %v1002_v7, %v156_v23  ;;  %v938_v18 = vld [vmem:[%s1472_s0 + $0x40] sm:$0xff]   ;;  %v939_v23 = vld [vmem:[%s1472_s0 + $0x48] sm:$0xff]  }
   0x8   :  { %v284_v28 = vmax.f32 %v220_v20, 0.0  ;;  %v285_v29 = vmax.f32 %v221_v21, 0.0  ;;  %v286_v32 = vmax.f32 %v222_v24, 0.0  ;;  %v287_v33 = vmax.f32 %v223_v25, 0.0  ;;  %v940_v24 = vld [vmem:[%s1472_s0 + $0x50] sm:$0xff]  }
   0x9   :  { %v288_v34 = vmax.f32 %v224_v26, 0.0  ;;  %v289_v35 = vmax.f32 %v225_v27, 0.0  ;;  %v290_v39 = vmax.f32 %v226_v30, 0.0  ;;  %v291_v40 = vmax.f32 %v227_v31, 0.0 }
   0xa   :  { %v739_v37 = vpack.c.bf16 %v284_v28, %v284_v28  ;;  %v740_v38 = vpack.c.bf16 %v285_v29, %v285_v29  ;;  %v741_v43 = vpack.c.bf16 %v286_v32, %v286_v32  ;;  %v742_v44 = vpack.c.bf16 %v287_v33, %v287_v33  ;;  %v941_v29 = vld [vmem:[%s1472_s0 + $0x58] sm:$0xff]  }
   0xb   :  { %v743_v45 = vpack.c.bf16 %v288_v34, %v288_v34  ;;  %v744_v46 = vpack.c.bf16 %v289_v35, %v289_v35  ;;  %v745_v48 = vpack.c.bf16 %v290_v39, %v290_v39  ;;  %v746_v49 = vpack.c.bf16 %v291_v40, %v291_v40 }
   0xc   :  { %605 = vst.msk [vmem:[%s1475_s3] sm:$0xf] %vm604_vm0, %v739_v37  ;;  %606 = vst.msk [vmem:[%s1475_s3 + $0x4] sm:$0xf] %vm604_vm0, %v740_v38  ;;  %v821_v50 = vunpack.c.l.bf16 %v934_v36  ;;  %v822_v51 = vunpack.c.h.bf16 %v934_v36  ;;  %v825_v52 = vunpack.c.l.bf16 %v935_v41  ;;  %v826_v53 = vunpack.c.h.bf16 %v935_v41 }
   0xd   :  { %607 = vst.msk [vmem:[%s1475_s3 + $0x8] sm:$0xf] %vm604_vm0, %v741_v43  ;;  %608 = vst.msk [vmem:[%s1475_s3 + $0xc] sm:$0xf] %vm604_vm0, %v742_v44  ;;  %v829_v54 = vunpack.c.l.bf16 %v936_v42  ;;  %v830_v55 = vunpack.c.h.bf16 %v936_v42  ;;  %v833_v58 = vunpack.c.l.bf16 %v937_v47  ;;  %v834_v59 = vunpack.c.h.bf16 %v937_v47 }
   0xe   :  { %609 = vst.msk [vmem:[%s1475_s3 + $0x10] sm:$0xf] %vm604_vm0, %v743_v45  ;;  %610 = vst.msk [vmem:[%s1475_s3 + $0x14] sm:$0xf] %vm604_vm0, %v744_v46  ;;  %v157_v56 = vmul.f32 %v821_v50, %v988_v1  ;;  %v158_v57 = vmul.f32 %v822_v51, %v988_v1  ;;  %v159_v60 = vmul.f32 %v825_v52, %v988_v1  ;;  %v837_v32 = vunpack.c.l.bf16 %v938_v18 }
   0xf   :  { %611 = vst.msk [vmem:[%s1475_s3 + $0x18] sm:$0xf] %vm604_vm0, %v745_v48  ;;  %612 = vst.msk [vmem:[%s1475_s3 + $0x1c] sm:$0xf] %vm604_vm0, %v746_v49  ;;  %v160_v61 = vmul.f32 %v826_v53, %v988_v1  ;;  %v161_v62 = vmul.f32 %v829_v54, %v988_v1  ;;  %v162_v63 = vmul.f32 %v830_v55, %v988_v1  ;;  %v838_v33 = vunpack.c.h.bf16 %v938_v18 }
  0x10   :  { %v228_v0 = vadd.f32 %v1002_v7, %v157_v56  ;;  %v229_v2 = vadd.f32 %v1002_v7, %v158_v57  ;;  %v163_v3 = vmul.f32 %v833_v58, %v988_v1  ;;  %v164_v4 = vmul.f32 %v834_v59, %v988_v1 }
  0x11   :  { %v230_v5 = vadd.f32 %v1002_v7, %v159_v60  ;;  %v231_v6 = vadd.f32 %v1002_v7, %v160_v61  ;;  %v232_v8 = vadd.f32 %v1002_v7, %v161_v62  ;;  %v233_v9 = vadd.f32 %v1002_v7, %v162_v63  ;;  %v942_v62 = vld [vmem:[%s1472_s0 + $0x60] sm:$0xff]  }
  0x12   :  { %v292_v10 = vmax.f32 %v228_v0, 0.0  ;;  %v293_v11 = vmax.f32 %v229_v2, 0.0  ;;  %v234_v12 = vadd.f32 %v1002_v7, %v163_v3  ;;  %v235_v13 = vadd.f32 %v1002_v7, %v164_v4  ;;  %v943_v4 = vld [vmem:[%s1472_s0 + $0x68] sm:$0xff]  }
  0x13   :  { %v294_v14 = vmax.f32 %v230_v5, 0.0  ;;  %v295_v15 = vmax.f32 %v231_v6, 0.0  ;;  %v296_v16 = vmax.f32 %v232_v8, 0.0  ;;  %v297_v17 = vmax.f32 %v233_v9, 0.0  ;;  %v944_v5 = vld [vmem:[%s1472_s0 + $0x70] sm:$0xff]  }
  0x14   :  { %v747_v19 = vpack.c.bf16 %v292_v10, %v292_v10  ;;  %v748_v20 = vpack.c.bf16 %v293_v11, %v293_v11  ;;  %v298_v21 = vmax.f32 %v234_v12, 0.0  ;;  %v299_v22 = vmax.f32 %v235_v13, 0.0  ;;  %v945_v11 = vld [vmem:[%s1472_s0 + $0x78] sm:$0xff]  }
  0x15   :  { %v749_v25 = vpack.c.bf16 %v294_v14, %v294_v14  ;;  %v750_v26 = vpack.c.bf16 %v295_v15, %v295_v15  ;;  %v751_v27 = vpack.c.bf16 %v296_v16, %v296_v16  ;;  %v752_v28 = vpack.c.bf16 %v297_v17, %v297_v17 }
  0x16   :  { %613 = vst.msk [vmem:[%s1475_s3 + $0x20] sm:$0xf] %vm604_vm0, %v747_v19  ;;  %614 = vst.msk [vmem:[%s1475_s3 + $0x24] sm:$0xf] %vm604_vm0, %v748_v20  ;;  %v753_v30 = vpack.c.bf16 %v298_v21, %v298_v21  ;;  %v754_v31 = vpack.c.bf16 %v299_v22, %v299_v22  ;;  %v841_v34 = vunpack.c.l.bf16 %v939_v23  ;;  %v842_v35 = vunpack.c.h.bf16 %v939_v23 }
  0x17   :  { %615 = vst.msk [vmem:[%s1475_s3 + $0x28] sm:$0xf] %vm604_vm0, %v749_v25  ;;  %616 = vst.msk [vmem:[%s1475_s3 + $0x2c] sm:$0xf] %vm604_vm0, %v750_v26  ;;  %v845_v36 = vunpack.c.l.bf16 %v940_v24  ;;  %v846_v37 = vunpack.c.h.bf16 %v940_v24  ;;  %v165_v38 = vmul.f32 %v837_v32, %v988_v1  ;;  %v166_v39 = vmul.f32 %v838_v33, %v988_v1 }
  0x18   :  { %617 = vst.msk [vmem:[%s1475_s3 + $0x30] sm:$0xf] %vm604_vm0, %v751_v27  ;;  %618 = vst.msk [vmem:[%s1475_s3 + $0x34] sm:$0xf] %vm604_vm0, %v752_v28  ;;  %v849_v40 = vunpack.c.l.bf16 %v941_v29  ;;  %v850_v41 = vunpack.c.h.bf16 %v941_v29  ;;  %v167_v42 = vmul.f32 %v841_v34, %v988_v1  ;;  %v168_v43 = vmul.f32 %v842_v35, %v988_v1 }
  0x19   :  { %619 = vst.msk [vmem:[%s1475_s3 + $0x38] sm:$0xf] %vm604_vm0, %v753_v30  ;;  %620 = vst.msk [vmem:[%s1475_s3 + $0x3c] sm:$0xf] %vm604_vm0, %v754_v31  ;;  %v169_v44 = vmul.f32 %v845_v36, %v988_v1  ;;  %v170_v45 = vmul.f32 %v846_v37, %v988_v1  ;;  %v236_v46 = vadd.f32 %v1002_v7, %v165_v38  ;;  %v853_v14 = vunpack.c.l.bf16 %v942_v62 }
  0x1a   :  { %v237_v47 = vadd.f32 %v1002_v7, %v166_v39  ;;  %v171_v48 = vmul.f32 %v849_v40, %v988_v1  ;;  %v172_v49 = vmul.f32 %v850_v41, %v988_v1  ;;  %v238_v50 = vadd.f32 %v1002_v7, %v167_v42 }
  0x1b   :  { %v239_v51 = vadd.f32 %v1002_v7, %v168_v43  ;;  %v240_v52 = vadd.f32 %v1002_v7, %v169_v44  ;;  %v241_v53 = vadd.f32 %v1002_v7, %v170_v45  ;;  %v300_v54 = vmax.f32 %v236_v46, 0.0  ;;  %v946_v44 = vld [vmem:[%s1472_s0 + $0x80] sm:$0xff]  }
  0x1c   :  { %v301_v55 = vmax.f32 %v237_v47, 0.0  ;;  %v242_v56 = vadd.f32 %v1002_v7, %v171_v48  ;;  %v243_v57 = vadd.f32 %v1002_v7, %v172_v49  ;;  %v302_v58 = vmax.f32 %v238_v50, 0.0  ;;  %v947_v49 = vld [vmem:[%s1472_s0 + $0x88] sm:$0xff]   ;;  %v948_v50 = vld [vmem:[%s1472_s0 + $0x90] sm:$0xff]  }
  0x1d   :  { %v303_v59 = vmax.f32 %v239_v51, 0.0  ;;  %v304_v60 = vmax.f32 %v240_v52, 0.0  ;;  %v305_v61 = vmax.f32 %v241_v53, 0.0  ;;  %v755_v63 = vpack.c.bf16 %v300_v54, %v300_v54 }
  0x1e   :  { %v756_v0 = vpack.c.bf16 %v301_v55, %v301_v55  ;;  %v306_v2 = vmax.f32 %v242_v56, 0.0  ;;  %v307_v3 = vmax.f32 %v243_v57, 0.0  ;;  %v757_v6 = vpack.c.bf16 %v302_v58, %v302_v58  ;;  %v949_v55 = vld [vmem:[%s1472_s0 + $0x98] sm:$0xff]  }
  0x1f   :  { %v758_v8 = vpack.c.bf16 %v303_v59, %v303_v59  ;;  %v759_v9 = vpack.c.bf16 %v304_v60, %v304_v60  ;;  %v760_v10 = vpack.c.bf16 %v305_v61, %v305_v61  ;;  %621 = vst.msk [vmem:[%s1475_s3 + $0x40] sm:$0xf] %vm604_vm0, %v755_v63  ;;  %v854_v15 = vunpack.c.h.bf16 %v942_v62 }
  0x20   :  { %622 = vst.msk [vmem:[%s1475_s3 + $0x44] sm:$0xf] %vm604_vm0, %v756_v0  ;;  %v761_v12 = vpack.c.bf16 %v306_v2, %v306_v2  ;;  %v762_v13 = vpack.c.bf16 %v307_v3, %v307_v3  ;;  %623 = vst.msk [vmem:[%s1475_s3 + $0x48] sm:$0xf] %vm604_vm0, %v757_v6  ;;  %v857_v16 = vunpack.c.l.bf16 %v943_v4  ;;  %v858_v17 = vunpack.c.h.bf16 %v943_v4 }
  0x21   :  { %624 = vst.msk [vmem:[%s1475_s3 + $0x4c] sm:$0xf] %vm604_vm0, %v758_v8  ;;  %625 = vst.msk [vmem:[%s1475_s3 + $0x50] sm:$0xf] %vm604_vm0, %v759_v9  ;;  %v861_v18 = vunpack.c.l.bf16 %v944_v5  ;;  %v862_v19 = vunpack.c.h.bf16 %v944_v5  ;;  %v173_v20 = vmul.f32 %v853_v14, %v988_v1  ;;  %v174_v21 = vmul.f32 %v854_v15, %v988_v1 }
  0x22   :  { %626 = vst.msk [vmem:[%s1475_s3 + $0x54] sm:$0xf] %vm604_vm0, %v760_v10  ;;  %627 = vst.msk [vmem:[%s1475_s3 + $0x58] sm:$0xf] %vm604_vm0, %v761_v12  ;;  %v865_v22 = vunpack.c.l.bf16 %v945_v11  ;;  %v866_v23 = vunpack.c.h.bf16 %v945_v11  ;;  %v175_v24 = vmul.f32 %v857_v16, %v988_v1  ;;  %v176_v25 = vmul.f32 %v858_v17, %v988_v1 }
  0x23   :  { %628 = vst.msk [vmem:[%s1475_s3 + $0x5c] sm:$0xf] %vm604_vm0, %v762_v13  ;;  %v177_v26 = vmul.f32 %v861_v18, %v988_v1  ;;  %v178_v27 = vmul.f32 %v862_v19, %v988_v1  ;;  %v244_v28 = vadd.f32 %v1002_v7, %v173_v20  ;;  %v245_v29 = vadd.f32 %v1002_v7, %v174_v21 }
  0x24   :  { %v179_v30 = vmul.f32 %v865_v22, %v988_v1  ;;  %v180_v31 = vmul.f32 %v866_v23, %v988_v1  ;;  %v246_v32 = vadd.f32 %v1002_v7, %v175_v24  ;;  %v247_v33 = vadd.f32 %v1002_v7, %v176_v25 }
  0x25   :  { %v248_v34 = vadd.f32 %v1002_v7, %v177_v26  ;;  %v249_v35 = vadd.f32 %v1002_v7, %v178_v27  ;;  %v308_v36 = vmax.f32 %v244_v28, 0.0  ;;  %v309_v37 = vmax.f32 %v245_v29, 0.0  ;;  %v950_v26 = vld [vmem:[%s1472_s0 + $0xa0] sm:$0xff]  }
  0x26   :  { %v250_v38 = vadd.f32 %v1002_v7, %v179_v30  ;;  %v251_v39 = vadd.f32 %v1002_v7, %v180_v31  ;;  %v310_v40 = vmax.f32 %v246_v32, 0.0  ;;  %v311_v41 = vmax.f32 %v247_v33, 0.0  ;;  %v951_v31 = vld [vmem:[%s1472_s0 + $0xa8] sm:$0xff]   ;;  %v952_v32 = vld [vmem:[%s1472_s0 + $0xb0] sm:$0xff]  }
  0x27   :  { %v312_v42 = vmax.f32 %v248_v34, 0.0  ;;  %v313_v43 = vmax.f32 %v249_v35, 0.0  ;;  %v763_v45 = vpack.c.bf16 %v308_v36, %v308_v36  ;;  %v764_v46 = vpack.c.bf16 %v309_v37, %v309_v37  ;;  %v953_v37 = vld [vmem:[%s1472_s0 + $0xb8] sm:$0xff]  }
  0x28   :  { %v314_v47 = vmax.f32 %v250_v38, 0.0  ;;  %v315_v48 = vmax.f32 %v251_v39, 0.0  ;;  %v765_v51 = vpack.c.bf16 %v310_v40, %v310_v40  ;;  %v766_v52 = vpack.c.bf16 %v311_v41, %v311_v41 }
  0x29   :  { %v767_v53 = vpack.c.bf16 %v312_v42, %v312_v42  ;;  %v768_v54 = vpack.c.bf16 %v313_v43, %v313_v43  ;;  %629 = vst.msk [vmem:[%s1475_s3 + $0x60] sm:$0xf] %vm604_vm0, %v763_v45  ;;  %630 = vst.msk [vmem:[%s1475_s3 + $0x64] sm:$0xf] %vm604_vm0, %v764_v46  ;;  %v869_v58 = vunpack.c.l.bf16 %v946_v44  ;;  %v870_v59 = vunpack.c.h.bf16 %v946_v44 }
  0x2a   :  { %v769_v56 = vpack.c.bf16 %v314_v47, %v314_v47  ;;  %v770_v57 = vpack.c.bf16 %v315_v48, %v315_v48  ;;  %631 = vst.msk [vmem:[%s1475_s3 + $0x68] sm:$0xf] %vm604_vm0, %v765_v51  ;;  %632 = vst.msk [vmem:[%s1475_s3 + $0x6c] sm:$0xf] %vm604_vm0, %v766_v52  ;;  %v873_v60 = vunpack.c.l.bf16 %v947_v49  ;;  %v874_v61 = vunpack.c.h.bf16 %v947_v49 }
  0x2b   :  { %633 = vst.msk [vmem:[%s1475_s3 + $0x70] sm:$0xf] %vm604_vm0, %v767_v53  ;;  %634 = vst.msk [vmem:[%s1475_s3 + $0x74] sm:$0xf] %vm604_vm0, %v768_v54  ;;  %v877_v62 = vunpack.c.l.bf16 %v948_v50  ;;  %v878_v63 = vunpack.c.h.bf16 %v948_v50  ;;  %v181_v0 = vmul.f32 %v869_v58, %v988_v1  ;;  %v182_v2 = vmul.f32 %v870_v59, %v988_v1 }
  0x2c   :  { %635 = vst.msk [vmem:[%s1475_s3 + $0x78] sm:$0xf] %vm604_vm0, %v769_v56  ;;  %636 = vst.msk [vmem:[%s1475_s3 + $0x7c] sm:$0xf] %vm604_vm0, %v770_v57  ;;  %v881_v3 = vunpack.c.l.bf16 %v949_v55  ;;  %v882_v4 = vunpack.c.h.bf16 %v949_v55  ;;  %v183_v5 = vmul.f32 %v873_v60, %v988_v1  ;;  %v184_v6 = vmul.f32 %v874_v61, %v988_v1 }
  0x2d   :  { %v185_v8 = vmul.f32 %v877_v62, %v988_v1  ;;  %v186_v9 = vmul.f32 %v878_v63, %v988_v1  ;;  %v252_v10 = vadd.f32 %v1002_v7, %v181_v0  ;;  %v253_v11 = vadd.f32 %v1002_v7, %v182_v2 }
  0x2e   :  { %v187_v12 = vmul.f32 %v881_v3, %v988_v1  ;;  %v188_v13 = vmul.f32 %v882_v4, %v988_v1  ;;  %v254_v14 = vadd.f32 %v1002_v7, %v183_v5  ;;  %v255_v15 = vadd.f32 %v1002_v7, %v184_v6 }
  0x2f   :  { %v256_v16 = vadd.f32 %v1002_v7, %v185_v8  ;;  %v257_v17 = vadd.f32 %v1002_v7, %v186_v9  ;;  %v316_v18 = vmax.f32 %v252_v10, 0.0  ;;  %v317_v19 = vmax.f32 %v253_v11, 0.0  ;;  %v954_v8 = vld [vmem:[%s1472_s0 + $0xc0] sm:$0xff]  }
  0x30   :  { %v258_v20 = vadd.f32 %v1002_v7, %v187_v12  ;;  %v259_v21 = vadd.f32 %v1002_v7, %v188_v13  ;;  %v318_v22 = vmax.f32 %v254_v14, 0.0  ;;  %v319_v23 = vmax.f32 %v255_v15, 0.0  ;;  %v955_v13 = vld [vmem:[%s1472_s0 + $0xc8] sm:$0xff]   ;;  %v956_v14 = vld [vmem:[%s1472_s0 + $0xd0] sm:$0xff]  }
  0x31   :  { %v320_v24 = vmax.f32 %v256_v16, 0.0  ;;  %v321_v25 = vmax.f32 %v257_v17, 0.0  ;;  %v771_v27 = vpack.c.bf16 %v316_v18, %v316_v18  ;;  %v772_v28 = vpack.c.bf16 %v317_v19, %v317_v19  ;;  %v957_v19 = vld [vmem:[%s1472_s0 + $0xd8] sm:$0xff]  }
  0x32   :  { %v322_v29 = vmax.f32 %v258_v20, 0.0  ;;  %v323_v30 = vmax.f32 %v259_v21, 0.0  ;;  %v773_v33 = vpack.c.bf16 %v318_v22, %v318_v22  ;;  %v774_v34 = vpack.c.bf16 %v319_v23, %v319_v23 }
  0x33   :  { %v775_v35 = vpack.c.bf16 %v320_v24, %v320_v24  ;;  %v776_v36 = vpack.c.bf16 %v321_v25, %v321_v25  ;;  %637 = vst.msk [vmem:[%s1475_s3 + $0x80] sm:$0xf] %vm604_vm0, %v771_v27  ;;  %638 = vst.msk [vmem:[%s1475_s3 + $0x84] sm:$0xf] %vm604_vm0, %v772_v28  ;;  %v885_v40 = vunpack.c.l.bf16 %v950_v26  ;;  %v886_v41 = vunpack.c.h.bf16 %v950_v26 }
  0x34   :  { %v777_v38 = vpack.c.bf16 %v322_v29, %v322_v29  ;;  %v778_v39 = vpack.c.bf16 %v323_v30, %v323_v30  ;;  %639 = vst.msk [vmem:[%s1475_s3 + $0x88] sm:$0xf] %vm604_vm0, %v773_v33  ;;  %640 = vst.msk [vmem:[%s1475_s3 + $0x8c] sm:$0xf] %vm604_vm0, %v774_v34  ;;  %v889_v42 = vunpack.c.l.bf16 %v951_v31  ;;  %v890_v43 = vunpack.c.h.bf16 %v951_v31 }
  0x35   :  { %641 = vst.msk [vmem:[%s1475_s3 + $0x90] sm:$0xf] %vm604_vm0, %v775_v35  ;;  %642 = vst.msk [vmem:[%s1475_s3 + $0x94] sm:$0xf] %vm604_vm0, %v776_v36  ;;  %v893_v44 = vunpack.c.l.bf16 %v952_v32  ;;  %v894_v45 = vunpack.c.h.bf16 %v952_v32  ;;  %v189_v46 = vmul.f32 %v885_v40, %v988_v1  ;;  %v190_v47 = vmul.f32 %v886_v41, %v988_v1 }
  0x36   :  { %643 = vst.msk [vmem:[%s1475_s3 + $0x98] sm:$0xf] %vm604_vm0, %v777_v38  ;;  %644 = vst.msk [vmem:[%s1475_s3 + $0x9c] sm:$0xf] %vm604_vm0, %v778_v39  ;;  %v897_v48 = vunpack.c.l.bf16 %v953_v37  ;;  %v898_v49 = vunpack.c.h.bf16 %v953_v37  ;;  %v191_v50 = vmul.f32 %v889_v42, %v988_v1  ;;  %v192_v51 = vmul.f32 %v890_v43, %v988_v1 }
  0x37   :  { %v193_v52 = vmul.f32 %v893_v44, %v988_v1  ;;  %v194_v53 = vmul.f32 %v894_v45, %v988_v1  ;;  %v260_v54 = vadd.f32 %v1002_v7, %v189_v46  ;;  %v261_v55 = vadd.f32 %v1002_v7, %v190_v47 }
  0x38   :  { %v195_v56 = vmul.f32 %v897_v48, %v988_v1  ;;  %v196_v57 = vmul.f32 %v898_v49, %v988_v1  ;;  %v262_v58 = vadd.f32 %v1002_v7, %v191_v50  ;;  %v263_v59 = vadd.f32 %v1002_v7, %v192_v51 }
  0x39   :  { %v264_v60 = vadd.f32 %v1002_v7, %v193_v52  ;;  %v265_v61 = vadd.f32 %v1002_v7, %v194_v53  ;;  %v324_v62 = vmax.f32 %v260_v54, 0.0  ;;  %v325_v63 = vmax.f32 %v261_v55, 0.0  ;;  %v958_v52 = vld [vmem:[%s1472_s0 + $0xe0] sm:$0xff]  }
  0x3a   :  { %v266_v0 = vadd.f32 %v1002_v7, %v195_v56  ;;  %v267_v2 = vadd.f32 %v1002_v7, %v196_v57  ;;  %v326_v3 = vmax.f32 %v262_v58, 0.0  ;;  %v327_v4 = vmax.f32 %v263_v59, 0.0  ;;  %v959_v57 = vld [vmem:[%s1472_s0 + $0xe8] sm:$0xff]   ;;  %v960_v58 = vld [vmem:[%s1472_s0 + $0xf0] sm:$0xff]  }
  0x3b   :  { %v328_v5 = vmax.f32 %v264_v60, 0.0  ;;  %v329_v6 = vmax.f32 %v265_v61, 0.0  ;;  %v779_v9 = vpack.c.bf16 %v324_v62, %v324_v62  ;;  %v780_v10 = vpack.c.bf16 %v325_v63, %v325_v63  ;;  %v961_v63 = vld [vmem:[%s1472_s0 + $0xf8] sm:$0xff]  }
  0x3c   :  { %v330_v11 = vmax.f32 %v266_v0, 0.0  ;;  %v331_v12 = vmax.f32 %v267_v2, 0.0  ;;  %v781_v15 = vpack.c.bf16 %v326_v3, %v326_v3  ;;  %v782_v16 = vpack.c.bf16 %v327_v4, %v327_v4 }
  0x3d   :  { %v783_v17 = vpack.c.bf16 %v328_v5, %v328_v5  ;;  %v784_v18 = vpack.c.bf16 %v329_v6, %v329_v6  ;;  %645 = vst.msk [vmem:[%s1475_s3 + $0xa0] sm:$0xf] %vm604_vm0, %v779_v9  ;;  %646 = vst.msk [vmem:[%s1475_s3 + $0xa4] sm:$0xf] %vm604_vm0, %v780_v10  ;;  %v901_v22 = vunpack.c.l.bf16 %v954_v8  ;;  %v902_v23 = vunpack.c.h.bf16 %v954_v8 }
  0x3e   :  { %v785_v20 = vpack.c.bf16 %v330_v11, %v330_v11  ;;  %v786_v21 = vpack.c.bf16 %v331_v12, %v331_v12  ;;  %647 = vst.msk [vmem:[%s1475_s3 + $0xa8] sm:$0xf] %vm604_vm0, %v781_v15  ;;  %648 = vst.msk [vmem:[%s1475_s3 + $0xac] sm:$0xf] %vm604_vm0, %v782_v16  ;;  %v905_v24 = vunpack.c.l.bf16 %v955_v13  ;;  %v906_v25 = vunpack.c.h.bf16 %v955_v13 }
  0x3f   :  { %649 = vst.msk [vmem:[%s1475_s3 + $0xb0] sm:$0xf] %vm604_vm0, %v783_v17  ;;  %650 = vst.msk [vmem:[%s1475_s3 + $0xb4] sm:$0xf] %vm604_vm0, %v784_v18  ;;  %v909_v26 = vunpack.c.l.bf16 %v956_v14  ;;  %v910_v27 = vunpack.c.h.bf16 %v956_v14  ;;  %v197_v28 = vmul.f32 %v901_v22, %v988_v1  ;;  %v198_v29 = vmul.f32 %v902_v23, %v988_v1 }
  0x40   :  { %651 = vst.msk [vmem:[%s1475_s3 + $0xb8] sm:$0xf] %vm604_vm0, %v785_v20  ;;  %652 = vst.msk [vmem:[%s1475_s3 + $0xbc] sm:$0xf] %vm604_vm0, %v786_v21  ;;  %v913_v30 = vunpack.c.l.bf16 %v957_v19  ;;  %v914_v31 = vunpack.c.h.bf16 %v957_v19  ;;  %v199_v32 = vmul.f32 %v905_v24, %v988_v1  ;;  %v200_v33 = vmul.f32 %v906_v25, %v988_v1 }
  0x41   :  { %v201_v34 = vmul.f32 %v909_v26, %v988_v1  ;;  %v202_v35 = vmul.f32 %v910_v27, %v988_v1  ;;  %v268_v36 = vadd.f32 %v1002_v7, %v197_v28  ;;  %v269_v37 = vadd.f32 %v1002_v7, %v198_v29 }
  0x42   :  { %v203_v38 = vmul.f32 %v913_v30, %v988_v1  ;;  %v204_v39 = vmul.f32 %v914_v31, %v988_v1  ;;  %v270_v40 = vadd.f32 %v1002_v7, %v199_v32  ;;  %v271_v41 = vadd.f32 %v1002_v7, %v200_v33 }
  0x43   :  { %v272_v42 = vadd.f32 %v1002_v7, %v201_v34  ;;  %v273_v43 = vadd.f32 %v1002_v7, %v202_v35  ;;  %v332_v44 = vmax.f32 %v268_v36, 0.0  ;;  %v333_v45 = vmax.f32 %v269_v37, 0.0 }
  0x44   :  { %v274_v46 = vadd.f32 %v1002_v7, %v203_v38  ;;  %v275_v47 = vadd.f32 %v1002_v7, %v204_v39  ;;  %v334_v48 = vmax.f32 %v270_v40, 0.0  ;;  %v335_v49 = vmax.f32 %v271_v41, 0.0 }
  0x45   :  { %v336_v50 = vmax.f32 %v272_v42, 0.0  ;;  %v337_v51 = vmax.f32 %v273_v43, 0.0  ;;  %v787_v53 = vpack.c.bf16 %v332_v44, %v332_v44  ;;  %v788_v54 = vpack.c.bf16 %v333_v45, %v333_v45 }
  0x46   :  { %v338_v55 = vmax.f32 %v274_v46, 0.0  ;;  %v339_v56 = vmax.f32 %v275_v47, 0.0  ;;  %v789_v59 = vpack.c.bf16 %v334_v48, %v334_v48  ;;  %v790_v60 = vpack.c.bf16 %v335_v49, %v335_v49 }
  0x47   :  { %v791_v61 = vpack.c.bf16 %v336_v50, %v336_v50  ;;  %v792_v62 = vpack.c.bf16 %v337_v51, %v337_v51  ;;  %653 = vst.msk [vmem:[%s1475_s3 + $0xc0] sm:$0xf] %vm604_vm0, %v787_v53  ;;  %654 = vst.msk [vmem:[%s1475_s3 + $0xc4] sm:$0xf] %vm604_vm0, %v788_v54  ;;  %v917_v3 = vunpack.c.l.bf16 %v958_v52  ;;  %v918_v4 = vunpack.c.h.bf16 %v958_v52 }
  0x48   :  { %v793_v0 = vpack.c.bf16 %v338_v55, %v338_v55  ;;  %v794_v2 = vpack.c.bf16 %v339_v56, %v339_v56  ;;  %655 = vst.msk [vmem:[%s1475_s3 + $0xc8] sm:$0xf] %vm604_vm0, %v789_v59  ;;  %656 = vst.msk [vmem:[%s1475_s3 + $0xcc] sm:$0xf] %vm604_vm0, %v790_v60  ;;  %v921_v5 = vunpack.c.l.bf16 %v959_v57  ;;  %v922_v6 = vunpack.c.h.bf16 %v959_v57 }
  0x49   :  { %657 = vst.msk [vmem:[%s1475_s3 + $0xd0] sm:$0xf] %vm604_vm0, %v791_v61  ;;  %658 = vst.msk [vmem:[%s1475_s3 + $0xd4] sm:$0xf] %vm604_vm0, %v792_v62  ;;  %v925_v8 = vunpack.c.l.bf16 %v960_v58  ;;  %v926_v9 = vunpack.c.h.bf16 %v960_v58  ;;  %v205_v10 = vmul.f32 %v917_v3, %v988_v1  ;;  %v206_v11 = vmul.f32 %v918_v4, %v988_v1 }
  0x4a   :  { %659 = vst.msk [vmem:[%s1475_s3 + $0xd8] sm:$0xf] %vm604_vm0, %v793_v0  ;;  %660 = vst.msk [vmem:[%s1475_s3 + $0xdc] sm:$0xf] %vm604_vm0, %v794_v2  ;;  %v929_v12 = vunpack.c.l.bf16 %v961_v63  ;;  %v930_v13 = vunpack.c.h.bf16 %v961_v63  ;;  %v207_v14 = vmul.f32 %v921_v5, %v988_v1  ;;  %v208_v15 = vmul.f32 %v922_v6, %v988_v1 }
  0x4b   :  { %v209_v16 = vmul.f32 %v925_v8, %v988_v1  ;;  %v210_v17 = vmul.f32 %v926_v9, %v988_v1  ;;  %v276_v18 = vadd.f32 %v1002_v7, %v205_v10  ;;  %v277_v19 = vadd.f32 %v1002_v7, %v206_v11 }
  0x4c   :  { %v211_v20 = vmul.f32 %v929_v12, %v988_v1  ;;  %v212_v21 = vmul.f32 %v930_v13, %v988_v1  ;;  %v278_v22 = vadd.f32 %v1002_v7, %v207_v14  ;;  %v279_v23 = vadd.f32 %v1002_v7, %v208_v15 }
  0x4d   :  { %v280_v24 = vadd.f32 %v1002_v7, %v209_v16  ;;  %v281_v25 = vadd.f32 %v1002_v7, %v210_v17  ;;  %v340_v26 = vmax.f32 %v276_v18, 0.0  ;;  %v341_v27 = vmax.f32 %v277_v19, 0.0 }
  0x4e   :  { %v282_v28 = vadd.f32 %v1002_v7, %v211_v20  ;;  %v283_v29 = vadd.f32 %v1002_v7, %v212_v21  ;;  %v342_v30 = vmax.f32 %v278_v22, 0.0  ;;  %v343_v31 = vmax.f32 %v279_v23, 0.0 }
  0x4f   :  { %v344_v32 = vmax.f32 %v280_v24, 0.0  ;;  %v345_v33 = vmax.f32 %v281_v25, 0.0  ;;  %v795_v34 = vpack.c.bf16 %v340_v26, %v340_v26  ;;  %v796_v1 = vpack.c.bf16 %v341_v27, %v341_v27 }
  0x50   :  { %v346_v35 = vmax.f32 %v282_v28, 0.0  ;;  %v347_v36 = vmax.f32 %v283_v29, 0.0  ;;  %v797_v37 = vpack.c.bf16 %v342_v30, %v342_v30  ;;  %v798_v38 = vpack.c.bf16 %v343_v31, %v343_v31 }
  0x51   :  { %v799_v39 = vpack.c.bf16 %v344_v32, %v344_v32  ;;  %v800_v40 = vpack.c.bf16 %v345_v33, %v345_v33  ;;  %661 = vst.msk [vmem:[%s1475_s3 + $0xe0] sm:$0xf] %vm604_vm0, %v795_v34  ;;  %662 = vst.msk [vmem:[%s1475_s3 + $0xe4] sm:$0xf] %vm604_vm0, %v796_v1 }
  0x52   :  { %v801_v7 = vpack.c.bf16 %v346_v35, %v346_v35  ;;  %v802_v41 = vpack.c.bf16 %v347_v36, %v347_v36  ;;  %663 = vst.msk [vmem:[%s1475_s3 + $0xe8] sm:$0xf] %vm604_vm0, %v797_v37  ;;  %664 = vst.msk [vmem:[%s1475_s3 + $0xec] sm:$0xf] %vm604_vm0, %v798_v38 }
  0x53   :  { %665 = vst.msk [vmem:[%s1475_s3 + $0xf0] sm:$0xf] %vm604_vm0, %v799_v39  ;;  %666 = vst.msk [vmem:[%s1475_s3 + $0xf4] sm:$0xf] %vm604_vm0, %v800_v40 }
  0x54   :  { %667 = vst.msk [vmem:[%s1475_s3 + $0xf8] sm:$0xf] %vm604_vm0, %v801_v7  ;;  %668 = vst.msk [vmem:[%s1475_s3 + $0xfc] sm:$0xf] %vm604_vm0, %v802_v41 }

// kernel: densenet_forward.19
= control target key start
LH: loop header
LB: loop body
LE: loop exit
PB: predicated region body
PF: predicated region fallthrough
CT: control target
= control target key end

     0   :  { %s764_s15 = smov 0   ;;  %s766_s16 = smov 0   ;;  %s841_s0 = inlined_call_operand.vmem [shape: bf16[128,16], index: 0, kind: input, shape index: {}]   ;;  %s842_s1 = inlined_call_operand.vmem [shape: f32[1,16], index: 1, kind: input, shape index: {}]   ;;  %s843_s2 = inlined_call_operand.vmem [shape: f32[1,16], index: 2, kind: input, shape index: {}]   ;;  %s844_s3 = inlined_call_operand.vmem [shape: bf16[16,16], index: 3, kind: input, shape index: {}]   ;;  %s845_s4 = inlined_call_operand.vmem [shape: bf16[128,16], index: 4, kind: output, shape index: {}]  }
   0x1   :  { %s768_s17 = smov 0  }
   0x2 LB: > { %s26_s18 = sadd.s32 1, %s732_s16  ;;  %p622_p0 = scmp.ge.s32.totalorder %s736_s17, 1  ;;  %s736_s17 = sphi %s768_s17, %s14_s17   ;;  %s732_s16 = sphi %s766_s16, %s847_s16   ;;  %s728_s15 = sphi %s764_s15, %s846_s15  }
   0x3   : > { %p28_p1 = scmp.ge.s32.totalorder %s26_s18, 2  ;;  %p207_p2 = scmp.lt.s32.totalorder %s736_s17, 3 }
   0x5   : > { %s849_s18 = smov (%p28_p1, %s26_s18), 0  ;;  %p208_p3 = pnand %p622_p0, %p207_p2 }
   0x6   : > { %s623_s21 = sshll.u32 (!%p208_p3), %s728_s15, 3 }
   0x7   : > { %211 = sbr.rel (%p208_p3) target bundleno = 240 (0xf0), region = 36  ;;  %p248_p4 = scmp.lt.s32.totalorder (!%p208_p3), %s623_s21, 15 }
   0xc   : > { %v713_v0 = vld [vmem:[%s844_s3] sm:$0xff]   ;;  %vm279_vm0 = vcmask 130048   ;;  %s851_s21 = smov (!%p248_p4, %s623_s21), 15  ;;  %v738_v1 = vmov 0.0   ;;  %vm499_vm1 = vcmask 125952  }
   0xd   : > { %676 = vmatprep.subr.bf16.mxu0 %v713_v0  ;;  %686 = vmatprep.subr.bf16.mxu1 %v713_v0  ;;  %282 = vst.msk [vmem:[#allocation2 + $0x10] sm:$0xff] %vm279_vm0, %v738_v1  ;;  %280 = vst.msk [vmem:[#allocation2] sm:$0xff] %vm279_vm0, %v738_v1  ;;  %s624_s22 = sshll.u32 %s851_s21, 2  ;;  %v627_v2 = vld [vmem:[%s842_s1] ss:$0 sm:$0xff] }
   0xe   : > { %677 = vmatpush3.bf16.msra.mxu0 %v713_v0  ;;  %687 = vmatpush3.bf16.msra.mxu1 %v713_v0  ;;  %281 = vst.msk [vmem:[#allocation2 + $0x8] sm:$0xff] %vm279_vm0, %v738_v1  ;;  %283 = vst.msk [vmem:[#allocation2 + $0x18] sm:$0xff] %vm279_vm0, %v738_v1  ;;  %s254_s25 = scalar_lea.vmem %s841_s0, %s624_s22  ;;  %v628_v11 = vld [vmem:[%s843_s2] ss:$0 sm:$0xff]  ;;  %s272_s6 = scalar_lea.vmem %s845_s4, %s624_s22 }
   0xf   : > { %284 = vst.msk [vmem:[#allocation2 + $0x20] sm:$0xff] %vm279_vm0, %v738_v1  ;;  %285 = vst.msk [vmem:[#allocation2 + $0x28] sm:$0xff] %vm279_vm0, %v738_v1  ;;  %v653_v3 = vld [vmem:[%s254_s25] sm:$0xff]   ;;  %v669_v4 = vld [vmem:[%s254_s25 + $0x10] sm:$0xff]  }
  0x10   : > { %286 = vst.msk [vmem:[#allocation2 + $0x30] sm:$0xff] %vm279_vm0, %v738_v1  ;;  %287 = vst.msk [vmem:[#allocation2 + $0x38] sm:$0xff] %vm279_vm0, %v738_v1  ;;  %v668_v5 = vld [vmem:[%s254_s25 + $0x8] sm:$0xff]   ;;  %v654_v6 = vunpack.c.l.bf16 %v653_v3  ;;  %v655_v7 = vunpack.c.h.bf16 %v653_v3  ;;  %v662_v8 = vunpack.c.l.bf16 %v669_v4  ;;  %v663_v9 = vunpack.c.h.bf16 %v669_v4  ;;  %v670_v10 = vld [vmem:[%s254_s25 + $0x18] sm:$0xff]  }
  0x11   : > { %v658_v12 = vunpack.c.l.bf16 %v668_v5  ;;  %v659_v13 = vunpack.c.h.bf16 %v668_v5  ;;  %v666_v14 = vunpack.c.l.bf16 %v670_v10  ;;  %v667_v15 = vunpack.c.h.bf16 %v670_v10 }
  0x12   : > { %v311_v16 = vmul.f32 %v654_v6, %v627_v2  ;;  %v312_v17 = vmul.f32 %v655_v7, %v627_v2  ;;  %v315_v18 = vmul.f32 %v662_v8, %v627_v2  ;;  %v316_v19 = vmul.f32 %v663_v9, %v627_v2 }
  0x13   : > { %v313_v20 = vmul.f32 %v658_v12, %v627_v2  ;;  %v314_v21 = vmul.f32 %v659_v13, %v627_v2  ;;  %v317_v22 = vmul.f32 %v666_v14, %v627_v2  ;;  %v318_v23 = vmul.f32 %v667_v15, %v627_v2 }
  0x14   : > { %v326_v24 = vadd.f32 %v628_v11, %v311_v16  ;;  %v327_v25 = vadd.f32 %v628_v11, %v312_v17  ;;  %v330_v26 = vadd.f32 %v628_v11, %v315_v18  ;;  %v331_v27 = vadd.f32 %v628_v11, %v316_v19  ;;  %v344_v44 = vld [vmem:[#allocation2 + $0x10] sm:$0xff]  ;;  %v342_v48 = vld [vmem:[#allocation2] sm:$0xff] }
  0x15   : > { %v328_v28 = vadd.f32 %v628_v11, %v313_v20  ;;  %v329_v29 = vadd.f32 %v628_v11, %v314_v21  ;;  %v332_v30 = vadd.f32 %v628_v11, %v317_v22  ;;  %v333_v31 = vadd.f32 %v628_v11, %v318_v23  ;;  %v345_v54 = vld [vmem:[#allocation2 + $0x18] sm:$0xff]  ;;  %v343_v60 = vld [vmem:[#allocation2 + $0x8] sm:$0xff] }
  0x16   : > { %v334_v32 = vmax.f32 %v326_v24, 0.0  ;;  %v335_v33 = vmax.f32 %v327_v25, 0.0  ;;  %v338_v34 = vmax.f32 %v330_v26, 0.0  ;;  %v339_v35 = vmax.f32 %v331_v27, 0.0  ;;  %v346_v49 = vld [vmem:[#allocation2 + $0x20] sm:$0xff]  ;;  %v347_v61 = vld [vmem:[#allocation2 + $0x28] sm:$0xff] }
  0x17   : > { %v336_v36 = vmax.f32 %v328_v28, 0.0  ;;  %v337_v37 = vmax.f32 %v329_v29, 0.0  ;;  %v340_v38 = vmax.f32 %v332_v30, 0.0  ;;  %v341_v39 = vmax.f32 %v333_v31, 0.0  ;;  %v348_v45 = vld [vmem:[#allocation2 + $0x30] sm:$0xff]  ;;  %v349_v55 = vld [vmem:[#allocation2 + $0x38] sm:$0xff] }
  0x18   : > { %v350_v40 = vpack.c.bf16 %v335_v33, %v334_v32  ;;  %v352_v41 = vpack.c.bf16 %v339_v35, %v338_v34 }
  0x19   : > { %v351_v42 = vpack.c.bf16 %v337_v37, %v336_v36  ;;  %v353_v43 = vpack.c.bf16 %v341_v39, %v340_v38 }
  0x1a   : > { %678 = vmatprep.mubr.msk.bf16.mxu0 %vm279_vm0, %v350_v40  ;;  %682 = vmatprep.mubr.msk.bf16.mxu1 %vm279_vm0, %v352_v41 }
  0x1b   : > { %679 = vmatmul.mubr.msk.bf16.vlgmr.msra.gmra.mxu0 %vm279_vm0, %v351_v42  ;;  %683 = vmatmul.mubr.msk.bf16.vlgmr.msra.gmra.mxu1 %vm279_vm0, %v353_v43 }
  0xdb   : > { %v680_v46 = vpop.f32.mrf.mxu0  ;;  %v684_v47 = vpop.f32.mrf.mxu1 }
  0xdc   : > { %v442_v50 = vadd.f32 %v680_v46, %v344_v44  ;;  %v446_v51 = vadd.f32 %v684_v47, %v348_v45 }
  0xdd   : > { %v409_v52 = vpop.f32.mrf.mxu0  ;;  %v425_v53 = vpop.f32.mrf.mxu1 }
  0xde   : > { %450 = vst.msk [vmem:[#allocation2 + $0x10] sm:$0xff] %vm279_vm0, %v442_v50  ;;  %454 = vst.msk [vmem:[#allocation2 + $0x30] sm:$0xff] %vm279_vm0, %v446_v51  ;;  %v440_v56 = vadd.f32 %v409_v52, %v342_v48  ;;  %v444_v57 = vadd.f32 %v425_v53, %v346_v49 }
  0xdf   : > { %v681_v58 = vpop.f32.mrf.mxu0  ;;  %v685_v59 = vpop.f32.mrf.mxu1 }
  0xe0   : > { %448 = vst.msk [vmem:[#allocation2] sm:$0xff] %vm279_vm0, %v440_v56  ;;  %452 = vst.msk [vmem:[#allocation2 + $0x20] sm:$0xff] %vm279_vm0, %v444_v57  ;;  %v443_v62 = vadd.f32 %v681_v58, %v345_v54  ;;  %v447_v63 = vadd.f32 %v685_v59, %v349_v55 }
  0xe1   : > { %v412_v0 = vpop.f32.mrf.mxu0  ;;  %v428_v1 = vpop.f32.mrf.mxu1 }
  0xe2   : > { %451 = vst.msk [vmem:[#allocation2 + $0x18] sm:$0xff] %vm279_vm0, %v443_v62  ;;  %455 = vst.msk [vmem:[#allocation2 + $0x38] sm:$0xff] %vm279_vm0, %v447_v63  ;;  %v441_v2 = vadd.f32 %v412_v0, %v343_v60  ;;  %v445_v3 = vadd.f32 %v428_v1, %v347_v61 }
  0xe4   : > { %449 = vst.msk [vmem:[#allocation2 + $0x8] sm:$0xff] %vm279_vm0, %v441_v2  ;;  %453 = vst.msk [vmem:[#allocation2 + $0x28] sm:$0xff] %vm279_vm0, %v445_v3 }
  0xe5   : > { %v461_v4 = vld [vmem:[#allocation2 + $0x10] sm:$0xff] }
  0xe6   : > { %v465_v5 = vld [vmem:[#allocation2 + $0x30] sm:$0xff]  ;;  %v646_v6 = vpack.c.bf16 %v461_v4, %v461_v4 }
  0xe7   : > { %v650_v7 = vpack.c.bf16 %v465_v5, %v465_v5  ;;  %v459_v8 = vld [vmem:[#allocation2] sm:$0xff] }
  0xe8   : > { %v463_v9 = vld [vmem:[#allocation2 + $0x20] sm:$0xff]  ;;  %502 = vst.msk [vmem:[%s272_s6 + $0x8] sm:$0xf] %vm499_vm1, %v646_v6  ;;  %v644_v10 = vpack.c.bf16 %v459_v8, %v459_v8 }
  0xe9   : > { %506 = vst.msk [vmem:[%s272_s6 + $0x18] sm:$0xf] %vm499_vm1, %v650_v7  ;;  %v648_v11 = vpack.c.bf16 %v463_v9, %v463_v9  ;;  %v462_v12 = vld [vmem:[#allocation2 + $0x18] sm:$0xff] }
  0xea   : > { %v466_v13 = vld [vmem:[#allocation2 + $0x38] sm:$0xff]  ;;  %500 = vst.msk [vmem:[%s272_s6] sm:$0xf] %vm499_vm1, %v644_v10  ;;  %v647_v14 = vpack.c.bf16 %v462_v12, %v462_v12 }
  0xeb   : > { %504 = vst.msk [vmem:[%s272_s6 + $0x10] sm:$0xf] %vm499_vm1, %v648_v11  ;;  %v651_v15 = vpack.c.bf16 %v466_v13, %v466_v13  ;;  %v460_v16 = vld [vmem:[#allocation2 + $0x8] sm:$0xff] }
  0xec   : > { %v464_v17 = vld [vmem:[#allocation2 + $0x28] sm:$0xff]  ;;  %503 = vst.msk [vmem:[%s272_s6 + $0xc] sm:$0xf] %vm499_vm1, %v647_v14  ;;  %v645_v18 = vpack.c.bf16 %v460_v16, %v460_v16 }
  0xed   : > { %507 = vst.msk [vmem:[%s272_s6 + $0x1c] sm:$0xf] %vm499_vm1, %v651_v15  ;;  %v649_v19 = vpack.c.bf16 %v464_v17, %v464_v17 }
  0xee   : > { %501 = vst.msk [vmem:[%s272_s6 + $0x4] sm:$0xf] %vm499_vm1, %v645_v18 }
  0xef   : > { %505 = vst.msk [vmem:[%s272_s6 + $0x14] sm:$0xf] %vm499_vm1, %v649_v19 }
  0xf0 PF: > { %s14_s17 = sadd.s32 1, %s736_s17   ;;  %s846_s15 = smov %s732_s16 }
  0xf1   : > { %p11_p5 = scmp.ge.s32.totalorder %s14_s17, 4   ;;  %s847_s16 = smov %s849_s18 }
  0xf3   :  { %13 = sbr.rel (!%p11_p5) target bundleno = 2 (0x2), region = 83 }

// kernel: tile.63
= control target key start
LH: loop header
LB: loop body
LE: loop exit
PB: predicated region body
PF: predicated region fallthrough
CT: control target
= control target key end

     0   :  { %s28_s0 = inlined_call_operand.vmem [shape: f32[16], index: 0, kind: input, shape index: {}]   ;;  %s29_s1 = inlined_call_operand.vmem [shape: f32[9,16], index: 1, kind: output, shape index: {}]  }
   0x1   :  { %v4_v0 = vld [vmem:[%s28_s0] ss:$0 sm:$0xff] }
   0x2   :  { %5 = vst [vmem:[%s29_s1] sm:$0xff] %v4_v0  ;;  %8 = vst [vmem:[%s29_s1 + $0x8] sm:$0xff] %v4_v0 }

// kernel: tile.68
= control target key start
LH: loop header
LB: loop body
LE: loop exit
PB: predicated region body
PF: predicated region fallthrough
CT: control target
= control target key end

     0   :  { %s77_s10 = smov 112   ;;  %s78_s11 = smov 80   ;;  %vm4_vm0 = vcmask 130048   ;;  %vm10_vm1 = vcmask 1048448   ;;  %vm16_vm2 = vcmask 917248   ;;  %vm22_vm3 = vcmask 786048   ;;  %s124_s0 = inlined_call_operand.vmem [shape: f32[9,16], index: 0, kind: input, shape index: {}]   ;;  %s125_s1 = inlined_call_operand.vmem [shape: f32[1,144], index: 1, kind: output, shape index: {}]  }
   0x1   :  { %v62_v0 = vld [vmem:[%s124_s0 + $0x7] sm:$0x1]   ;;  %v64_v1 = vld [vmem:[%s124_s0 + $0x5] sm:$0x1]   ;;  %v63_v2 = vld [vmem:[%s124_s0 + $0x6] sm:$0x1]  }
   0x2   :  { %8 = vrot.lane.b32.xlu0 %v62_v0, %s77_s10  ;;  %20 = vrot.lane.b32.xlu1 %v64_v1, %s78_s11  ;;  %v65_v3 = vld [vmem:[%s124_s0 + $0x4] sm:$0x1]   ;;  %s2_s16 = smov 3  ;;  %s79_s19 = smov 96   ;;  %v66_v5 = vld [vmem:[%s124_s0 + $0x3] sm:$0x1]  }
   0x3   :  { %v3_v4 = vld [vmem:[%s124_s0] ss:$8 sm:%s2_s16]   ;;  %s80_s20 = smov 64   ;;  %v67_v6 = vld [vmem:[%s124_s0 + $0x2] sm:$0x1]   ;;  %s81_s25 = smov 48  }
   0x4   :  { %5 = vst.msk [vmem:[#allocation0] ss:$8 sm:$0x3] %vm4_vm0, %v3_v4   ;;  %s82_s26 = smov 32   ;;  %v68_v7 = vld [vmem:[%s124_s0 + $0x1] sm:$0x1]  }
   0x5   :  { %s83_s0 = smov 16   ;;  %vm28_vm4 = vcmask 654848   ;;  %vm34_vm5 = vcmask 523648   ;;  %vm40_vm6 = vcmask 392448   ;;  %vm46_vm7 = vcmask 261248  }
   0x6   :  { %14 = vrot.lane.b32.xlu0 %v63_v2, %s79_s19  ;;  %26 = vrot.lane.b32.xlu1 %v65_v3, %s80_s20 }
   0xa   :  { %32 = vrot.lane.b32.xlu0 %v66_v5, %s81_s25  ;;  %38 = vrot.lane.b32.xlu1 %v67_v6, %s82_s26 }
   0xb   :  { %v57_v8 = vld [vmem:[#allocation0 + $0x8] sm:$0x1] }
   0xc   :  { %69 = vst [vmem:[%s125_s1 + $0x1] sm:$0x1] %v57_v8 }
   0xe   :  { %44 = vrot.lane.b32.xlu0 %v68_v7, %s83_s0 }
  0x74   :  { %v9_v9 = vpop.permute.xlu0 %8   ;;  %v21_v10 = vpop.permute.xlu1 %20  }
  0x75   :  { %11 = vst.msk [vmem:[#allocation0] sm:$0x1] %vm10_vm1, %v9_v9  }
  0x78   :  { %v15_v11 = vpop.permute.xlu0 %14   ;;  %v27_v12 = vpop.permute.xlu1 %26  }
  0x79   :  { %17 = vst.msk [vmem:[#allocation0] sm:$0x1] %vm16_vm2, %v15_v11  }
  0x7a   :  { %23 = vst.msk [vmem:[#allocation0] sm:$0x1] %vm22_vm3, %v21_v10  }
  0x7b   :  { %29 = vst.msk [vmem:[#allocation0] sm:$0x1] %vm28_vm4, %v27_v12  }
  0x7c   :  { %v33_v13 = vpop.permute.xlu0 %32   ;;  %v39_v14 = vpop.permute.xlu1 %38  }
  0x7d   :  { %35 = vst.msk [vmem:[#allocation0] sm:$0x1] %vm34_vm5, %v33_v13  }
  0x7e   :  { %41 = vst.msk [vmem:[#allocation0] sm:$0x1] %vm40_vm6, %v39_v14  }
  0x80   :  { %v45_v15 = vpop.permute.xlu0 %44  }
  0x81   :  { %47 = vst.msk [vmem:[#allocation0] sm:$0x1] %vm46_vm7, %v45_v15  }
  0x88   :  { %v52_v16 = vld [vmem:[#allocation0] sm:$0x1] }
  0x89   :  { %55 = vst [vmem:[%s125_s1] sm:$0x1] %v52_v16 }

// kernel: densenet_forward.20
= control target key start
LH: loop header
LB: loop body
LE: loop exit
PB: predicated region body
PF: predicated region fallthrough
CT: control target
= control target key end

     0   :  { %s896_s15 = smov 0   ;;  %s898_s16 = smov 0   ;;  %s1074_s0 = inlined_call_operand.vmem [shape: bf16[128,144], index: 0, kind: input, shape index: {}]   ;;  %s1075_s1 = inlined_call_operand.vmem [shape: f32[1,144], index: 1, kind: input, shape index: {}]   ;;  %s1076_s2 = inlined_call_operand.vmem [shape: f32[1,144], index: 2, kind: input, shape index: {}]   ;;  %s1077_s3 = inlined_call_operand.vmem [shape: bf16[144,4], index: 3, kind: input, shape index: {}]   ;;  %s1078_s4 = inlined_call_operand.vmem [shape: bf16[128,4], index: 4, kind: output, shape index: {}]  }
   0x1   :  { %s900_s17 = smov 0  }
   0x2 LB: > { %s26_s18 = sadd.s32 1, %s863_s16  ;;  %p754_p0 = scmp.ge.s32.totalorder %s867_s17, 1  ;;  %s867_s17 = sphi %s900_s17, %s14_s17   ;;  %s863_s16 = sphi %s898_s16, %s1080_s16   ;;  %s859_s15 = sphi %s896_s15, %s1079_s15  }
   0x3   : > { %p28_p1 = scmp.ge.s32.totalorder %s26_s18, 2  ;;  %p214_p2 = scmp.lt.s32.totalorder %s867_s17, 3 }
   0x5   : > { %s1082_s18 = smov (%p28_p1, %s26_s18), 0  ;;  %p215_p3 = pnand %p754_p0, %p214_p2 }
   0x6   : > { %s755_s21 = sshll.u32 (!%p215_p3), %s859_s15, 3 }
   0x7   : > { %218 = sbr.rel (%p215_p3) target bundleno = 268 (0x10c), region = 36  ;;  %p260_p4 = scmp.lt.s32.totalorder (!%p215_p3), %s755_s21, 15 }
   0xc   : > { %v836_v0 = vld [vmem:[%s1077_s3 + $0x38] sm:$0xff]   ;;  %v332_v1 = vlaneseq  ;;  %v869_v2 = vmov 0   ;;  %v837_v3 = vld [vmem:[%s1077_s3 + $0x30] sm:$0xff]   ;;  %s1084_s21 = smov (!%p260_p4, %s755_s21), 15  ;;  %v838_v5 = vld [vmem:[%s1077_s3 + $0x28] sm:$0xff]   ;;  %vm490_vm0 = vcmask 130048  }
   0xd   : > { %503 = vmatprep.subr.bf16.mxu0 %v869_v2  ;;  %792 = vmatprep.subr.bf16.mxu1 %v869_v2  ;;  %s783_s26 = sshll.u32 %s1084_s21, 3  ;;  %v839_v6 = vld [vmem:[%s1077_s3 + $0x20] sm:$0xff]   ;;  %v840_v24 = vld [vmem:[%s1077_s3 + $0x18] sm:$0xff]   ;;  %v841_v42 = vld [vmem:[%s1077_s3 + $0x10] sm:$0xff]   ;;  %vm297_vm1 = vcmask 31744   ;;  %s759_s24 = sshll.u32 %s1084_s21, 2 }
   0xe   : > { %504 = vmatpush1.bf16.msra.mxu0 %v836_v0  ;;  %801 = vmatpush1.bf16.msra.mxu1 %v836_v0  ;;  %v333_v4 = vshrl.u32 %v332_v1, 7  ;;  %s935_s29 = scalar_lea.vmem %s1074_s0, %s783_s26  ;;  %v330_v10 = vld [vmem:[%s1075_s1] sm:$0x3]  ;;  %v842_v56 = vld [vmem:[%s1077_s3 + $0x8] sm:$0xff]   ;;  %s1043_s27 = scalar_lea.vmem %s1078_s4, %s759_s24  ;;  %vm628_vm2 = vcmask 27648  }
   0xf   : > { %505 = vmatprep.subr.bf16.mxu0 %v869_v2  ;;  %793 = vmatprep.subr.bf16.mxu1 %v869_v2  ;;  %v306_v8 = vld [vmem:[%s935_s29] sm:$0xff]  ;;  %v307_v9 = vld [vmem:[%s935_s29 + $0x8] sm:$0xff]  ;;  %v955_v23 = vld [vmem:[%s935_s29 + $0x10] sm:$0xff] }
  0x10   : > { %v338_v7 = vsub.s32 1, %v333_v4  ;;  %v315_v11 = vunpack.c.h.bf16 %v306_v8  ;;  %v317_v12 = vunpack.c.h.bf16 %v307_v9  ;;  %v334_v13 = vsub.s32 0, %v333_v4  ;;  %v358_v14 = vld [vmem:[%s1076_s2] sm:$0x3]  ;;  %v311_v16 = vld [vmem:[%s935_s29 + $0x28] sm:$0xff]  ;;  %v967_v33 = vld [vmem:[%s935_s29 + $0x18] sm:$0xff] }
  0x11   : > { %v310_v15 = vld [vmem:[%s935_s29 + $0x20] sm:$0xff]  ;;  %v325_v20 = vunpack.c.h.bf16 %v311_v16  ;;  %v314_v25 = vunpack.c.l.bf16 %v306_v8  ;;  %v316_v29 = vunpack.c.l.bf16 %v307_v9  ;;  %v324_v34 = vunpack.c.l.bf16 %v311_v16  ;;  %v975_v41 = vld [vmem:[%s935_s29 + $0x30] sm:$0xff]  ;;  %v313_v47 = vld [vmem:[%s935_s29 + $0x38] sm:$0xff] }
  0x12   : > { %506 = vmatpush1.bf16.msra.mxu0 %v837_v3  ;;  %802 = vmatpush1.bf16.msra.mxu1 %v837_v3  ;;  %v339_v17 = vrot.slane %v330_v10, %v338_v7  ;;  %v952_v18 = vrot.slane %v358_v14, %v338_v7  ;;  %v323_v19 = vunpack.c.h.bf16 %v310_v15  ;;  %v960_v26 = vrot.slane %v330_v10, %v334_v13 }
  0x13   : > { %507 = vmatprep.subr.bf16.mxu0 %v869_v2  ;;  %794 = vmatprep.subr.bf16.mxu1 %v869_v2  ;;  %v322_v32 = vunpack.c.l.bf16 %v310_v15  ;;  %v319_v37 = vunpack.c.h.bf16 %v955_v23  ;;  %v972_v38 = vrot.slane %v358_v14, %v334_v13  ;;  %v321_v46 = vunpack.c.h.bf16 %v967_v33 }
  0x14   : > { %v343_v21 = vmul.f32 %v339_v17, %v315_v11  ;;  %v345_v22 = vmul.f32 %v339_v17, %v317_v12  ;;  %v351_v27 = vmul.f32 %v339_v17, %v323_v19  ;;  %v353_v28 = vmul.f32 %v339_v17, %v325_v20  ;;  %v844_v19 = vld [vmem:[%s1077_s3 + $0x40] sm:$0xff]  }
  0x15   : > { %v342_v45 = vmul.f32 %v960_v26, %v314_v25  ;;  %v344_v49 = vmul.f32 %v960_v26, %v316_v29  ;;  %v350_v50 = vmul.f32 %v960_v26, %v322_v32  ;;  %v352_v52 = vmul.f32 %v960_v26, %v324_v34 }
  0x16   : > { %508 = vmatpush1.bf16.msra.mxu0 %v838_v5  ;;  %803 = vmatpush1.bf16.msra.mxu1 %v838_v5  ;;  %v371_v30 = vadd.f32 %v952_v18, %v343_v21  ;;  %v373_v31 = vadd.f32 %v952_v18, %v345_v22  ;;  %v379_v35 = vadd.f32 %v952_v18, %v351_v27  ;;  %v327_v54 = vunpack.c.h.bf16 %v975_v41 }
  0x17   : > { %509 = vmatprep.subr.bf16.mxu0 %v869_v2  ;;  %795 = vmatprep.subr.bf16.mxu1 %v869_v2  ;;  %v381_v36 = vadd.f32 %v952_v18, %v353_v28  ;;  %v347_v53 = vmul.f32 %v339_v17, %v319_v37  ;;  %v329_v55 = vunpack.c.h.bf16 %v313_v47  ;;  %v349_v57 = vmul.f32 %v339_v17, %v321_v46 }
  0x18   : > { %v387_v39 = vmax.f32 %v371_v30, 0.0  ;;  %v389_v40 = vmax.f32 %v373_v31, 0.0  ;;  %v395_v43 = vmax.f32 %v379_v35, 0.0  ;;  %v355_v58 = vmul.f32 %v339_v17, %v327_v54 }
  0x19   : > { %v397_v44 = vmax.f32 %v381_v36, 0.0  ;;  %v370_v59 = vadd.f32 %v972_v38, %v342_v45  ;;  %v372_v60 = vadd.f32 %v972_v38, %v344_v49  ;;  %v357_v61 = vmul.f32 %v339_v17, %v329_v55 }
  0x1a   : > { %510 = vmatpush1.bf16.msra.mxu0 %v839_v6  ;;  %804 = vmatpush1.bf16.msra.mxu1 %v839_v6  ;;  %v411_v48 = vpack.c.bf16 %v389_v40, %v387_v39  ;;  %v378_v62 = vadd.f32 %v972_v38, %v350_v50  ;;  %v380_v63 = vadd.f32 %v972_v38, %v352_v52  ;;  %v318_v1 = vunpack.c.l.bf16 %v955_v23  ;;  %v843_v6 = vld [vmem:[%s1077_s3] sm:$0xff]  }
  0x1b   : > { %511 = vmatprep.subr.bf16.mxu0 %v869_v2  ;;  %796 = vmatprep.subr.bf16.mxu1 %v869_v2  ;;  %v415_v51 = vpack.c.bf16 %v397_v44, %v395_v43  ;;  %v375_v0 = vadd.f32 %v952_v18, %v347_v53  ;;  %v320_v3 = vunpack.c.l.bf16 %v967_v33  ;;  %v326_v4 = vunpack.c.l.bf16 %v975_v41 }
  0x1c   : > { %769 = vmatprep.mubr.msk.bf16.mxu0 %vm490_vm0, %v411_v48  ;;  %v328_v5 = vunpack.c.l.bf16 %v313_v47  ;;  %v377_v7 = vadd.f32 %v952_v18, %v349_v57  ;;  %v383_v8 = vadd.f32 %v952_v18, %v355_v58  ;;  %v385_v9 = vadd.f32 %v952_v18, %v357_v61 }
  0x1d   : > { %771 = vmatprep.mubr.msk.bf16.mxu1 %vm490_vm0, %v415_v51  ;;  %v870_v10 = vmov 0.0   ;;  %v386_v11 = vmax.f32 %v370_v59, 0.0  ;;  %v388_v12 = vmax.f32 %v372_v60, 0.0  ;;  %v394_v13 = vmax.f32 %v378_v62, 0.0 }
  0x1e   : > { %512 = vmatpush1.bf16.msra.mxu0 %v840_v24  ;;  %805 = vmatpush1.bf16.msra.mxu1 %v840_v24  ;;  %298 = vst.msk [vmem:[#allocation2] sm:$0xff] %vm297_vm1, %v870_v10  ;;  %299 = vst.msk [vmem:[#allocation2 + $0x8] sm:$0xff] %vm297_vm1, %v870_v10  ;;  %v396_v14 = vmax.f32 %v380_v63, 0.0  ;;  %v346_v15 = vmul.f32 %v960_v26, %v318_v1  ;;  %v348_v16 = vmul.f32 %v960_v26, %v320_v3 }
  0x1f   : > { %513 = vmatprep.subr.bf16.mxu0 %v869_v2  ;;  %797 = vmatprep.subr.bf16.mxu1 %v869_v2  ;;  %300 = vst.msk [vmem:[#allocation2 + $0x10] sm:$0xff] %vm297_vm1, %v870_v10  ;;  %301 = vst.msk [vmem:[#allocation2 + $0x18] sm:$0xff] %vm297_vm1, %v870_v10  ;;  %v354_v17 = vmul.f32 %v960_v26, %v326_v4  ;;  %v356_v18 = vmul.f32 %v960_v26, %v328_v5  ;;  %v391_v20 = vmax.f32 %v375_v0, 0.0 }
  0x20   : > { %302 = vst.msk [vmem:[#allocation2 + $0x20] sm:$0xff] %vm297_vm1, %v870_v10  ;;  %303 = vst.msk [vmem:[#allocation2 + $0x28] sm:$0xff] %vm297_vm1, %v870_v10  ;;  %v393_v21 = vmax.f32 %v377_v7, 0.0  ;;  %v399_v22 = vmax.f32 %v383_v8, 0.0  ;;  %v401_v23 = vmax.f32 %v385_v9, 0.0  ;;  %v410_v24 = vpack.c.bf16 %v388_v12, %v386_v11 }
  0x21   : > { %304 = vst.msk [vmem:[#allocation2 + $0x30] sm:$0xff] %vm297_vm1, %v870_v10  ;;  %305 = vst.msk [vmem:[#allocation2 + $0x38] sm:$0xff] %vm297_vm1, %v870_v10  ;;  %v414_v25 = vpack.c.bf16 %v396_v14, %v394_v13  ;;  %v374_v27 = vadd.f32 %v972_v38, %v346_v15  ;;  %v376_v26 = vadd.f32 %v972_v38, %v348_v16 }
  0x22   : > { %514 = vmatpush1.bf16.msra.mxu0 %v841_v42  ;;  %806 = vmatpush1.bf16.msra.mxu1 %v841_v42  ;;  %v382_v28 = vadd.f32 %v972_v38, %v354_v17  ;;  %v384_v29 = vadd.f32 %v972_v38, %v356_v18  ;;  %v413_v30 = vpack.c.bf16 %v393_v21, %v391_v20 }
  0x23   : > { %515 = vmatprep.subr.bf16.mxu0 %v869_v2  ;;  %798 = vmatprep.subr.bf16.mxu1 %v869_v2  ;;  %v417_v31 = vpack.c.bf16 %v401_v23, %v399_v22  ;;  %v390_v32 = vmax.f32 %v374_v27, 0.0  ;;  %v392_v33 = vmax.f32 %v376_v26, 0.0 }
  0x24   : > { %v398_v34 = vmax.f32 %v382_v28, 0.0 }
  0x25   : > { %v412_v35 = vpack.c.bf16 %v392_v33, %v390_v32  ;;  %v402_v37 = vld [vmem:[#allocation2] sm:$0xff]  ;;  %v403_v45 = vld [vmem:[#allocation2 + $0x8] sm:$0xff] }
  0x26   : > { %516 = vmatpush1.bf16.msra.mxu0 %v842_v56  ;;  %807 = vmatpush1.bf16.msra.mxu1 %v842_v56  ;;  %v404_v53 = vld [vmem:[#allocation2 + $0x10] sm:$0xff]  ;;  %v405_v59 = vld [vmem:[#allocation2 + $0x18] sm:$0xff] }
  0x27   : > { %517 = vmatprep.subr.bf16.mxu0 %v869_v2  ;;  %799 = vmatprep.subr.bf16.mxu1 %v869_v2  ;;  %v406_v38 = vld [vmem:[#allocation2 + $0x20] sm:$0xff]  ;;  %v407_v46 = vld [vmem:[#allocation2 + $0x28] sm:$0xff] }
  0x28   : > { %v408_v54 = vld [vmem:[#allocation2 + $0x30] sm:$0xff]  ;;  %v409_v0 = vld [vmem:[#allocation2 + $0x38] sm:$0xff] }
  0x2a   : > { %518 = vmatpush1.bf16.msra.mxu0 %v843_v6  ;;  %808 = vmatpush1.bf16.msra.mxu1 %v843_v6 }
  0x2b   : > { %533 = vmatprep.subr.bf16.mxu0 %v869_v2  ;;  %800 = vmatprep.subr.bf16.mxu1 %v869_v2  ;;  %v400_v2 = vmax.f32 %v384_v29, 0.0 }
  0x2d   : > { %v416_v36 = vpack.c.bf16 %v400_v2, %v398_v34 }
  0x2e   : > { %534 = vmatpush2.bf16.msra.mxu0 %v844_v19  ;;  %809 = vmatpush2.bf16.msra.mxu1 %v844_v19 }
  0x31   : > { %536 = vmatmul.mubr.bf16.vlgmr.msra.gmra.mxu0 %v410_v24  ;;  %552 = vmatmul.mubr.bf16.vlgmr.msra.gmra.mxu1 %v414_v25 }
  0x32   : > { %770 = vmatprep.mubr.msk.bf16.mxu0 %vm490_vm0, %v413_v30  ;;  %772 = vmatprep.mubr.msk.bf16.mxu1 %vm490_vm0, %v417_v31 }
  0x39   : > { %544 = vmatmul.mubr.bf16.gmra.mxu0 %v412_v35  ;;  %560 = vmatmul.mubr.bf16.gmra.mxu1 %v416_v36 }
  0xf1   : > { %v537_v39 = vpop.f32.mrf.mxu0  ;;  %v553_v40 = vpop.f32.mrf.mxu1 }
  0xf2   : > { %v568_v41 = vadd.f32 %v537_v39, %v402_v37  ;;  %v572_v42 = vadd.f32 %v553_v40, %v406_v38 }
  0xf3   : > { %v539_v43 = vpop.f32.mrf.mxu0  ;;  %v555_v44 = vpop.f32.mrf.mxu1 }
  0xf4   : > { %577 = vst.msk [vmem:[#allocation2] sm:$0xff] %vm297_vm1, %v568_v41  ;;  %581 = vst.msk [vmem:[#allocation2 + $0x20] sm:$0xff] %vm297_vm1, %v572_v42 }
  0xf5   : > { %v540_v47 = vpop.f32.mrf.mxu0  ;;  %v556_v48 = vpop.f32.mrf.mxu1 }
  0xf6   : > { %v569_v49 = vadd.f32 %v540_v47, %v403_v45  ;;  %v573_v50 = vadd.f32 %v556_v48, %v407_v46 }
  0xf7   : > { %v542_v51 = vpop.f32.mrf.mxu0  ;;  %v558_v52 = vpop.f32.mrf.mxu1 }
  0xf8   : > { %578 = vst.msk [vmem:[#allocation2 + $0x8] sm:$0xff] %vm297_vm1, %v569_v49  ;;  %582 = vst.msk [vmem:[#allocation2 + $0x28] sm:$0xff] %vm297_vm1, %v573_v50 }
  0xf9   : > { %v545_v55 = vpop.f32.mrf.mxu0  ;;  %v561_v56 = vpop.f32.mrf.mxu1 }
  0xfa   : > { %v570_v57 = vadd.f32 %v545_v55, %v404_v53  ;;  %v574_v58 = vadd.f32 %v561_v56, %v408_v54 }
  0xfb   : > { %v588_v60 = vld [vmem:[#allocation2] sm:$0xff]  ;;  %v547_v62 = vpop.f32.mrf.mxu0  ;;  %v563_v63 = vpop.f32.mrf.mxu1 }
  0xfc   : > { %v592_v61 = vld [vmem:[#allocation2 + $0x20] sm:$0xff]  ;;  %v784_v1 = vpack.c.bf16 %v588_v60, %v588_v60  ;;  %579 = vst.msk [vmem:[#allocation2 + $0x10] sm:$0xff] %vm297_vm1, %v570_v57  ;;  %583 = vst.msk [vmem:[#allocation2 + $0x30] sm:$0xff] %vm297_vm1, %v574_v58 }
  0xfd   : > { %v788_v3 = vpack.c.bf16 %v592_v61, %v592_v61  ;;  %v548_v4 = vpop.f32.mrf.mxu0  ;;  %v564_v5 = vpop.f32.mrf.mxu1 }
  0xfe   : > { %629 = vst.msk [vmem:[%s1043_s27] sm:$0xf] %vm628_vm2, %v784_v1  ;;  %v571_v6 = vadd.f32 %v548_v4, %v405_v59  ;;  %v575_v7 = vadd.f32 %v564_v5, %v409_v0 }
  0xff   : > { %633 = vst.msk [vmem:[%s1043_s27 + $0x10] sm:$0xf] %vm628_vm2, %v788_v3  ;;  %v589_v8 = vld [vmem:[#allocation2 + $0x8] sm:$0xff]  ;;  %v550_v10 = vpop.f32.mrf.mxu0  ;;  %v566_v11 = vpop.f32.mrf.mxu1 }
 0x100   : > { %v593_v9 = vld [vmem:[#allocation2 + $0x28] sm:$0xff]  ;;  %v785_v12 = vpack.c.bf16 %v589_v8, %v589_v8  ;;  %580 = vst.msk [vmem:[#allocation2 + $0x18] sm:$0xff] %vm297_vm1, %v571_v6  ;;  %584 = vst.msk [vmem:[#allocation2 + $0x38] sm:$0xff] %vm297_vm1, %v575_v7 }
 0x101   : > { %v789_v13 = vpack.c.bf16 %v593_v9, %v593_v9 }
 0x102   : > { %630 = vst.msk [vmem:[%s1043_s27 + $0x4] sm:$0xf] %vm628_vm2, %v785_v12 }
 0x103   : > { %634 = vst.msk [vmem:[%s1043_s27 + $0x14] sm:$0xf] %vm628_vm2, %v789_v13  ;;  %v590_v14 = vld [vmem:[#allocation2 + $0x10] sm:$0xff] }
 0x104   : > { %v594_v15 = vld [vmem:[#allocation2 + $0x30] sm:$0xff]  ;;  %v786_v16 = vpack.c.bf16 %v590_v14, %v590_v14 }
 0x105   : > { %v790_v17 = vpack.c.bf16 %v594_v15, %v594_v15 }
 0x106   : > { %631 = vst.msk [vmem:[%s1043_s27 + $0x8] sm:$0xf] %vm628_vm2, %v786_v16 }
 0x107   : > { %635 = vst.msk [vmem:[%s1043_s27 + $0x18] sm:$0xf] %vm628_vm2, %v790_v17  ;;  %v591_v18 = vld [vmem:[#allocation2 + $0x18] sm:$0xff] }
 0x108   : > { %v595_v19 = vld [vmem:[#allocation2 + $0x38] sm:$0xff]  ;;  %v787_v20 = vpack.c.bf16 %v591_v18, %v591_v18 }
 0x109   : > { %v791_v21 = vpack.c.bf16 %v595_v19, %v595_v19 }
 0x10a   : > { %632 = vst.msk [vmem:[%s1043_s27 + $0xc] sm:$0xf] %vm628_vm2, %v787_v20 }
 0x10b   : > { %636 = vst.msk [vmem:[%s1043_s27 + $0x1c] sm:$0xf] %vm628_vm2, %v791_v21 }
 0x10c PF: > { %s14_s17 = sadd.s32 1, %s867_s17   ;;  %s1079_s15 = smov %s863_s16 }
 0x10d   : > { %p11_p5 = scmp.ge.s32.totalorder %s14_s17, 4   ;;  %s1080_s16 = smov %s1082_s18 }
 0x10f   :  { %13 = sbr.rel (!%p11_p5) target bundleno = 2 (0x2), region = 83 }

// kernel: densenet_forward.23
= control target key start
LH: loop header
LB: loop body
LE: loop exit
PB: predicated region body
PF: predicated region fallthrough
CT: control target
= control target key end

     0   :  { %s765_s15 = smov 0   ;;  %s767_s16 = smov 0   ;;  %s842_s0 = inlined_call_operand.vmem [shape: bf16[128,16], index: 0, kind: input, shape index: {}]   ;;  %s843_s1 = inlined_call_operand.vmem [shape: f32[1,16], index: 1, kind: input, shape index: {}]   ;;  %s844_s2 = inlined_call_operand.vmem [shape: f32[1,16], index: 2, kind: input, shape index: {}]   ;;  %s845_s3 = inlined_call_operand.vmem [shape: bf16[16,8], index: 3, kind: input, shape index: {}]   ;;  %s846_s4 = inlined_call_operand.vmem [shape: bf16[128,8], index: 4, kind: output, shape index: {}]  }
   0x1   :  { %s769_s17 = smov 0  }
   0x2 LB: > { %s26_s18 = sadd.s32 1, %s733_s16  ;;  %p623_p0 = scmp.ge.s32.totalorder %s737_s17, 1  ;;  %s737_s17 = sphi %s769_s17, %s14_s17   ;;  %s733_s16 = sphi %s767_s16, %s848_s16   ;;  %s729_s15 = sphi %s765_s15, %s847_s15  }
   0x3   : > { %p28_p1 = scmp.ge.s32.totalorder %s26_s18, 2  ;;  %p207_p2 = scmp.lt.s32.totalorder %s737_s17, 3 }
   0x5   : > { %s850_s18 = smov (%p28_p1, %s26_s18), 0  ;;  %p208_p3 = pnand %p623_p0, %p207_p2 }
   0x6   : > { %s624_s21 = sshll.u32 (!%p208_p3), %s729_s15, 3 }
   0x7   : > { %211 = sbr.rel (%p208_p3) target bundleno = 240 (0xf0), region = 36  ;;  %p248_p4 = scmp.lt.s32.totalorder (!%p208_p3), %s624_s21, 15 }
   0xc   : > { %v714_v0 = vld [vmem:[%s845_s3] sm:$0xff]   ;;  %vm279_vm0 = vcmask 64512   ;;  %s852_s21 = smov (!%p248_p4, %s624_s21), 15  ;;  %v739_v1 = vmov 0.0   ;;  %vm362_vm1 = vcmask 130048   ;;  %vm500_vm2 = vcmask 60416  }
   0xd   : > { %677 = vmatprep.subr.bf16.mxu0 %v714_v0  ;;  %687 = vmatprep.subr.bf16.mxu1 %v714_v0  ;;  %282 = vst.msk [vmem:[#allocation2 + $0x10] sm:$0xff] %vm279_vm0, %v739_v1  ;;  %280 = vst.msk [vmem:[#allocation2] sm:$0xff] %vm279_vm0, %v739_v1  ;;  %s625_s22 = sshll.u32 %s852_s21, 2  ;;  %v628_v2 = vld [vmem:[%s843_s1] ss:$0 sm:$0xff] }
   0xe   : > { %678 = vmatpush3.bf16.msra.mxu0 %v714_v0  ;;  %688 = vmatpush3.bf16.msra.mxu1 %v714_v0  ;;  %281 = vst.msk [vmem:[#allocation2 + $0x8] sm:$0xff] %vm279_vm0, %v739_v1  ;;  %283 = vst.msk [vmem:[#allocation2 + $0x18] sm:$0xff] %vm279_vm0, %v739_v1  ;;  %s254_s25 = scalar_lea.vmem %s842_s0, %s625_s22  ;;  %v629_v11 = vld [vmem:[%s844_s2] ss:$0 sm:$0xff]  ;;  %s272_s6 = scalar_lea.vmem %s846_s4, %s625_s22 }
   0xf   : > { %284 = vst.msk [vmem:[#allocation2 + $0x20] sm:$0xff] %vm279_vm0, %v739_v1  ;;  %285 = vst.msk [vmem:[#allocation2 + $0x28] sm:$0xff] %vm279_vm0, %v739_v1  ;;  %v654_v3 = vld [vmem:[%s254_s25] sm:$0xff]   ;;  %v670_v4 = vld [vmem:[%s254_s25 + $0x10] sm:$0xff]  }
  0x10   : > { %286 = vst.msk [vmem:[#allocation2 + $0x30] sm:$0xff] %vm279_vm0, %v739_v1  ;;  %287 = vst.msk [vmem:[#allocation2 + $0x38] sm:$0xff] %vm279_vm0, %v739_v1  ;;  %v669_v5 = vld [vmem:[%s254_s25 + $0x8] sm:$0xff]   ;;  %v655_v6 = vunpack.c.l.bf16 %v654_v3  ;;  %v656_v7 = vunpack.c.h.bf16 %v654_v3  ;;  %v663_v8 = vunpack.c.l.bf16 %v670_v4  ;;  %v664_v9 = vunpack.c.h.bf16 %v670_v4  ;;  %v671_v10 = vld [vmem:[%s254_s25 + $0x18] sm:$0xff]  }
  0x11   : > { %v659_v12 = vunpack.c.l.bf16 %v669_v5  ;;  %v660_v13 = vunpack.c.h.bf16 %v669_v5  ;;  %v667_v14 = vunpack.c.l.bf16 %v671_v10  ;;  %v668_v15 = vunpack.c.h.bf16 %v671_v10 }
  0x12   : > { %v311_v16 = vmul.f32 %v655_v6, %v628_v2  ;;  %v312_v17 = vmul.f32 %v656_v7, %v628_v2  ;;  %v315_v18 = vmul.f32 %v663_v8, %v628_v2  ;;  %v316_v19 = vmul.f32 %v664_v9, %v628_v2 }
  0x13   : > { %v313_v20 = vmul.f32 %v659_v12, %v628_v2  ;;  %v314_v21 = vmul.f32 %v660_v13, %v628_v2  ;;  %v317_v22 = vmul.f32 %v667_v14, %v628_v2  ;;  %v318_v23 = vmul.f32 %v668_v15, %v628_v2 }
  0x14   : > { %v326_v24 = vadd.f32 %v629_v11, %v311_v16  ;;  %v327_v25 = vadd.f32 %v629_v11, %v312_v17  ;;  %v330_v26 = vadd.f32 %v629_v11, %v315_v18  ;;  %v331_v27 = vadd.f32 %v629_v11, %v316_v19  ;;  %v344_v44 = vld [vmem:[#allocation2 + $0x10] sm:$0xff]  ;;  %v342_v48 = vld [vmem:[#allocation2] sm:$0xff] }
  0x15   : > { %v328_v28 = vadd.f32 %v629_v11, %v313_v20  ;;  %v329_v29 = vadd.f32 %v629_v11, %v314_v21  ;;  %v332_v30 = vadd.f32 %v629_v11, %v317_v22  ;;  %v333_v31 = vadd.f32 %v629_v11, %v318_v23  ;;  %v345_v54 = vld [vmem:[#allocation2 + $0x18] sm:$0xff]  ;;  %v343_v60 = vld [vmem:[#allocation2 + $0x8] sm:$0xff] }
  0x16   : > { %v334_v32 = vmax.f32 %v326_v24, 0.0  ;;  %v335_v33 = vmax.f32 %v327_v25, 0.0  ;;  %v338_v34 = vmax.f32 %v330_v26, 0.0  ;;  %v339_v35 = vmax.f32 %v331_v27, 0.0  ;;  %v346_v49 = vld [vmem:[#allocation2 + $0x20] sm:$0xff]  ;;  %v347_v61 = vld [vmem:[#allocation2 + $0x28] sm:$0xff] }
  0x17   : > { %v336_v36 = vmax.f32 %v328_v28, 0.0  ;;  %v337_v37 = vmax.f32 %v329_v29, 0.0  ;;  %v340_v38 = vmax.f32 %v332_v30, 0.0  ;;  %v341_v39 = vmax.f32 %v333_v31, 0.0  ;;  %v348_v45 = vld [vmem:[#allocation2 + $0x30] sm:$0xff]  ;;  %v349_v55 = vld [vmem:[#allocation2 + $0x38] sm:$0xff] }
  0x18   : > { %v350_v40 = vpack.c.bf16 %v335_v33, %v334_v32  ;;  %v352_v41 = vpack.c.bf16 %v339_v35, %v338_v34 }
  0x19   : > { %v351_v42 = vpack.c.bf16 %v337_v37, %v336_v36  ;;  %v353_v43 = vpack.c.bf16 %v341_v39, %v340_v38 }
  0x1a   : > { %679 = vmatprep.mubr.msk.bf16.mxu0 %vm362_vm1, %v350_v40  ;;  %683 = vmatprep.mubr.msk.bf16.mxu1 %vm362_vm1, %v352_v41 }
  0x1b   : > { %680 = vmatmul.mubr.msk.bf16.vlgmr.msra.gmra.mxu0 %vm362_vm1, %v351_v42  ;;  %684 = vmatmul.mubr.msk.bf16.vlgmr.msra.gmra.mxu1 %vm362_vm1, %v353_v43 }
  0xdb   : > { %v681_v46 = vpop.f32.mrf.mxu0  ;;  %v685_v47 = vpop.f32.mrf.mxu1 }
  0xdc   : > { %v442_v50 = vadd.f32 %v681_v46, %v344_v44  ;;  %v446_v51 = vadd.f32 %v685_v47, %v348_v45 }
  0xdd   : > { %v409_v52 = vpop.f32.mrf.mxu0  ;;  %v425_v53 = vpop.f32.mrf.mxu1 }
  0xde   : > { %451 = vst.msk [vmem:[#allocation2 + $0x10] sm:$0xff] %vm279_vm0, %v442_v50  ;;  %455 = vst.msk [vmem:[#allocation2 + $0x30] sm:$0xff] %vm279_vm0, %v446_v51  ;;  %v440_v56 = vadd.f32 %v409_v52, %v342_v48  ;;  %v444_v57 = vadd.f32 %v425_v53, %v346_v49 }
  0xdf   : > { %v682_v58 = vpop.f32.mrf.mxu0  ;;  %v686_v59 = vpop.f32.mrf.mxu1 }
  0xe0   : > { %449 = vst.msk [vmem:[#allocation2] sm:$0xff] %vm279_vm0, %v440_v56  ;;  %453 = vst.msk [vmem:[#allocation2 + $0x20] sm:$0xff] %vm279_vm0, %v444_v57  ;;  %v443_v62 = vadd.f32 %v682_v58, %v345_v54  ;;  %v447_v63 = vadd.f32 %v686_v59, %v349_v55 }
  0xe1   : > { %v412_v0 = vpop.f32.mrf.mxu0  ;;  %v428_v1 = vpop.f32.mrf.mxu1 }
  0xe2   : > { %452 = vst.msk [vmem:[#allocation2 + $0x18] sm:$0xff] %vm279_vm0, %v443_v62  ;;  %456 = vst.msk [vmem:[#allocation2 + $0x38] sm:$0xff] %vm279_vm0, %v447_v63  ;;  %v441_v2 = vadd.f32 %v412_v0, %v343_v60  ;;  %v445_v3 = vadd.f32 %v428_v1, %v347_v61 }
  0xe4   : > { %450 = vst.msk [vmem:[#allocation2 + $0x8] sm:$0xff] %vm279_vm0, %v441_v2  ;;  %454 = vst.msk [vmem:[#allocation2 + $0x28] sm:$0xff] %vm279_vm0, %v445_v3 }
  0xe5   : > { %v462_v4 = vld [vmem:[#allocation2 + $0x10] sm:$0xff] }
  0xe6   : > { %v466_v5 = vld [vmem:[#allocation2 + $0x30] sm:$0xff]  ;;  %v647_v6 = vpack.c.bf16 %v462_v4, %v462_v4 }
  0xe7   : > { %v651_v7 = vpack.c.bf16 %v466_v5, %v466_v5  ;;  %v460_v8 = vld [vmem:[#allocation2] sm:$0xff] }
  0xe8   : > { %v464_v9 = vld [vmem:[#allocation2 + $0x20] sm:$0xff]  ;;  %503 = vst.msk [vmem:[%s272_s6 + $0x8] sm:$0xf] %vm500_vm2, %v647_v6  ;;  %v645_v10 = vpack.c.bf16 %v460_v8, %v460_v8 }
  0xe9   : > { %507 = vst.msk [vmem:[%s272_s6 + $0x18] sm:$0xf] %vm500_vm2, %v651_v7  ;;  %v649_v11 = vpack.c.bf16 %v464_v9, %v464_v9  ;;  %v463_v12 = vld [vmem:[#allocation2 + $0x18] sm:$0xff] }
  0xea   : > { %v467_v13 = vld [vmem:[#allocation2 + $0x38] sm:$0xff]  ;;  %501 = vst.msk [vmem:[%s272_s6] sm:$0xf] %vm500_vm2, %v645_v10  ;;  %v648_v14 = vpack.c.bf16 %v463_v12, %v463_v12 }
  0xeb   : > { %505 = vst.msk [vmem:[%s272_s6 + $0x10] sm:$0xf] %vm500_vm2, %v649_v11  ;;  %v652_v15 = vpack.c.bf16 %v467_v13, %v467_v13  ;;  %v461_v16 = vld [vmem:[#allocation2 + $0x8] sm:$0xff] }
  0xec   : > { %v465_v17 = vld [vmem:[#allocation2 + $0x28] sm:$0xff]  ;;  %504 = vst.msk [vmem:[%s272_s6 + $0xc] sm:$0xf] %vm500_vm2, %v648_v14  ;;  %v646_v18 = vpack.c.bf16 %v461_v16, %v461_v16 }
  0xed   : > { %508 = vst.msk [vmem:[%s272_s6 + $0x1c] sm:$0xf] %vm500_vm2, %v652_v15  ;;  %v650_v19 = vpack.c.bf16 %v465_v17, %v465_v17 }
  0xee   : > { %502 = vst.msk [vmem:[%s272_s6 + $0x4] sm:$0xf] %vm500_vm2, %v646_v18 }
  0xef   : > { %506 = vst.msk [vmem:[%s272_s6 + $0x14] sm:$0xf] %vm500_vm2, %v650_v19 }
  0xf0 PF: > { %s14_s17 = sadd.s32 1, %s737_s17   ;;  %s847_s15 = smov %s733_s16 }
  0xf1   : > { %p11_p5 = scmp.ge.s32.totalorder %s14_s17, 4   ;;  %s848_s16 = smov %s850_s18 }
  0xf3   :  { %13 = sbr.rel (!%p11_p5) target bundleno = 2 (0x2), region = 83 }

// kernel: densenet_forward.24
= control target key start
LH: loop header
LB: loop body
LE: loop exit
PB: predicated region body
PF: predicated region fallthrough
CT: control target
= control target key end

     0   :  { %s601_s15 = smov 0   ;;  %s603_s16 = smov 0   ;;  %s648_s0 = inlined_call_operand.vmem [shape: bf16[32,16], index: 0, kind: input, shape index: {}]   ;;  %s649_s1 = inlined_call_operand.vmem [shape: f32[1,16], index: 1, kind: input, shape index: {}]   ;;  %s650_s2 = inlined_call_operand.vmem [shape: f32[1,16], index: 2, kind: input, shape index: {}]   ;;  %s651_s3 = inlined_call_operand.vmem [shape: bf16[16,16], index: 3, kind: input, shape index: {}]   ;;  %s652_s4 = inlined_call_operand.vmem [shape: bf16[32,16], index: 4, kind: output, shape index: {}]  }
   0x1   :  { %s605_s17 = smov 0  }
   0x2 LB: > { %s26_s18 = sadd.s32 1, %s568_s16  ;;  %p496_p0 = scmp.ge.s32.totalorder %s572_s17, 1  ;;  %s572_s17 = sphi %s605_s17, %s14_s17   ;;  %s568_s16 = sphi %s603_s16, %s654_s16   ;;  %s564_s15 = sphi %s601_s15, %s653_s15  }
   0x3   : > { %p28_p1 = scmp.ge.s32.totalorder %s26_s18, 2  ;;  %p207_p2 = scmp.lt.s32.totalorder %s572_s17, 3 }
   0x5   : > { %s656_s18 = smov (%p28_p1, %s26_s18), 0  ;;  %p208_p3 = pnand %p496_p0, %p207_p2 }
   0x6   : > { %s497_s21 = sshll.u32 (!%p208_p3), %s564_s15, 1 }
   0x7   : > { %211 = sbr.rel (%p208_p3) target bundleno = 236 (0xec), region = 36  ;;  %p248_p4 = scmp.lt.s32.totalorder (!%p208_p3), %s497_s21, 3 }
   0xc   : > { %v549_v0 = vld [vmem:[%s651_s3] sm:$0xff]   ;;  %v574_v1 = vmov 0.0   ;;  %vm279_vm0 = vcmask 130048   ;;  %vm575_vm1 = vmmov 0   ;;  %s658_s21 = smov (!%p248_p4, %s497_s21), 3  ;;  %vm379_vm2 = vcmask 125952  }
   0xd   : > { %517 = vmatprep.subr.bf16.mxu0 %v574_v1  ;;  %519 = vmatprep.mubr.msk.bf16.mxu0 %vm575_vm1, %v574_v1  ;;  %280 = vst.msk [vmem:[#allocation2] sm:$0xff] %vm279_vm0, %v574_v1  ;;  %281 = vst.msk [vmem:[#allocation2 + $0x8] sm:$0xff] %vm279_vm0, %v574_v1  ;;  %s498_s22 = sshll.u32 %s658_s21, 2  ;;  %v501_v3 = vld [vmem:[%s649_s1] ss:$0 sm:$0xff] }
   0xe   : > { %518 = vmatpush3.bf16.msra.mxu0 %v549_v0  ;;  %s254_s25 = scalar_lea.vmem %s648_s0, %s498_s22  ;;  %v502_v6 = vld [vmem:[%s650_s2] ss:$0 sm:$0xff]  ;;  %s272_s6 = scalar_lea.vmem %s652_s4, %s498_s22 }
   0xf   : > { %v512_v2 = vld [vmem:[%s254_s25] sm:$0xff]  }
  0x10   : > { %v513_v4 = vunpack.c.l.bf16 %v512_v2  ;;  %v514_v5 = vunpack.c.h.bf16 %v512_v2 }
  0x12   : > { %v293_v7 = vmul.f32 %v513_v4, %v501_v3  ;;  %v294_v8 = vmul.f32 %v514_v5, %v501_v3 }
  0x14   : > { %v302_v9 = vadd.f32 %v502_v6, %v293_v7  ;;  %v303_v10 = vadd.f32 %v502_v6, %v294_v8  ;;  %v306_v14 = vld [vmem:[#allocation2] sm:$0xff]  ;;  %v307_v18 = vld [vmem:[#allocation2 + $0x8] sm:$0xff] }
  0x16   : > { %v304_v11 = vmax.f32 %v302_v9, 0.0  ;;  %v305_v12 = vmax.f32 %v303_v10, 0.0 }
  0x18   : > { %v308_v13 = vpack.c.bf16 %v305_v12, %v304_v11 }
  0x1a   : > { %520 = vmatmul.mubr.msk.bf16.vlgmr.msra.gmra.mxu0 %vm279_vm0, %v308_v13 }
  0xda   : > { %v355_v15 = vpop.f32.mrf.mxu0 }
  0xdb   : > { %v362_v16 = vadd.f32 %v355_v15, %v306_v14 }
  0xdc   : > { %v521_v17 = vpop.f32.mrf.mxu0 }
  0xdd   : > { %364 = vst.msk [vmem:[#allocation2] sm:$0xff] %vm279_vm0, %v362_v16 }
  0xde   : > { %v358_v19 = vpop.f32.mrf.mxu0 }
  0xdf   : > { %v363_v20 = vadd.f32 %v358_v19, %v307_v18 }
  0xe0   : > { %v522_v21 = vpop.f32.mrf.mxu0 }
  0xe1   : > { %365 = vst.msk [vmem:[#allocation2 + $0x8] sm:$0xff] %vm279_vm0, %v363_v20 }
  0xe4   : > { %v369_v22 = vld [vmem:[#allocation2] sm:$0xff] }
  0xe5   : > { %v509_v23 = vpack.c.bf16 %v369_v22, %v369_v22 }
  0xe7   : > { %380 = vst.msk [vmem:[%s272_s6] sm:$0xf] %vm379_vm2, %v509_v23 }
  0xe8   : > { %v370_v24 = vld [vmem:[#allocation2 + $0x8] sm:$0xff] }
  0xe9   : > { %v510_v25 = vpack.c.bf16 %v370_v24, %v370_v24 }
  0xeb   : > { %381 = vst.msk [vmem:[%s272_s6 + $0x4] sm:$0xf] %vm379_vm2, %v510_v25 }
  0xec PF: > { %s14_s17 = sadd.s32 1, %s572_s17   ;;  %s653_s15 = smov %s568_s16 }
  0xed   : > { %p11_p5 = scmp.ge.s32.totalorder %s14_s17, 4   ;;  %s654_s16 = smov %s656_s18 }
  0xef   :  { %13 = sbr.rel (!%p11_p5) target bundleno = 2 (0x2), region = 83 }

// kernel: densenet_forward.25
= control target key start
LH: loop header
LB: loop body
LE: loop exit
PB: predicated region body
PF: predicated region fallthrough
CT: control target
= control target key end

     0   :  { %s710_s15 = smov 0   ;;  %s712_s16 = smov 0   ;;  %s793_s0 = inlined_call_operand.vmem [shape: bf16[32,144], index: 0, kind: input, shape index: {}]   ;;  %s794_s1 = inlined_call_operand.vmem [shape: f32[1,144], index: 1, kind: input, shape index: {}]   ;;  %s795_s2 = inlined_call_operand.vmem [shape: f32[1,144], index: 2, kind: input, shape index: {}]   ;;  %s796_s3 = inlined_call_operand.vmem [shape: bf16[144,4], index: 3, kind: input, shape index: {}]   ;;  %s797_s4 = inlined_call_operand.vmem [shape: bf16[32,4], index: 4, kind: output, shape index: {}]  }
   0x1   :  { %s714_s17 = smov 0  }
   0x2 LB: > { %s26_s18 = sadd.s32 1, %s677_s16  ;;  %p601_p0 = scmp.ge.s32.totalorder %s681_s17, 1  ;;  %s681_s17 = sphi %s714_s17, %s14_s17   ;;  %s677_s16 = sphi %s712_s16, %s799_s16   ;;  %s673_s15 = sphi %s710_s15, %s798_s15  }
   0x3   : > { %p28_p1 = scmp.ge.s32.totalorder %s26_s18, 2  ;;  %p214_p2 = scmp.lt.s32.totalorder %s681_s17, 3 }
   0x5   : > { %s801_s18 = smov (%p28_p1, %s26_s18), 0  ;;  %p215_p3 = pnand %p601_p0, %p214_p2 }
   0x6   : > { %s602_s21 = sshll.u32 (!%p215_p3), %s673_s15, 1 }
   0x7   : > { %218 = sbr.rel (%p215_p3) target bundleno = 259 (0x103), region = 36  ;;  %p260_p4 = scmp.lt.s32.totalorder (!%p215_p3), %s602_s21, 3 }
   0xc   : > { %v650_v0 = vld [vmem:[%s796_s3 + $0x38] sm:$0xff]   ;;  %v308_v1 = vlaneseq  ;;  %v683_v2 = vmov 0   ;;  %v651_v3 = vld [vmem:[%s796_s3 + $0x30] sm:$0xff]   ;;  %s803_s21 = smov (!%p260_p4, %s602_s21), 3  ;;  %v652_v5 = vld [vmem:[%s796_s3 + $0x28] sm:$0xff]   ;;  %vm297_vm0 = vcmask 31744  }
   0xd   : > { %422 = vmatprep.subr.bf16.mxu0 %v683_v2  ;;  %s621_s26 = sshll.u32 %s803_s21, 3  ;;  %v306_v9 = vld [vmem:[%s794_s1] sm:$0x3]  ;;  %v684_v19 = vmov 0.0   ;;  %v654_v20 = vld [vmem:[%s796_s3 + $0x18] sm:$0xff]   ;;  %v655_v28 = vld [vmem:[%s796_s3 + $0x10] sm:$0xff]  }
   0xe   : > { %423 = vmatpush1.bf16.msra.mxu0 %v650_v0  ;;  %v309_v4 = vshrl.u32 %v308_v1, 7  ;;  %s267_s29 = scalar_lea.vmem %s793_s0, %s621_s26  ;;  %v653_v10 = vld [vmem:[%s796_s3 + $0x20] sm:$0xff]   ;;  %298 = vst.msk [vmem:[#allocation2] sm:$0xff] %vm297_vm0, %v684_v19  ;;  %299 = vst.msk [vmem:[#allocation2 + $0x8] sm:$0xff] %vm297_vm0, %v684_v19  ;;  %vm418_vm1 = vcmask 130048   ;;  %v656_v33 = vld [vmem:[%s796_s3 + $0x8] sm:$0xff]  }
   0xf   : > { %424 = vmatprep.subr.bf16.mxu0 %v683_v2  ;;  %v300_v7 = vld [vmem:[%s267_s29] sm:$0xff]  ;;  %v301_v8 = vld [vmem:[%s267_s29 + $0x8] sm:$0xff]  ;;  %s606_s24 = sshll.u32 %s803_s21, 2  ;;  %vm481_vm2 = vcmask 27648  }
  0x10   : > { %v314_v6 = vsub.s32 1, %v309_v4  ;;  %v303_v11 = vunpack.c.h.bf16 %v300_v7  ;;  %v305_v12 = vunpack.c.h.bf16 %v301_v8  ;;  %v322_v13 = vld [vmem:[%s795_s2] sm:$0x3]  ;;  %v310_v16 = vsub.s32 0, %v309_v4  ;;  %s290_s27 = scalar_lea.vmem %s797_s4, %s606_s24 }
  0x11   : > { %v302_v23 = vunpack.c.l.bf16 %v300_v7  ;;  %v304_v24 = vunpack.c.l.bf16 %v301_v8  ;;  %v657_v36 = vld [vmem:[%s796_s3] sm:$0xff]  }
  0x12   : > { %425 = vmatpush1.bf16.msra.mxu0 %v651_v3  ;;  %v315_v14 = vrot.slane %v306_v9, %v314_v6  ;;  %v331_v15 = vrot.slane %v322_v13, %v314_v6  ;;  %v311_v25 = vrot.slane %v306_v9, %v310_v16  ;;  %v327_v30 = vrot.slane %v322_v13, %v310_v16  ;;  %v658_v39 = vld [vmem:[%s796_s3 + $0x40] sm:$0xff]  }
  0x13   : > { %426 = vmatprep.subr.bf16.mxu0 %v683_v2 }
  0x14   : > { %v319_v17 = vmul.f32 %v315_v14, %v303_v11  ;;  %v321_v18 = vmul.f32 %v315_v14, %v305_v12  ;;  %v318_v31 = vmul.f32 %v311_v25, %v302_v23  ;;  %v320_v32 = vmul.f32 %v311_v25, %v304_v24 }
  0x15   : > { %v342_v41 = vld [vmem:[#allocation2] sm:$0xff]  ;;  %v343_v45 = vld [vmem:[#allocation2 + $0x8] sm:$0xff] }
  0x16   : > { %427 = vmatpush1.bf16.msra.mxu0 %v652_v5  ;;  %v335_v21 = vadd.f32 %v331_v15, %v319_v17  ;;  %v337_v22 = vadd.f32 %v331_v15, %v321_v18  ;;  %v334_v34 = vadd.f32 %v327_v30, %v318_v31  ;;  %v336_v35 = vadd.f32 %v327_v30, %v320_v32 }
  0x17   : > { %428 = vmatprep.subr.bf16.mxu0 %v683_v2 }
  0x18   : > { %v339_v26 = vmax.f32 %v335_v21, 0.0  ;;  %v341_v27 = vmax.f32 %v337_v22, 0.0  ;;  %v338_v37 = vmax.f32 %v334_v34, 0.0  ;;  %v340_v38 = vmax.f32 %v336_v35, 0.0 }
  0x1a   : > { %429 = vmatpush1.bf16.msra.mxu0 %v653_v10  ;;  %v345_v29 = vpack.c.bf16 %v341_v27, %v339_v26  ;;  %v344_v40 = vpack.c.bf16 %v340_v38, %v338_v37 }
  0x1b   : > { %430 = vmatprep.subr.bf16.mxu0 %v683_v2 }
  0x1c   : > { %616 = vmatprep.mubr.msk.bf16.mxu0 %vm418_vm1, %v345_v29 }
  0x1e   : > { %431 = vmatpush1.bf16.msra.mxu0 %v654_v20 }
  0x1f   : > { %432 = vmatprep.subr.bf16.mxu0 %v683_v2 }
  0x22   : > { %433 = vmatpush1.bf16.msra.mxu0 %v655_v28 }
  0x23   : > { %434 = vmatprep.subr.bf16.mxu0 %v683_v2 }
  0x26   : > { %435 = vmatpush1.bf16.msra.mxu0 %v656_v33 }
  0x27   : > { %436 = vmatprep.subr.bf16.mxu0 %v683_v2 }
  0x2a   : > { %437 = vmatpush1.bf16.msra.mxu0 %v657_v36 }
  0x2b   : > { %452 = vmatprep.subr.bf16.mxu0 %v683_v2 }
  0x2e   : > { %453 = vmatpush2.bf16.msra.mxu0 %v658_v39 }
  0x31   : > { %455 = vmatmul.mubr.bf16.vlgmr.msra.gmra.mxu0 %v344_v40 }
  0xf1   : > { %v456_v42 = vpop.f32.mrf.mxu0 }
  0xf2   : > { %v463_v43 = vadd.f32 %v456_v42, %v342_v41 }
  0xf3   : > { %v458_v44 = vpop.f32.mrf.mxu0 }
  0xf4   : > { %466 = vst.msk [vmem:[#allocation2] sm:$0xff] %vm297_vm0, %v463_v43 }
  0xf5   : > { %v459_v46 = vpop.f32.mrf.mxu0 }
  0xf6   : > { %v464_v47 = vadd.f32 %v459_v46, %v343_v45 }
  0xf7   : > { %v461_v48 = vpop.f32.mrf.mxu0 }
  0xf8   : > { %467 = vst.msk [vmem:[#allocation2 + $0x8] sm:$0xff] %vm297_vm0, %v464_v47 }
  0xfb   : > { %v471_v49 = vld [vmem:[#allocation2] sm:$0xff] }
  0xfc   : > { %v622_v50 = vpack.c.bf16 %v471_v49, %v471_v49 }
  0xfe   : > { %482 = vst.msk [vmem:[%s290_s27] sm:$0xf] %vm481_vm2, %v622_v50 }
  0xff   : > { %v472_v51 = vld [vmem:[#allocation2 + $0x8] sm:$0xff] }
 0x100   : > { %v623_v52 = vpack.c.bf16 %v472_v51, %v472_v51 }
 0x102   : > { %483 = vst.msk [vmem:[%s290_s27 + $0x4] sm:$0xf] %vm481_vm2, %v623_v52 }
 0x103 PF: > { %s14_s17 = sadd.s32 1, %s681_s17   ;;  %s798_s15 = smov %s677_s16 }
 0x104   : > { %p11_p5 = scmp.ge.s32.totalorder %s14_s17, 4   ;;  %s799_s16 = smov %s801_s18 }
 0x106   :  { %13 = sbr.rel (!%p11_p5) target bundleno = 2 (0x2), region = 83 }

// kernel: densenet_forward.28
= control target key start
LH: loop header
LB: loop body
LE: loop exit
PB: predicated region body
PF: predicated region fallthrough
CT: control target
= control target key end

     0   :  { %s602_s15 = smov 0   ;;  %s604_s16 = smov 0   ;;  %s648_s0 = inlined_call_operand.vmem [shape: bf16[32,16], index: 0, kind: input, shape index: {}]   ;;  %s649_s1 = inlined_call_operand.vmem [shape: f32[1,16], index: 1, kind: input, shape index: {}]   ;;  %s650_s2 = inlined_call_operand.vmem [shape: f32[1,16], index: 2, kind: input, shape index: {}]   ;;  %s651_s3 = inlined_call_operand.vmem [shape: bf16[16,8], index: 3, kind: input, shape index: {}]   ;;  %s652_s4 = inlined_call_operand.vmem [shape: bf16[32,8], index: 4, kind: output, shape index: {}]  }
   0x1   :  { %s606_s17 = smov 0  }
   0x2 LB: > { %s26_s18 = sadd.s32 1, %s569_s16  ;;  %p497_p0 = scmp.ge.s32.totalorder %s573_s17, 1  ;;  %s573_s17 = sphi %s606_s17, %s14_s17   ;;  %s569_s16 = sphi %s604_s16, %s654_s16   ;;  %s565_s15 = sphi %s602_s15, %s653_s15  }
   0x3   : > { %p28_p1 = scmp.ge.s32.totalorder %s26_s18, 2  ;;  %p207_p2 = scmp.lt.s32.totalorder %s573_s17, 3 }
   0x5   : > { %s656_s18 = smov (%p28_p1, %s26_s18), 0  ;;  %p208_p3 = pnand %p497_p0, %p207_p2 }
   0x6   : > { %s498_s21 = sshll.u32 (!%p208_p3), %s565_s15, 1 }
   0x7   : > { %211 = sbr.rel (%p208_p3) target bundleno = 236 (0xec), region = 36  ;;  %p248_p4 = scmp.lt.s32.totalorder (!%p208_p3), %s498_s21, 3 }
   0xc   : > { %vm279_vm0 = vcmask 64512   ;;  %v575_v0 = vmov 0.0   ;;  %v550_v1 = vld [vmem:[%s651_s3] sm:$0xff]   ;;  %vm576_vm1 = vmmov 0   ;;  %s658_s21 = smov (!%p248_p4, %s498_s21), 3  ;;  %vm317_vm2 = vcmask 130048  }
   0xd   : > { %280 = vst.msk [vmem:[#allocation2] sm:$0xff] %vm279_vm0, %v575_v0  ;;  %281 = vst.msk [vmem:[#allocation2 + $0x8] sm:$0xff] %vm279_vm0, %v575_v0  ;;  %518 = vmatprep.subr.bf16.mxu0 %v575_v0  ;;  %520 = vmatprep.mubr.msk.bf16.mxu0 %vm576_vm1, %v575_v0  ;;  %s499_s22 = sshll.u32 %s658_s21, 2  ;;  %v502_v3 = vld [vmem:[%s649_s1] ss:$0 sm:$0xff]  ;;  %vm380_vm3 = vcmask 60416  }
   0xe   : > { %519 = vmatpush3.bf16.msra.mxu0 %v550_v1  ;;  %s254_s25 = scalar_lea.vmem %s648_s0, %s499_s22  ;;  %v503_v6 = vld [vmem:[%s650_s2] ss:$0 sm:$0xff]  ;;  %s272_s6 = scalar_lea.vmem %s652_s4, %s499_s22 }
   0xf   : > { %v513_v2 = vld [vmem:[%s254_s25] sm:$0xff]  }
  0x10   : > { %v514_v4 = vunpack.c.l.bf16 %v513_v2  ;;  %v515_v5 = vunpack.c.h.bf16 %v513_v2 }
  0x12   : > { %v293_v7 = vmul.f32 %v514_v4, %v502_v3  ;;  %v294_v8 = vmul.f32 %v515_v5, %v502_v3 }
  0x14   : > { %v302_v9 = vadd.f32 %v503_v6, %v293_v7  ;;  %v303_v10 = vadd.f32 %v503_v6, %v294_v8  ;;  %v306_v14 = vld [vmem:[#allocation2] sm:$0xff]  ;;  %v307_v18 = vld [vmem:[#allocation2 + $0x8] sm:$0xff] }
  0x16   : > { %v304_v11 = vmax.f32 %v302_v9, 0.0  ;;  %v305_v12 = vmax.f32 %v303_v10, 0.0 }
  0x18   : > { %v308_v13 = vpack.c.bf16 %v305_v12, %v304_v11 }
  0x1a   : > { %521 = vmatmul.mubr.msk.bf16.vlgmr.msra.gmra.mxu0 %vm317_vm2, %v308_v13 }
  0xda   : > { %v355_v15 = vpop.f32.mrf.mxu0 }
  0xdb   : > { %v362_v16 = vadd.f32 %v355_v15, %v306_v14 }
  0xdc   : > { %v522_v17 = vpop.f32.mrf.mxu0 }
  0xdd   : > { %365 = vst.msk [vmem:[#allocation2] sm:$0xff] %vm279_vm0, %v362_v16 }
  0xde   : > { %v358_v19 = vpop.f32.mrf.mxu0 }
  0xdf   : > { %v363_v20 = vadd.f32 %v358_v19, %v307_v18 }
  0xe0   : > { %v523_v21 = vpop.f32.mrf.mxu0 }
  0xe1   : > { %366 = vst.msk [vmem:[#allocation2 + $0x8] sm:$0xff] %vm279_vm0, %v363_v20 }
  0xe4   : > { %v370_v22 = vld [vmem:[#allocation2] sm:$0xff] }
  0xe5   : > { %v510_v23 = vpack.c.bf16 %v370_v22, %v370_v22 }
  0xe7   : > { %381 = vst.msk [vmem:[%s272_s6] sm:$0xf] %vm380_vm3, %v510_v23 }
  0xe8   : > { %v371_v24 = vld [vmem:[#allocation2 + $0x8] sm:$0xff] }
  0xe9   : > { %v511_v25 = vpack.c.bf16 %v371_v24, %v371_v24 }
  0xeb   : > { %382 = vst.msk [vmem:[%s272_s6 + $0x4] sm:$0xf] %vm380_vm3, %v511_v25 }
  0xec PF: > { %s14_s17 = sadd.s32 1, %s573_s17   ;;  %s653_s15 = smov %s569_s16 }
  0xed   : > { %p11_p5 = scmp.ge.s32.totalorder %s14_s17, 4   ;;  %s654_s16 = smov %s656_s18 }
  0xef   :  { %13 = sbr.rel (!%p11_p5) target bundleno = 2 (0x2), region = 83 }

// kernel: densenet_forward.29
= control target key start
LH: loop header
LB: loop body
LE: loop exit
PB: predicated region body
PF: predicated region fallthrough
CT: control target
= control target key end

     0   :  { %vm22_vm0 = vcmask 130048   ;;  %v125_v0 = vmov 0.0   ;;  %vm126_vm1 = vmmov 0   ;;  %vm104_vm2 = vcmask 125952   ;;  %s170_s3 = inlined_call_operand.vmem [shape: bf16[16,16], index: 3, kind: input, shape index: {}]   ;;  %s171_s0 = inlined_call_operand.vmem [shape: bf16[8,16], index: 0, kind: input, shape index: {}]   ;;  %s172_s1 = inlined_call_operand.vmem [shape: f32[1,16], index: 1, kind: input, shape index: {}]   ;;  %s173_s2 = inlined_call_operand.vmem [shape: f32[1,16], index: 2, kind: input, shape index: {}]   ;;  %s174_s4 = inlined_call_operand.vmem [shape: bf16[8,16], index: 4, kind: output, shape index: {}]  }
   0x1   :  { %116 = vmatprep.subr.bf16.mxu0 %v125_v0  ;;  %v124_v1 = vld [vmem:[%s170_s3] sm:$0xff]   ;;  %118 = vmatprep.mubr.msk.bf16.mxu0 %vm126_vm1, %v125_v0  ;;  %23 = vst.msk [vmem:[#allocation2] sm:$0xff] %vm22_vm0, %v125_v0 }
   0x2   :  { %v24_v2 = vld [vmem:[%s171_s0] sm:$0xf]  ;;  %117 = vmatpush3.bf16.msra.mxu0 %v124_v1 }
   0x3   :  { %v110_v3 = vld [vmem:[%s172_s1] ss:$0 sm:$0xff]  ;;  %v25_v4 = vunpack.c.l.bf16 %v24_v2 }
   0x4   :  { %v111_v5 = vld [vmem:[%s173_s2] ss:$0 sm:$0xff] }
   0x5   :  { %v33_v6 = vmul.f32 %v110_v3, %v25_v4 }
   0x7   :  { %v41_v7 = vadd.f32 %v111_v5, %v33_v6 }
   0x8   :  { %v43_v10 = vld [vmem:[#allocation2] sm:$0xff] }
   0x9   :  { %v42_v8 = vmax.f32 %v41_v7, 0.0 }
   0xb   :  { %v44_v9 = vpack.c.bf16 %v42_v8, %v42_v8 }
   0xd   :  { %119 = vmatmul.mubr.msk.bf16.vlgmr.msra.gmra.mxu0 %vm22_vm0, %v44_v9 }
  0xcd   :  { %v91_v11 = vpop.f32.mrf.mxu0 }
  0xce   :  { %v97_v12 = vadd.f32 %v91_v11, %v43_v10 }
  0xcf   :  { %v120_v13 = vpop.f32.mrf.mxu0 }
  0xd0   :  { %98 = vst.msk [vmem:[#allocation2] sm:$0xff] %vm22_vm0, %v97_v12 }
  0xd1   :  { %v94_v14 = vpop.f32.mrf.mxu0 }
  0xd3   :  { %v121_v15 = vpop.f32.mrf.mxu0 }
  0xd7   :  { %v102_v16 = vld [vmem:[#allocation2] sm:$0xff] }
  0xd8   :  { %v103_v17 = vpack.c.bf16 %v102_v16, %v102_v16 }
  0xda   :  { %105 = vst.msk [vmem:[%s174_s4] sm:$0xf] %vm104_vm2, %v103_v17 }

// kernel: densenet_forward.30
= control target key start
LH: loop header
LB: loop body
LE: loop exit
PB: predicated region body
PF: predicated region fallthrough
CT: control target
= control target key end

     0   :  { %v29_v0 = vlaneseq  ;;  %vm22_vm0 = vcmask 31744   ;;  %v211_v1 = vmov 0   ;;  %v212_v3 = vmov 0.0   ;;  %s279_s3 = inlined_call_operand.vmem [shape: bf16[144,4], index: 3, kind: input, shape index: {}]   ;;  %s280_s0 = inlined_call_operand.vmem [shape: bf16[8,144], index: 0, kind: input, shape index: {}]   ;;  %s281_s1 = inlined_call_operand.vmem [shape: f32[1,144], index: 1, kind: input, shape index: {}]   ;;  %s282_s2 = inlined_call_operand.vmem [shape: f32[1,144], index: 2, kind: input, shape index: {}]   ;;  %s283_s4 = inlined_call_operand.vmem [shape: bf16[8,4], index: 4, kind: output, shape index: {}]  }
   0x1   :  { %136 = vmatprep.subr.bf16.mxu0 %v211_v1  ;;  %v202_v2 = vld [vmem:[%s279_s3 + $0x38] sm:$0xff]   ;;  %23 = vst.msk [vmem:[#allocation2] sm:$0xff] %vm22_vm0, %v212_v3  ;;  %v203_v4 = vld [vmem:[%s279_s3 + $0x30] sm:$0xff]   ;;  %v204_v6 = vld [vmem:[%s279_s3 + $0x28] sm:$0xff]   ;;  %vm132_vm1 = vcmask 130048   ;;  %vm184_vm2 = vcmask 27648  }
   0x2   :  { %137 = vmatpush1.bf16.msra.mxu0 %v202_v2  ;;  %v30_v5 = vshrl.u32 %v29_v0, 7  ;;  %v24_v8 = vld [vmem:[%s280_s0] sm:$0xff]  ;;  %v206_v17 = vld [vmem:[%s279_s3 + $0x18] sm:$0xff]   ;;  %v207_v22 = vld [vmem:[%s279_s3 + $0x10] sm:$0xff]  }
   0x3   :  { %138 = vmatprep.subr.bf16.mxu0 %v211_v1  ;;  %v27_v9 = vld [vmem:[%s281_s1] sm:$0x3]  ;;  %v26_v12 = vunpack.c.h.bf16 %v24_v8  ;;  %v25_v20 = vunpack.c.l.bf16 %v24_v8  ;;  %v208_v26 = vld [vmem:[%s279_s3 + $0x8] sm:$0xff]  }
   0x4   :  { %v35_v7 = vsub.s32 1, %v30_v5  ;;  %v41_v10 = vld [vmem:[%s282_s2] sm:$0x3]  ;;  %v31_v16 = vsub.s32 0, %v30_v5 }
   0x5   :  { %v205_v11 = vld [vmem:[%s279_s3 + $0x20] sm:$0xff]  }
   0x6   :  { %139 = vmatpush1.bf16.msra.mxu0 %v203_v4  ;;  %v36_v13 = vrot.slane %v27_v9, %v35_v7  ;;  %v50_v14 = vrot.slane %v41_v10, %v35_v7  ;;  %v32_v21 = vrot.slane %v27_v9, %v31_v16  ;;  %v46_v24 = vrot.slane %v41_v10, %v31_v16  ;;  %v209_v28 = vld [vmem:[%s279_s3] sm:$0xff]  }
   0x7   :  { %140 = vmatprep.subr.bf16.mxu0 %v211_v1  ;;  %v210_v30 = vld [vmem:[%s279_s3 + $0x40] sm:$0xff]  }
   0x8   :  { %v40_v15 = vmul.f32 %v36_v13, %v26_v12  ;;  %v39_v25 = vmul.f32 %v32_v21, %v25_v20  ;;  %v57_v32 = vld [vmem:[#allocation2] sm:$0xff] }
   0xa   :  { %141 = vmatpush1.bf16.msra.mxu0 %v204_v6  ;;  %v54_v18 = vadd.f32 %v50_v14, %v40_v15  ;;  %v53_v27 = vadd.f32 %v46_v24, %v39_v25 }
   0xb   :  { %142 = vmatprep.subr.bf16.mxu0 %v211_v1 }
   0xc   :  { %v56_v19 = vmax.f32 %v54_v18, 0.0  ;;  %v55_v29 = vmax.f32 %v53_v27, 0.0 }
   0xe   :  { %143 = vmatpush1.bf16.msra.mxu0 %v205_v11  ;;  %v59_v23 = vpack.c.bf16 %v56_v19, %v56_v19  ;;  %v58_v31 = vpack.c.bf16 %v55_v29, %v55_v29 }
   0xf   :  { %144 = vmatprep.subr.bf16.mxu0 %v211_v1 }
  0x10   :  { %199 = vmatprep.mubr.msk.bf16.mxu0 %vm132_vm1, %v59_v23 }
  0x12   :  { %145 = vmatpush1.bf16.msra.mxu0 %v206_v17 }
  0x13   :  { %146 = vmatprep.subr.bf16.mxu0 %v211_v1 }
  0x16   :  { %147 = vmatpush1.bf16.msra.mxu0 %v207_v22 }
  0x17   :  { %148 = vmatprep.subr.bf16.mxu0 %v211_v1 }
  0x1a   :  { %149 = vmatpush1.bf16.msra.mxu0 %v208_v26 }
  0x1b   :  { %150 = vmatprep.subr.bf16.mxu0 %v211_v1 }
  0x1e   :  { %151 = vmatpush1.bf16.msra.mxu0 %v209_v28 }
  0x1f   :  { %166 = vmatprep.subr.bf16.mxu0 %v211_v1 }
  0x22   :  { %167 = vmatpush2.bf16.msra.mxu0 %v210_v30 }
  0x25   :  { %169 = vmatmul.mubr.bf16.vlgmr.msra.gmra.mxu0 %v58_v31 }
  0xe5   :  { %v170_v33 = vpop.f32.mrf.mxu0 }
  0xe6   :  { %v176_v34 = vadd.f32 %v170_v33, %v57_v32 }
  0xe7   :  { %v172_v35 = vpop.f32.mrf.mxu0 }
  0xe8   :  { %178 = vst.msk [vmem:[#allocation2] sm:$0xff] %vm22_vm0, %v176_v34 }
  0xe9   :  { %v173_v36 = vpop.f32.mrf.mxu0 }
  0xeb   :  { %v174_v37 = vpop.f32.mrf.mxu0 }
  0xef   :  { %v182_v38 = vld [vmem:[#allocation2] sm:$0xff] }
  0xf0   :  { %v183_v39 = vpack.c.bf16 %v182_v38, %v182_v38 }
  0xf2   :  { %185 = vst.msk [vmem:[%s283_s4] sm:$0xf] %vm184_vm2, %v183_v39 }

// kernel: densenet_forward.33
= control target key start
LH: loop header
LB: loop body
LE: loop exit
PB: predicated region body
PF: predicated region fallthrough
CT: control target
= control target key end

     0   :  { %vm34_vm0 = vcmask 125952   ;;  %s74_s0 = inlined_call_operand.vmem [shape: bf16[8,16], index: 0, kind: input, shape index: {}]   ;;  %s75_s1 = inlined_call_operand.vmem [shape: f32[1,16], index: 1, kind: input, shape index: {}]   ;;  %s76_s2 = inlined_call_operand.vmem [shape: f32[1,16], index: 2, kind: input, shape index: {}]   ;;  %s77_s3 = inlined_call_operand.vmem [shape: bf16[8,16], index: 3, kind: output, shape index: {}]  }
   0x1   :  { %v14_v0 = vld [vmem:[%s74_s0] sm:$0xf] }
   0x2   :  { %v40_v1 = vld [vmem:[%s75_s1] ss:$0 sm:$0xff]  ;;  %v15_v2 = vunpack.c.l.bf16 %v14_v0 }
   0x3   :  { %v41_v3 = vld [vmem:[%s76_s2] ss:$0 sm:$0xff] }
   0x4   :  { %v23_v4 = vmul.f32 %v40_v1, %v15_v2 }
   0x6   :  { %v31_v5 = vadd.f32 %v41_v3, %v23_v4 }
   0x8   :  { %v32_v6 = vmax.f32 %v31_v5, 0.0 }
   0xa   :  { %v33_v7 = vpack.c.bf16 %v32_v6, %v32_v6 }
   0xc   :  { %35 = vst.msk [vmem:[%s77_s3] sm:$0xf] %vm34_vm0, %v33_v7 }

</bundles_post_ra>
